<compile_context>
chip_gen: v5e
topology: v5e:2x2
jax: 0.10.0
libtpu: 0.0.40
codegen_flags: <defaults>
</compile_context>

<pallas_src>
import functools

import numpy as np
import jax
import jax.numpy as jnp
from jax.experimental import pallas as pl
from jax.experimental.pallas import tpu as pltpu

BN_EPS = 1e-5


# --------------------------------------------------------------------------
# Host-side constants (numpy, built at trace time)
# --------------------------------------------------------------------------

def _bilinear_matrix(in_size, scale):
    """1-D interpolation matrix replicating nn.Upsample(mode='bilinear',
    align_corners=False) source-index computation (with edge clamping)."""
    out_size = in_size * scale
    dst = np.arange(out_size, dtype=np.float64)
    src = np.maximum((dst + 0.5) / float(scale) - 0.5, 0.0)
    lo = np.minimum(np.floor(src).astype(np.int64), in_size - 1)
    hi = np.minimum(lo + 1, in_size - 1)
    frac = (src - lo).astype(np.float32)
    a = np.zeros((out_size, in_size), np.float32)
    a[np.arange(out_size), lo] += 1.0 - frac
    a[np.arange(out_size), hi] += frac
    return a


def _upsample_matrix(h_in, w_in, scale):
    """(h_in*w_in, h_out*w_out) matrix G such that up2d(img).flat = img.flat @ G."""
    ah = _bilinear_matrix(h_in, scale)            # (h_out, h_in)
    aw = _bilinear_matrix(w_in, scale)            # (w_out, w_in)
    return jnp.asarray(np.kron(ah, aw).T)         # [hi*Wi+wi, ho*Wo+wo]


def _tap_masks(n, h, w):
    """(9, n*h*w) {0,1} masks: mask[t, p] == 1 iff the 3x3 tap t of pixel p lies
    inside the same image (zero-padding conv semantics).  Correctness of the
    lane-roll im2col relies on these masks zeroing every rolled value that
    crossed a row / image / wrap-around boundary."""
    hh = np.arange(h)
    ww = np.arange(w)
    m = np.zeros((9, n, h, w), np.float32)
    for dy in range(3):
        for dx in range(3):
            hv = ((hh + dy - 1) >= 0) & ((hh + dy - 1) < h)
            wv = ((ww + dx - 1) >= 0) & ((ww + dx - 1) < w)
            m[dy * 3 + dx] = (hv[:, None] & wv[None, :]).astype(np.float32)[None]
    return jnp.asarray(m.reshape(9, n * h * w))


def _tap_shifts(w_img, m_total):
    """Static lane-roll amounts so that roll(x, s, 1)[p] == x[(p + rel) % M]."""
    shifts = []
    for dy in range(3):
        for dx in range(3):
            rel = (dy - 1) * w_img + (dx - 1)
            shifts.append((-rel) % m_total)
    return tuple(shifts)


def _pack3x3(w):   # (Cout, Cin, 3, 3) -> (Cout, 9*Cin), column index = tap*Cin + cin
    co, ci = w.shape[0], w.shape[1]
    return jnp.transpose(w, (0, 2, 3, 1)).reshape(co, 9 * ci)


def _pack1x1(w):   # (Cout, Cin, 1, 1) -> (Cout, Cin)
    return w[:, :, 0, 0]


def _full_spec(shape):
    nd = len(shape)
    return pl.BlockSpec(tuple(shape), lambda i, _n=nd: (0,) * _n)


# --------------------------------------------------------------------------
# The single fused Pallas kernel
# --------------------------------------------------------------------------

def _pub_kernel(shifts, n_imgs, hw, inplanes, planes, inv_m,
                x_ref, pref_ref, skip_ref, gx_ref, gp_ref, mask_ref,
                w1_ref, w2_ref, wr1_ref, wr2_ref, wr3_ref, bn_ref,
                out_ref, xup_ref, cat_ref, tap_ref):
    f32 = jnp.float32
    masks = mask_ref[...]                      # (9, M)
    bnp = bn_ref[...]                          # (planes, 8) packed gamma/beta
    gx = gx_ref[...]                           # (HinWin, hw) upsample matrix (x)
    gp = gp_ref[...]                           # (HinWin, hw) upsample matrix (pref)
    m_total = n_imgs * hw
    ones_col = jnp.ones((m_total, 1), f32)     # MXU reduction vector

    def conv3x3(feat, w2d, c):
        """feat (c, M) -> (planes, M) via masked lane-rolled taps stacked into
        VMEM scratch + a single wide-K MXU dot with w2d (planes, 9*c)."""
        for t, s in enumerate(shifts):
            xt = feat if s == 0 else pltpu.roll(feat, s, 1)
            if t != 4:                         # centre tap mask is all-ones
                xt = xt * masks[t:t + 1, :]
            tap_ref[t * c:(t + 1) * c, :] = xt
        return jnp.dot(w2d, tap_ref[0:9 * c, :], preferred_element_type=f32)

    def batchnorm(y, col):
        """Training-mode BN (batch stats over all M interior pixels), one-pass
        E[y^2]-E[y]^2, sums computed on the MXU, folded into scale+shift."""
        gamma = bnp[:, col:col + 1]
        beta = bnp[:, col + 1:col + 2]
        s1 = jnp.dot(y, ones_col, preferred_element_type=f32) * inv_m
        s2 = jnp.dot(y * y, ones_col, preferred_element_type=f32) * inv_m
        var = jnp.maximum(s2 - s1 * s1, 0.0)
        scale = gamma * jax.lax.rsqrt(var + BN_EPS)
        return y * scale + (beta - s1 * scale)

    # ---- per-image: upsample1(x); conv2(1x1)+ReLU then upsample2(pref); skip copy
    w2 = w2_ref[...].astype(jnp.bfloat16)      # only real-K (512) dot -> bf16 MXU
    for n in range(n_imgs):
        lo, hi = n * hw, (n + 1) * hw
        xup_ref[:, lo:hi] = jnp.dot(x_ref[n], gx, preferred_element_type=f32)
        p1 = jnp.maximum(
            jnp.dot(w2, pref_ref[n].astype(jnp.bfloat16),
                    preferred_element_type=f32), 0.0)          # (planes, HinWin)
        cat_ref[2 * planes:3 * planes, lo:hi] = jnp.dot(
            p1, gp, preferred_element_type=f32)                # upsample2
        cat_ref[planes:2 * planes, lo:hi] = skip_ref[n]

    # ---- branch 1: conv1 = ConvBlock(3x3) = ReLU(BN(conv3x3(up1(x))))
    x1 = jnp.maximum(
        batchnorm(conv3x3(xup_ref[...], w1_ref[...], inplanes), 0), 0.0)
    cat_ref[0:planes, :] = x1                  # torch.cat([x, skip, pref], dim=1)

    # ---- ResBlk(3*planes -> planes), cat read once from VMEM for rb1 and rb3
    cat = cat_ref[...]
    h = jnp.maximum(
        batchnorm(conv3x3(cat, wr1_ref[...], 3 * planes), 2), 0.0)
    ident = batchnorm(
        jnp.dot(wr3_ref[...], cat, preferred_element_type=f32), 6)
    out = batchnorm(conv3x3(h, wr2_ref[...], planes), 4)
    out_ref[...] = jnp.maximum(out + ident, 0.0)


# --------------------------------------------------------------------------
# Parameters + forward
# --------------------------------------------------------------------------

def init_pub_params(key, inplanes=4, planes=4):
    ks = jax.random.split(key, 9)

    def conv_w(k, cout, cin, kh, kw):
        return 0.1 * jax.random.normal(k, (cout, cin, kh, kw), jnp.float32)

    def bn_p(k, c):
        k1, k2 = jax.random.split(k)
        return (1.0 + 0.1 * jax.random.normal(k1, (c,), jnp.float32),
                0.1 * jax.random.normal(k2, (c,), jnp.float32))

    p = {}
    p['conv1_w'] = conv_w(ks[0], planes, inplanes, 3, 3)        # PUB.conv1 (3x3)
    p['bn1_g'], p['bn1_b'] = bn_p(ks[1], planes)
    p['conv2_w'] = conv_w(ks[2], planes, 512, 1, 1)             # PUB.conv2 (1x1, no BN)
    p['rb1_w'] = conv_w(ks[3], planes, planes * 3, 3, 3)        # ResBlk.conv1
    p['rb1_g'], p['rb1_b'] = bn_p(ks[4], planes)
    p['rb2_w'] = conv_w(ks[5], planes, planes, 3, 3)            # ResBlk.conv2
    p['rb2_g'], p['rb2_b'] = bn_p(ks[6], planes)
    p['rb3_w'] = conv_w(ks[7], planes, planes * 3, 1, 1)        # ResBlk.conv3 (downsample)
    p['rb3_g'], p['rb3_b'] = bn_p(ks[8], planes)
    return p


def pub_forward(params, x, skip, preference, size=2):
    N, inplanes, Hx, Wx = x.shape
    planes = params['conv1_w'].shape[0]
    assert params['conv1_w'].shape[1] == inplanes
    up1 = 32 if size == 32 else 2
    H1, W1 = Hx * up1, Wx * up1
    Np, Cp, Hp2, Wp2 = preference.shape
    assert Np == N and (Hp2 * size, Wp2 * size) == (H1, W1)
    assert skip.shape == (N, planes, H1, W1)
    HW = H1 * W1                               # (multiple of 128 keeps lane slices aligned)
    M = N * HW

    # static constants (become on-device constants of the jitted graph)
    gx = _upsample_matrix(Hx, Wx, up1)
    gp = gx if (Hp2, Wp2, size) == (Hx, Wx, up1) else _upsample_matrix(Hp2, Wp2, size)
    masks = _tap_masks(N, H1, W1)
    shifts = _tap_shifts(W1, M)

    # pre-packed 2-D weights (Cout, taps*Cin) and packed BN gamma/beta columns
    w1 = _pack3x3(params['conv1_w'])
    w2 = _pack1x1(params['conv2_w'])
    wr1 = _pack3x3(params['rb1_w'])
    wr2 = _pack3x3(params['rb2_w'])
    wr3 = _pack1x1(params['rb3_w'])
    bn = jnp.stack([params['bn1_g'], params['bn1_b'],
                    params['rb1_g'], params['rb1_b'],
                    params['rb2_g'], params['rb2_b'],
                    params['rb3_g'], params['rb3_b']], axis=1)  # (planes, 8)

    # cheap input formatting only (no transposes of preference, no pads)
    x2 = x.reshape(N, inplanes, Hx * Wx)
    pref2 = preference.reshape(N, Cp, Hp2 * Wp2)
    skip2 = skip.reshape(N, planes, HW)

    kernel = functools.partial(_pub_kernel, shifts, N, HW, inplanes, planes,
                               1.0 / float(M))

    args = [x2, pref2, skip2, gx, gp, masks, w1, w2, wr1, wr2, wr3, bn]
    out_flat = pl.pallas_call(
        kernel,
        out_shape=jax.ShapeDtypeStruct((planes, M), jnp.float32),
        grid=(1,),
        in_specs=[_full_spec(a.shape) for a in args],
        out_specs=_full_spec((planes, M)),
        scratch_shapes=[
            pltpu.VMEM((inplanes, M), jnp.float32),                      # x upsampled
            pltpu.VMEM((3 * planes, M), jnp.float32),                    # cat
            pltpu.VMEM((9 * max(inplanes, 3 * planes), M), jnp.float32),  # tap stack
        ],
        compiler_params=pltpu.CompilerParams(
            dimension_semantics=("arbitrary",)),
    )(*args)

    return out_flat.reshape(planes, N, H1, W1).transpose(1, 0, 2, 3)


# --------------------------------------------------------------------------

if __name__ == "__main__":
    inplanes, planes, size = 4, 4, 2
    key = jax.random.PRNGKey(0)
    kx, ks, kp, kw = jax.random.split(key, 4)

    # x -> upsample x2 -> 16x16 ; preference -> 1x1 conv -> upsample x size -> 16x16
    x = jax.random.normal(kx, (2, inplanes, 8, 8), jnp.float32)
    skip = jax.random.normal(ks, (2, planes, 16, 16), jnp.float32)
    preference = jax.random.normal(kp, (2, 512, 8, 8), jnp.float32)
    params = init_pub_params(kw, inplanes, planes)

    fwd = jax.jit(functools.partial(pub_forward, size=size))
    out = jax.block_until_ready(fwd(params, x, skip, preference))
    assert out.shape == (2, planes, 16, 16), out.shape
    assert bool(jnp.all(jnp.isfinite(out)))
    print("KERNEL_OK")
</pallas_src>

<mosaic_0001>
module attributes {stable_mosaic.version = 11 : i64} {
  func.func @_pub_kernel(%arg0: i32, %arg1: memref<2x4x64xf32, #tpu.memory_space<vmem>>, %arg2: memref<2x512x64xf32, #tpu.memory_space<vmem>>, %arg3: memref<2x4x256xf32, #tpu.memory_space<vmem>>, %arg4: memref<64x256xf32, #tpu.memory_space<vmem>>, %arg5: memref<64x256xf32, #tpu.memory_space<vmem>>, %arg6: memref<9x512xf32, #tpu.memory_space<vmem>>, %arg7: memref<4x36xf32, #tpu.memory_space<vmem>>, %arg8: memref<4x512xf32, #tpu.memory_space<vmem>>, %arg9: memref<4x108xf32, #tpu.memory_space<vmem>>, %arg10: memref<4x36xf32, #tpu.memory_space<vmem>>, %arg11: memref<4x12xf32, #tpu.memory_space<vmem>>, %arg12: memref<4x8xf32, #tpu.memory_space<vmem>>, %arg13: memref<4x512xf32, #tpu.memory_space<vmem>>, %arg14: memref<4x512xf32, #tpu.memory_space<vmem>>, %arg15: memref<12x512xf32, #tpu.memory_space<vmem>>, %arg16: memref<108x512xf32, #tpu.memory_space<vmem>>) attributes {dimension_semantics = [#tpu.dimension_semantics<arbitrary>], iteration_bounds = array<i64: 1>, scalar_prefetch = 0 : i64, scratch_operands = 3 : i64, tpu.core_type = #tpu.core_type<tc>, window_params = [{pipeline_mode = #tpu.pipeline_mode<synchronous>, transform_indices = @transform_0, window_bounds = array<i64: 2, 4, 64>}, {pipeline_mode = #tpu.pipeline_mode<synchronous>, transform_indices = @transform_1, window_bounds = array<i64: 2, 512, 64>}, {pipeline_mode = #tpu.pipeline_mode<synchronous>, transform_indices = @transform_2, window_bounds = array<i64: 2, 4, 256>}, {pipeline_mode = #tpu.pipeline_mode<synchronous>, transform_indices = @transform_3, window_bounds = array<i64: 64, 256>}, {pipeline_mode = #tpu.pipeline_mode<synchronous>, transform_indices = @transform_4, window_bounds = array<i64: 64, 256>}, {pipeline_mode = #tpu.pipeline_mode<synchronous>, transform_indices = @transform_5, window_bounds = array<i64: 9, 512>}, {pipeline_mode = #tpu.pipeline_mode<synchronous>, transform_indices = @transform_6, window_bounds = array<i64: 4, 36>}, {pipeline_mode = #tpu.pipeline_mode<synchronous>, transform_indices = @transform_7, window_bounds = array<i64: 4, 512>}, {pipeline_mode = #tpu.pipeline_mode<synchronous>, transform_indices = @transform_8, window_bounds = array<i64: 4, 108>}, {pipeline_mode = #tpu.pipeline_mode<synchronous>, transform_indices = @transform_9, window_bounds = array<i64: 4, 36>}, {pipeline_mode = #tpu.pipeline_mode<synchronous>, transform_indices = @transform_10, window_bounds = array<i64: 4, 12>}, {pipeline_mode = #tpu.pipeline_mode<synchronous>, transform_indices = @transform_11, window_bounds = array<i64: 4, 8>}, {pipeline_mode = #tpu.pipeline_mode<synchronous>, transform_indices = @transform_12, window_bounds = array<i64: 4, 512>}]} {
    %c0 = arith.constant 0 : index
    %c0_0 = arith.constant 0 : index
    %0 = vector.load %arg6[%c0, %c0_0] : memref<9x512xf32, #tpu.memory_space<vmem>>, vector<9x512xf32>
    %c0_1 = arith.constant 0 : index
    %c0_2 = arith.constant 0 : index
    %1 = vector.load %arg12[%c0_1, %c0_2] : memref<4x8xf32, #tpu.memory_space<vmem>>, vector<4x8xf32>
    %c0_3 = arith.constant 0 : index
    %c0_4 = arith.constant 0 : index
    %2 = vector.load %arg4[%c0_3, %c0_4] : memref<64x256xf32, #tpu.memory_space<vmem>>, vector<64x256xf32>
    %c0_5 = arith.constant 0 : index
    %c0_6 = arith.constant 0 : index
    %3 = vector.load %arg5[%c0_5, %c0_6] : memref<64x256xf32, #tpu.memory_space<vmem>>, vector<64x256xf32>
    %cst = arith.constant 1.000000e+00 : f32
    %4 = vector.broadcast %cst : f32 to vector<512x1xf32>
    %c0_7 = arith.constant 0 : index
    %c0_8 = arith.constant 0 : index
    %5 = vector.load %arg8[%c0_7, %c0_8] : memref<4x512xf32, #tpu.memory_space<vmem>>, vector<4x512xf32>
    %6 = arith.truncf %5 : vector<4x512xf32> to vector<4x512xbf16>
    %c0_9 = arith.constant 0 : index
    %c0_10 = arith.constant 0 : index
    %c0_11 = arith.constant 0 : index
    %7 = vector.load %arg1[%c0_9, %c0_10, %c0_11] : memref<2x4x64xf32, #tpu.memory_space<vmem>>, vector<1x4x64xf32>
    %8 = vector.shape_cast %7 : vector<1x4x64xf32> to vector<4x64xf32>
    %cst_12 = arith.constant dense<0.000000e+00> : vector<4x256xf32>
    %9 = tpu.matmul %8, %2, %cst_12 {dimension_numbers = #tpu.dot_dimension_numbers<[1], [0], [0], [1], [0, 0, 1, 1], [], []>} : vector<4x64xf32>, vector<64x256xf32>, vector<4x256xf32> -> vector<4x256xf32>
    %c0_13 = arith.constant 0 : index
    %c0_14 = arith.constant 0 : index
    %10 = vector.load %arg14[%c0_13, %c0_14] : memref<4x512xf32, #tpu.memory_space<vmem>>, vector<4x256xf32>
    tpu.vector_store %arg14[%c0_13, %c0_14], %9 {strides = array<i32>} : memref<4x512xf32, #tpu.memory_space<vmem>>, vector<4x256xf32>,
    %c0_15 = arith.constant 0 : index
    %c0_16 = arith.constant 0 : index
    %c0_17 = arith.constant 0 : index
    %11 = vector.load %arg2[%c0_15, %c0_16, %c0_17] : memref<2x512x64xf32, #tpu.memory_space<vmem>>, vector<1x512x64xf32>
    %12 = vector.shape_cast %11 : vector<1x512x64xf32> to vector<512x64xf32>
    %13 = arith.truncf %12 : vector<512x64xf32> to vector<512x64xbf16>
    %cst_18 = arith.constant dense<0.000000e+00> : vector<4x64xf32>
    %14 = tpu.matmul %6, %13, %cst_18 {dimension_numbers = #tpu.dot_dimension_numbers<[1], [0], [0], [1], [0, 0, 1, 1], [], []>} : vector<4x512xbf16>, vector<512x64xbf16>, vector<4x64xf32> -> vector<4x64xf32>
    %cst_19 = arith.constant 0.000000e+00 : f32
    %15 = vector.broadcast %cst_19 : f32 to vector<4x64xf32>
    %16 = arith.maximumf %14, %15 : vector<4x64xf32>
    %cst_20 = arith.constant dense<0.000000e+00> : vector<4x256xf32>
    %17 = tpu.matmul %16, %3, %cst_20 {dimension_numbers = #tpu.dot_dimension_numbers<[1], [0], [0], [1], [0, 0, 1, 1], [], []>} : vector<4x64xf32>, vector<64x256xf32>, vector<4x256xf32> -> vector<4x256xf32>
    %c8 = arith.constant 8 : index
    %c0_21 = arith.constant 0 : index
    %18 = vector.load %arg15[%c8, %c0_21] : memref<12x512xf32, #tpu.memory_space<vmem>>, vector<4x256xf32>
    tpu.vector_store %arg15[%c8, %c0_21], %17 {strides = array<i32>} : memref<12x512xf32, #tpu.memory_space<vmem>>, vector<4x256xf32>,
    %c0_22 = arith.constant 0 : index
    %c0_23 = arith.constant 0 : index
    %c0_24 = arith.constant 0 : index
    %19 = vector.load %arg3[%c0_22, %c0_23, %c0_24] : memref<2x4x256xf32, #tpu.memory_space<vmem>>, vector<1x4x256xf32>
    %20 = vector.shape_cast %19 : vector<1x4x256xf32> to vector<4x256xf32>
    %c4 = arith.constant 4 : index
    %c0_25 = arith.constant 0 : index
    %21 = vector.load %arg15[%c4, %c0_25] : memref<12x512xf32, #tpu.memory_space<vmem>>, vector<4x256xf32>
    tpu.vector_store %arg15[%c4, %c0_25], %20 {strides = array<i32>} : memref<12x512xf32, #tpu.memory_space<vmem>>, vector<4x256xf32>,
    %c1 = arith.constant 1 : index
    %c0_26 = arith.constant 0 : index
    %c0_27 = arith.constant 0 : index
    %22 = vector.load %arg1[%c1, %c0_26, %c0_27] : memref<2x4x64xf32, #tpu.memory_space<vmem>>, vector<1x4x64xf32>
    %23 = vector.shape_cast %22 : vector<1x4x64xf32> to vector<4x64xf32>
    %cst_28 = arith.constant dense<0.000000e+00> : vector<4x256xf32>
    %24 = tpu.matmul %23, %2, %cst_28 {dimension_numbers = #tpu.dot_dimension_numbers<[1], [0], [0], [1], [0, 0, 1, 1], [], []>} : vector<4x64xf32>, vector<64x256xf32>, vector<4x256xf32> -> vector<4x256xf32>
    %c0_29 = arith.constant 0 : index
    %c256 = arith.constant 256 : index
    %25 = vector.load %arg14[%c0_29, %c256] : memref<4x512xf32, #tpu.memory_space<vmem>>, vector<4x256xf32>
    tpu.vector_store %arg14[%c0_29, %c256], %24 {strides = array<i32>} : memref<4x512xf32, #tpu.memory_space<vmem>>, vector<4x256xf32>,
    %c1_30 = arith.constant 1 : index
    %c0_31 = arith.constant 0 : index
    %c0_32 = arith.constant 0 : index
    %26 = vector.load %arg2[%c1_30, %c0_31, %c0_32] : memref<2x512x64xf32, #tpu.memory_space<vmem>>, vector<1x512x64xf32>
    %27 = vector.shape_cast %26 : vector<1x512x64xf32> to vector<512x64xf32>
    %28 = arith.truncf %27 : vector<512x64xf32> to vector<512x64xbf16>
    %cst_33 = arith.constant dense<0.000000e+00> : vector<4x64xf32>
    %29 = tpu.matmul %6, %28, %cst_33 {dimension_numbers = #tpu.dot_dimension_numbers<[1], [0], [0], [1], [0, 0, 1, 1], [], []>} : vector<4x512xbf16>, vector<512x64xbf16>, vector<4x64xf32> -> vector<4x64xf32>
    %cst_34 = arith.constant 0.000000e+00 : f32
    %30 = vector.broadcast %cst_34 : f32 to vector<4x64xf32>
    %31 = arith.maximumf %29, %30 : vector<4x64xf32>
    %cst_35 = arith.constant dense<0.000000e+00> : vector<4x256xf32>
    %32 = tpu.matmul %31, %3, %cst_35 {dimension_numbers = #tpu.dot_dimension_numbers<[1], [0], [0], [1], [0, 0, 1, 1], [], []>} : vector<4x64xf32>, vector<64x256xf32>, vector<4x256xf32> -> vector<4x256xf32>
    %c8_36 = arith.constant 8 : index
    %c256_37 = arith.constant 256 : index
    %33 = vector.load %arg15[%c8_36, %c256_37] : memref<12x512xf32, #tpu.memory_space<vmem>>, vector<4x256xf32>
    tpu.vector_store %arg15[%c8_36, %c256_37], %32 {strides = array<i32>} : memref<12x512xf32, #tpu.memory_space<vmem>>, vector<4x256xf32>,
    %c1_38 = arith.constant 1 : index
    %c0_39 = arith.constant 0 : index
    %c0_40 = arith.constant 0 : index
    %34 = vector.load %arg3[%c1_38, %c0_39, %c0_40] : memref<2x4x256xf32, #tpu.memory_space<vmem>>, vector<1x4x256xf32>
    %35 = vector.shape_cast %34 : vector<1x4x256xf32> to vector<4x256xf32>
    %c4_41 = arith.constant 4 : index
    %c256_42 = arith.constant 256 : index
    %36 = vector.load %arg15[%c4_41, %c256_42] : memref<12x512xf32, #tpu.memory_space<vmem>>, vector<4x256xf32>
    tpu.vector_store %arg15[%c4_41, %c256_42], %35 {strides = array<i32>} : memref<12x512xf32, #tpu.memory_space<vmem>>, vector<4x256xf32>,
    %c0_43 = arith.constant 0 : index
    %c0_44 = arith.constant 0 : index
    %37 = vector.load %arg14[%c0_43, %c0_44] : memref<4x512xf32, #tpu.memory_space<vmem>>, vector<4x512xf32>
    %c0_45 = arith.constant 0 : index
    %c0_46 = arith.constant 0 : index
    %38 = vector.load %arg7[%c0_45, %c0_46] : memref<4x36xf32, #tpu.memory_space<vmem>>, vector<4x36xf32>
    %c17_i32 = arith.constant 17 : i32
    %39 = tpu.dynamic_rotate %37 by %c17_i32 dim 1 : vector<4x512xf32>, i32 -> vector<4x512xf32>
    %40 = vector.extract_strided_slice %0 {offsets = [0, 0], sizes = [1, 512], strides = [1, 1]} : vector<9x512xf32> to vector<1x512xf32>
    %41 = vector.broadcast %40 : vector<1x512xf32> to vector<4x512xf32>
    %42 = arith.mulf %39, %41 : vector<4x512xf32>
    %c0_47 = arith.constant 0 : index
    %c0_48 = arith.constant 0 : index
    %43 = vector.load %arg16[%c0_47, %c0_48] : memref<108x512xf32, #tpu.memory_space<vmem>>, vector<4x512xf32>
    tpu.vector_store %arg16[%c0_47, %c0_48], %42 {strides = array<i32>} : memref<108x512xf32, #tpu.memory_space<vmem>>, vector<4x512xf32>,
    %c16_i32 = arith.constant 16 : i32
    %44 = tpu.dynamic_rotate %37 by %c16_i32 dim 1 : vector<4x512xf32>, i32 -> vector<4x512xf32>
    %45 = vector.extract_strided_slice %0 {offsets = [1, 0], sizes = [1, 512], strides = [1, 1]} : vector<9x512xf32> to vector<1x512xf32>
    %46 = vector.broadcast %45 : vector<1x512xf32> to vector<4x512xf32>
    %47 = arith.mulf %44, %46 : vector<4x512xf32>
    %c4_49 = arith.constant 4 : index
    %c0_50 = arith.constant 0 : index
    %48 = vector.load %arg16[%c4_49, %c0_50] : memref<108x512xf32, #tpu.memory_space<vmem>>, vector<4x512xf32>
    tpu.vector_store %arg16[%c4_49, %c0_50], %47 {strides = array<i32>} : memref<108x512xf32, #tpu.memory_space<vmem>>, vector<4x512xf32>,
    %c15_i32 = arith.constant 15 : i32
    %49 = tpu.dynamic_rotate %37 by %c15_i32 dim 1 : vector<4x512xf32>, i32 -> vector<4x512xf32>
    %50 = vector.extract_strided_slice %0 {offsets = [2, 0], sizes = [1, 512], strides = [1, 1]} : vector<9x512xf32> to vector<1x512xf32>
    %51 = vector.broadcast %50 : vector<1x512xf32> to vector<4x512xf32>
    %52 = arith.mulf %49, %51 : vector<4x512xf32>
    %c8_51 = arith.constant 8 : index
    %c0_52 = arith.constant 0 : index
    %53 = vector.load %arg16[%c8_51, %c0_52] : memref<108x512xf32, #tpu.memory_space<vmem>>, vector<4x512xf32>
    tpu.vector_store %arg16[%c8_51, %c0_52], %52 {strides = array<i32>} : memref<108x512xf32, #tpu.memory_space<vmem>>, vector<4x512xf32>,
    %c1_i32 = arith.constant 1 : i32
    %54 = tpu.dynamic_rotate %37 by %c1_i32 dim 1 : vector<4x512xf32>, i32 -> vector<4x512xf32>
    %55 = vector.extract_strided_slice %0 {offsets = [3, 0], sizes = [1, 512], strides = [1, 1]} : vector<9x512xf32> to vector<1x512xf32>
    %56 = vector.broadcast %55 : vector<1x512xf32> to vector<4x512xf32>
    %57 = arith.mulf %54, %56 : vector<4x512xf32>
    %c12 = arith.constant 12 : index
    %c0_53 = arith.constant 0 : index
    %58 = vector.load %arg16[%c12, %c0_53] : memref<108x512xf32, #tpu.memory_space<vmem>>, vector<4x512xf32>
    tpu.vector_store %arg16[%c12, %c0_53], %57 {strides = array<i32>} : memref<108x512xf32, #tpu.memory_space<vmem>>, vector<4x512xf32>,
    %c16 = arith.constant 16 : index
    %c0_54 = arith.constant 0 : index
    %59 = vector.load %arg16[%c16, %c0_54] : memref<108x512xf32, #tpu.memory_space<vmem>>, vector<4x512xf32>
    tpu.vector_store %arg16[%c16, %c0_54], %37 {strides = array<i32>} : memref<108x512xf32, #tpu.memory_space<vmem>>, vector<4x512xf32>,
    %c511_i32 = arith.constant 511 : i32
    %60 = tpu.dynamic_rotate %37 by %c511_i32 dim 1 : vector<4x512xf32>, i32 -> vector<4x512xf32>
    %61 = vector.extract_strided_slice %0 {offsets = [5, 0], sizes = [1, 512], strides = [1, 1]} : vector<9x512xf32> to vector<1x512xf32>
    %62 = vector.broadcast %61 : vector<1x512xf32> to vector<4x512xf32>
    %63 = arith.mulf %60, %62 : vector<4x512xf32>
    %c20 = arith.constant 20 : index
    %c0_55 = arith.constant 0 : index
    %64 = vector.load %arg16[%c20, %c0_55] : memref<108x512xf32, #tpu.memory_space<vmem>>, vector<4x512xf32>
    tpu.vector_store %arg16[%c20, %c0_55], %63 {strides = array<i32>} : memref<108x512xf32, #tpu.memory_space<vmem>>, vector<4x512xf32>,
    %c497_i32 = arith.constant 497 : i32
    %65 = tpu.dynamic_rotate %37 by %c497_i32 dim 1 : vector<4x512xf32>, i32 -> vector<4x512xf32>
    %66 = vector.extract_strided_slice %0 {offsets = [6, 0], sizes = [1, 512], strides = [1, 1]} : vector<9x512xf32> to vector<1x512xf32>
    %67 = vector.broadcast %66 : vector<1x512xf32> to vector<4x512xf32>
    %68 = arith.mulf %65, %67 : vector<4x512xf32>
    %c24 = arith.constant 24 : index
    %c0_56 = arith.constant 0 : index
    %69 = vector.load %arg16[%c24, %c0_56] : memref<108x512xf32, #tpu.memory_space<vmem>>, vector<4x512xf32>
    tpu.vector_store %arg16[%c24, %c0_56], %68 {strides = array<i32>} : memref<108x512xf32, #tpu.memory_space<vmem>>, vector<4x512xf32>,
    %c496_i32 = arith.constant 496 : i32
    %70 = tpu.dynamic_rotate %37 by %c496_i32 dim 1 : vector<4x512xf32>, i32 -> vector<4x512xf32>
    %71 = vector.extract_strided_slice %0 {offsets = [7, 0], sizes = [1, 512], strides = [1, 1]} : vector<9x512xf32> to vector<1x512xf32>
    %72 = vector.broadcast %71 : vector<1x512xf32> to vector<4x512xf32>
    %73 = arith.mulf %70, %72 : vector<4x512xf32>
    %c28 = arith.constant 28 : index
    %c0_57 = arith.constant 0 : index
    %74 = vector.load %arg16[%c28, %c0_57] : memref<108x512xf32, #tpu.memory_space<vmem>>, vector<4x512xf32>
    tpu.vector_store %arg16[%c28, %c0_57], %73 {strides = array<i32>} : memref<108x512xf32, #tpu.memory_space<vmem>>, vector<4x512xf32>,
    %c495_i32 = arith.constant 495 : i32
    %75 = tpu.dynamic_rotate %37 by %c495_i32 dim 1 : vector<4x512xf32>, i32 -> vector<4x512xf32>
    %76 = vector.extract_strided_slice %0 {offsets = [8, 0], sizes = [1, 512], strides = [1, 1]} : vector<9x512xf32> to vector<1x512xf32>
    %77 = vector.broadcast %76 : vector<1x512xf32> to vector<4x512xf32>
    %78 = arith.mulf %75, %77 : vector<4x512xf32>
    %c32 = arith.constant 32 : index
    %c0_58 = arith.constant 0 : index
    %79 = vector.load %arg16[%c32, %c0_58] : memref<108x512xf32, #tpu.memory_space<vmem>>, vector<4x512xf32>
    tpu.vector_store %arg16[%c32, %c0_58], %78 {strides = array<i32>} : memref<108x512xf32, #tpu.memory_space<vmem>>, vector<4x512xf32>,
    %c0_59 = arith.constant 0 : index
    %c0_60 = arith.constant 0 : index
    %80 = vector.load %arg16[%c0_59, %c0_60] : memref<108x512xf32, #tpu.memory_space<vmem>>, vector<36x512xf32>
    %cst_61 = arith.constant dense<0.000000e+00> : vector<4x512xf32>
    %81 = tpu.matmul %38, %80, %cst_61 {dimension_numbers = #tpu.dot_dimension_numbers<[1], [0], [0], [1], [0, 0, 1, 1], [], []>} : vector<4x36xf32>, vector<36x512xf32>, vector<4x512xf32> -> vector<4x512xf32>
    %82 = vector.extract_strided_slice %1 {offsets = [0, 0], sizes = [4, 1], strides = [1, 1]} : vector<4x8xf32> to vector<4x1xf32>
    %83 = vector.extract_strided_slice %1 {offsets = [0, 1], sizes = [4, 1], strides = [1, 1]} : vector<4x8xf32> to vector<4x1xf32>
    %cst_62 = arith.constant dense<0.000000e+00> : vector<4x1xf32>
    %84 = tpu.matmul %81, %4, %cst_62 {dimension_numbers = #tpu.dot_dimension_numbers<[1], [0], [0], [1], [0, 0, 1, 1], [], []>} : vector<4x512xf32>, vector<512x1xf32>, vector<4x1xf32> -> vector<4x1xf32>
    %cst_63 = arith.constant 0.001953125 : f32
    %85 = vector.broadcast %cst_63 : f32 to vector<4x1xf32>
    %86 = arith.mulf %84, %85 : vector<4x1xf32>
    %87 = arith.mulf %81, %81 : vector<4x512xf32>
    %cst_64 = arith.constant dense<0.000000e+00> : vector<4x1xf32>
    %88 = tpu.matmul %87, %4, %cst_64 {dimension_numbers = #tpu.dot_dimension_numbers<[1], [0], [0], [1], [0, 0, 1, 1], [], []>} : vector<4x512xf32>, vector<512x1xf32>, vector<4x1xf32> -> vector<4x1xf32>
    %cst_65 = arith.constant 0.001953125 : f32
    %89 = vector.broadcast %cst_65 : f32 to vector<4x1xf32>
    %90 = arith.mulf %88, %89 : vector<4x1xf32>
    %91 = arith.mulf %86, %86 : vector<4x1xf32>
    %92 = arith.subf %90, %91 : vector<4x1xf32>
    %cst_66 = arith.constant 0.000000e+00 : f32
    %93 = vector.broadcast %cst_66 : f32 to vector<4x1xf32>
    %94 = arith.maximumf %92, %93 : vector<4x1xf32>
    %cst_67 = arith.constant 9.99999974E-6 : f32
    %95 = vector.broadcast %cst_67 : f32 to vector<4x1xf32>
    %96 = arith.addf %94, %95 : vector<4x1xf32>
    %97 = math.rsqrt %96 : vector<4x1xf32>
    %98 = arith.mulf %82, %97 : vector<4x1xf32>
    %99 = vector.broadcast %98 : vector<4x1xf32> to vector<4x512xf32>
    %100 = arith.mulf %81, %99 : vector<4x512xf32>
    %101 = arith.mulf %86, %98 : vector<4x1xf32>
    %102 = arith.subf %83, %101 : vector<4x1xf32>
    %103 = vector.broadcast %102 : vector<4x1xf32> to vector<4x512xf32>
    %104 = arith.addf %100, %103 : vector<4x512xf32>
    %cst_68 = arith.constant 0.000000e+00 : f32
    %105 = vector.broadcast %cst_68 : f32 to vector<4x512xf32>
    %106 = arith.maximumf %104, %105 : vector<4x512xf32>
    %c0_69 = arith.constant 0 : index
    %c0_70 = arith.constant 0 : index
    %107 = vector.load %arg15[%c0_69, %c0_70] : memref<12x512xf32, #tpu.memory_space<vmem>>, vector<4x512xf32>
    tpu.vector_store %arg15[%c0_69, %c0_70], %106 {strides = array<i32>} : memref<12x512xf32, #tpu.memory_space<vmem>>, vector<4x512xf32>,
    %c0_71 = arith.constant 0 : index
    %c0_72 = arith.constant 0 : index
    %108 = vector.load %arg15[%c0_71, %c0_72] : memref<12x512xf32, #tpu.memory_space<vmem>>, vector<12x512xf32>
    %c0_73 = arith.constant 0 : index
    %c0_74 = arith.constant 0 : index
    %109 = vector.load %arg9[%c0_73, %c0_74] : memref<4x108xf32, #tpu.memory_space<vmem>>, vector<4x108xf32>
    %c17_i32_75 = arith.constant 17 : i32
    %110 = tpu.dynamic_rotate %108 by %c17_i32_75 dim 1 : vector<12x512xf32>, i32 -> vector<12x512xf32>
    %111 = vector.extract_strided_slice %0 {offsets = [0, 0], sizes = [1, 512], strides = [1, 1]} : vector<9x512xf32> to vector<1x512xf32>
    %112 = vector.broadcast %111 : vector<1x512xf32> to vector<12x512xf32>
    %113 = arith.mulf %110, %112 : vector<12x512xf32>
    %c0_76 = arith.constant 0 : index
    %c0_77 = arith.constant 0 : index
    %114 = vector.load %arg16[%c0_76, %c0_77] : memref<108x512xf32, #tpu.memory_space<vmem>>, vector<12x512xf32>
    tpu.vector_store %arg16[%c0_76, %c0_77], %113 {strides = array<i32>} : memref<108x512xf32, #tpu.memory_space<vmem>>, vector<12x512xf32>,
    %c16_i32_78 = arith.constant 16 : i32
    %115 = tpu.dynamic_rotate %108 by %c16_i32_78 dim 1 : vector<12x512xf32>, i32 -> vector<12x512xf32>
    %116 = vector.extract_strided_slice %0 {offsets = [1, 0], sizes = [1, 512], strides = [1, 1]} : vector<9x512xf32> to vector<1x512xf32>
    %117 = vector.broadcast %116 : vector<1x512xf32> to vector<12x512xf32>
    %118 = arith.mulf %115, %117 : vector<12x512xf32>
    %c12_79 = arith.constant 12 : index
    %c0_80 = arith.constant 0 : index
    %119 = vector.load %arg16[%c12_79, %c0_80] : memref<108x512xf32, #tpu.memory_space<vmem>>, vector<12x512xf32>
    tpu.vector_store %arg16[%c12_79, %c0_80], %118 {strides = array<i32>} : memref<108x512xf32, #tpu.memory_space<vmem>>, vector<12x512xf32>,
    %c15_i32_81 = arith.constant 15 : i32
    %120 = tpu.dynamic_rotate %108 by %c15_i32_81 dim 1 : vector<12x512xf32>, i32 -> vector<12x512xf32>
    %121 = vector.extract_strided_slice %0 {offsets = [2, 0], sizes = [1, 512], strides = [1, 1]} : vector<9x512xf32> to vector<1x512xf32>
    %122 = vector.broadcast %121 : vector<1x512xf32> to vector<12x512xf32>
    %123 = arith.mulf %120, %122 : vector<12x512xf32>
    %c24_82 = arith.constant 24 : index
    %c0_83 = arith.constant 0 : index
    %124 = vector.load %arg16[%c24_82, %c0_83] : memref<108x512xf32, #tpu.memory_space<vmem>>, vector<12x512xf32>
    tpu.vector_store %arg16[%c24_82, %c0_83], %123 {strides = array<i32>} : memref<108x512xf32, #tpu.memory_space<vmem>>, vector<12x512xf32>,
    %c1_i32_84 = arith.constant 1 : i32
    %125 = tpu.dynamic_rotate %108 by %c1_i32_84 dim 1 : vector<12x512xf32>, i32 -> vector<12x512xf32>
    %126 = vector.extract_strided_slice %0 {offsets = [3, 0], sizes = [1, 512], strides = [1, 1]} : vector<9x512xf32> to vector<1x512xf32>
    %127 = vector.broadcast %126 : vector<1x512xf32> to vector<12x512xf32>
    %128 = arith.mulf %125, %127 : vector<12x512xf32>
    %c36 = arith.constant 36 : index
    %c0_85 = arith.constant 0 : index
    %129 = vector.load %arg16[%c36, %c0_85] : memref<108x512xf32, #tpu.memory_space<vmem>>, vector<12x512xf32>
    tpu.vector_store %arg16[%c36, %c0_85], %128 {strides = array<i32>} : memref<108x512xf32, #tpu.memory_space<vmem>>, vector<12x512xf32>,
    %c48 = arith.constant 48 : index
    %c0_86 = arith.constant 0 : index
    %130 = vector.load %arg16[%c48, %c0_86] : memref<108x512xf32, #tpu.memory_space<vmem>>, vector<12x512xf32>
    tpu.vector_store %arg16[%c48, %c0_86], %108 {strides = array<i32>} : memref<108x512xf32, #tpu.memory_space<vmem>>, vector<12x512xf32>,
    %c511_i32_87 = arith.constant 511 : i32
    %131 = tpu.dynamic_rotate %108 by %c511_i32_87 dim 1 : vector<12x512xf32>, i32 -> vector<12x512xf32>
    %132 = vector.extract_strided_slice %0 {offsets = [5, 0], sizes = [1, 512], strides = [1, 1]} : vector<9x512xf32> to vector<1x512xf32>
    %133 = vector.broadcast %132 : vector<1x512xf32> to vector<12x512xf32>
    %134 = arith.mulf %131, %133 : vector<12x512xf32>
    %c60 = arith.constant 60 : index
    %c0_88 = arith.constant 0 : index
    %135 = vector.load %arg16[%c60, %c0_88] : memref<108x512xf32, #tpu.memory_space<vmem>>, vector<12x512xf32>
    tpu.vector_store %arg16[%c60, %c0_88], %134 {strides = array<i32>} : memref<108x512xf32, #tpu.memory_space<vmem>>, vector<12x512xf32>,
    %c497_i32_89 = arith.constant 497 : i32
    %136 = tpu.dynamic_rotate %108 by %c497_i32_89 dim 1 : vector<12x512xf32>, i32 -> vector<12x512xf32>
    %137 = vector.extract_strided_slice %0 {offsets = [6, 0], sizes = [1, 512], strides = [1, 1]} : vector<9x512xf32> to vector<1x512xf32>
    %138 = vector.broadcast %137 : vector<1x512xf32> to vector<12x512xf32>
    %139 = arith.mulf %136, %138 : vector<12x512xf32>
    %c72 = arith.constant 72 : index
    %c0_90 = arith.constant 0 : index
    %140 = vector.load %arg16[%c72, %c0_90] : memref<108x512xf32, #tpu.memory_space<vmem>>, vector<12x512xf32>
    tpu.vector_store %arg16[%c72, %c0_90], %139 {strides = array<i32>} : memref<108x512xf32, #tpu.memory_space<vmem>>, vector<12x512xf32>,
    %c496_i32_91 = arith.constant 496 : i32
    %141 = tpu.dynamic_rotate %108 by %c496_i32_91 dim 1 : vector<12x512xf32>, i32 -> vector<12x512xf32>
    %142 = vector.extract_strided_slice %0 {offsets = [7, 0], sizes = [1, 512], strides = [1, 1]} : vector<9x512xf32> to vector<1x512xf32>
    %143 = vector.broadcast %142 : vector<1x512xf32> to vector<12x512xf32>
    %144 = arith.mulf %141, %143 : vector<12x512xf32>
    %c84 = arith.constant 84 : index
    %c0_92 = arith.constant 0 : index
    %145 = vector.load %arg16[%c84, %c0_92] : memref<108x512xf32, #tpu.memory_space<vmem>>, vector<12x512xf32>
    tpu.vector_store %arg16[%c84, %c0_92], %144 {strides = array<i32>} : memref<108x512xf32, #tpu.memory_space<vmem>>, vector<12x512xf32>,
    %c495_i32_93 = arith.constant 495 : i32
    %146 = tpu.dynamic_rotate %108 by %c495_i32_93 dim 1 : vector<12x512xf32>, i32 -> vector<12x512xf32>
    %147 = vector.extract_strided_slice %0 {offsets = [8, 0], sizes = [1, 512], strides = [1, 1]} : vector<9x512xf32> to vector<1x512xf32>
    %148 = vector.broadcast %147 : vector<1x512xf32> to vector<12x512xf32>
    %149 = arith.mulf %146, %148 : vector<12x512xf32>
    %c96 = arith.constant 96 : index
    %c0_94 = arith.constant 0 : index
    %150 = vector.load %arg16[%c96, %c0_94] : memref<108x512xf32, #tpu.memory_space<vmem>>, vector<12x512xf32>
    tpu.vector_store %arg16[%c96, %c0_94], %149 {strides = array<i32>} : memref<108x512xf32, #tpu.memory_space<vmem>>, vector<12x512xf32>,
    %c0_95 = arith.constant 0 : index
    %c0_96 = arith.constant 0 : index
    %151 = vector.load %arg16[%c0_95, %c0_96] : memref<108x512xf32, #tpu.memory_space<vmem>>, vector<108x512xf32>
    %cst_97 = arith.constant dense<0.000000e+00> : vector<4x512xf32>
    %152 = tpu.matmul %109, %151, %cst_97 {dimension_numbers = #tpu.dot_dimension_numbers<[1], [0], [0], [1], [0, 0, 1, 1], [], []>} : vector<4x108xf32>, vector<108x512xf32>, vector<4x512xf32> -> vector<4x512xf32>
    %153 = vector.extract_strided_slice %1 {offsets = [0, 2], sizes = [4, 1], strides = [1, 1]} : vector<4x8xf32> to vector<4x1xf32>
    %154 = vector.extract_strided_slice %1 {offsets = [0, 3], sizes = [4, 1], strides = [1, 1]} : vector<4x8xf32> to vector<4x1xf32>
    %cst_98 = arith.constant dense<0.000000e+00> : vector<4x1xf32>
    %155 = tpu.matmul %152, %4, %cst_98 {dimension_numbers = #tpu.dot_dimension_numbers<[1], [0], [0], [1], [0, 0, 1, 1], [], []>} : vector<4x512xf32>, vector<512x1xf32>, vector<4x1xf32> -> vector<4x1xf32>
    %cst_99 = arith.constant 0.001953125 : f32
    %156 = vector.broadcast %cst_99 : f32 to vector<4x1xf32>
    %157 = arith.mulf %155, %156 : vector<4x1xf32>
    %158 = arith.mulf %152, %152 : vector<4x512xf32>
    %cst_100 = arith.constant dense<0.000000e+00> : vector<4x1xf32>
    %159 = tpu.matmul %158, %4, %cst_100 {dimension_numbers = #tpu.dot_dimension_numbers<[1], [0], [0], [1], [0, 0, 1, 1], [], []>} : vector<4x512xf32>, vector<512x1xf32>, vector<4x1xf32> -> vector<4x1xf32>
    %cst_101 = arith.constant 0.001953125 : f32
    %160 = vector.broadcast %cst_101 : f32 to vector<4x1xf32>
    %161 = arith.mulf %159, %160 : vector<4x1xf32>
    %162 = arith.mulf %157, %157 : vector<4x1xf32>
    %163 = arith.subf %161, %162 : vector<4x1xf32>
    %cst_102 = arith.constant 0.000000e+00 : f32
    %164 = vector.broadcast %cst_102 : f32 to vector<4x1xf32>
    %165 = arith.maximumf %163, %164 : vector<4x1xf32>
    %cst_103 = arith.constant 9.99999974E-6 : f32
    %166 = vector.broadcast %cst_103 : f32 to vector<4x1xf32>
    %167 = arith.addf %165, %166 : vector<4x1xf32>
    %168 = math.rsqrt %167 : vector<4x1xf32>
    %169 = arith.mulf %153, %168 : vector<4x1xf32>
    %170 = vector.broadcast %169 : vector<4x1xf32> to vector<4x512xf32>
    %171 = arith.mulf %152, %170 : vector<4x512xf32>
    %172 = arith.mulf %157, %169 : vector<4x1xf32>
    %173 = arith.subf %154, %172 : vector<4x1xf32>
    %174 = vector.broadcast %173 : vector<4x1xf32> to vector<4x512xf32>
    %175 = arith.addf %171, %174 : vector<4x512xf32>
    %cst_104 = arith.constant 0.000000e+00 : f32
    %176 = vector.broadcast %cst_104 : f32 to vector<4x512xf32>
    %177 = arith.maximumf %175, %176 : vector<4x512xf32>
    %c0_105 = arith.constant 0 : index
    %c0_106 = arith.constant 0 : index
    %178 = vector.load %arg11[%c0_105, %c0_106] : memref<4x12xf32, #tpu.memory_space<vmem>>, vector<4x12xf32>
    %cst_107 = arith.constant dense<0.000000e+00> : vector<4x512xf32>
    %179 = tpu.matmul %178, %108, %cst_107 {dimension_numbers = #tpu.dot_dimension_numbers<[1], [0], [0], [1], [0, 0, 1, 1], [], []>} : vector<4x12xf32>, vector<12x512xf32>, vector<4x512xf32> -> vector<4x512xf32>
    %180 = vector.extract_strided_slice %1 {offsets = [0, 6], sizes = [4, 1], strides = [1, 1]} : vector<4x8xf32> to vector<4x1xf32>
    %181 = vector.extract_strided_slice %1 {offsets = [0, 7], sizes = [4, 1], strides = [1, 1]} : vector<4x8xf32> to vector<4x1xf32>
    %cst_108 = arith.constant dense<0.000000e+00> : vector<4x1xf32>
    %182 = tpu.matmul %179, %4, %cst_108 {dimension_numbers = #tpu.dot_dimension_numbers<[1], [0], [0], [1], [0, 0, 1, 1], [], []>} : vector<4x512xf32>, vector<512x1xf32>, vector<4x1xf32> -> vector<4x1xf32>
    %cst_109 = arith.constant 0.001953125 : f32
    %183 = vector.broadcast %cst_109 : f32 to vector<4x1xf32>
    %184 = arith.mulf %182, %183 : vector<4x1xf32>
    %185 = arith.mulf %179, %179 : vector<4x512xf32>
    %cst_110 = arith.constant dense<0.000000e+00> : vector<4x1xf32>
    %186 = tpu.matmul %185, %4, %cst_110 {dimension_numbers = #tpu.dot_dimension_numbers<[1], [0], [0], [1], [0, 0, 1, 1], [], []>} : vector<4x512xf32>, vector<512x1xf32>, vector<4x1xf32> -> vector<4x1xf32>
    %cst_111 = arith.constant 0.001953125 : f32
    %187 = vector.broadcast %cst_111 : f32 to vector<4x1xf32>
    %188 = arith.mulf %186, %187 : vector<4x1xf32>
    %189 = arith.mulf %184, %184 : vector<4x1xf32>
    %190 = arith.subf %188, %189 : vector<4x1xf32>
    %cst_112 = arith.constant 0.000000e+00 : f32
    %191 = vector.broadcast %cst_112 : f32 to vector<4x1xf32>
    %192 = arith.maximumf %190, %191 : vector<4x1xf32>
    %cst_113 = arith.constant 9.99999974E-6 : f32
    %193 = vector.broadcast %cst_113 : f32 to vector<4x1xf32>
    %194 = arith.addf %192, %193 : vector<4x1xf32>
    %195 = math.rsqrt %194 : vector<4x1xf32>
    %196 = arith.mulf %180, %195 : vector<4x1xf32>
    %197 = vector.broadcast %196 : vector<4x1xf32> to vector<4x512xf32>
    %198 = arith.mulf %179, %197 : vector<4x512xf32>
    %199 = arith.mulf %184, %196 : vector<4x1xf32>
    %200 = arith.subf %181, %199 : vector<4x1xf32>
    %201 = vector.broadcast %200 : vector<4x1xf32> to vector<4x512xf32>
    %202 = arith.addf %198, %201 : vector<4x512xf32>
    %c0_114 = arith.constant 0 : index
    %c0_115 = arith.constant 0 : index
    %203 = vector.load %arg10[%c0_114, %c0_115] : memref<4x36xf32, #tpu.memory_space<vmem>>, vector<4x36xf32>
    %c17_i32_116 = arith.constant 17 : i32
    %204 = tpu.dynamic_rotate %177 by %c17_i32_116 dim 1 : vector<4x512xf32>, i32 -> vector<4x512xf32>
    %205 = vector.extract_strided_slice %0 {offsets = [0, 0], sizes = [1, 512], strides = [1, 1]} : vector<9x512xf32> to vector<1x512xf32>
    %206 = vector.broadcast %205 : vector<1x512xf32> to vector<4x512xf32>
    %207 = arith.mulf %204, %206 : vector<4x512xf32>
    %c0_117 = arith.constant 0 : index
    %c0_118 = arith.constant 0 : index
    %208 = vector.load %arg16[%c0_117, %c0_118] : memref<108x512xf32, #tpu.memory_space<vmem>>, vector<4x512xf32>
    tpu.vector_store %arg16[%c0_117, %c0_118], %207 {strides = array<i32>} : memref<108x512xf32, #tpu.memory_space<vmem>>, vector<4x512xf32>,
    %c16_i32_119 = arith.constant 16 : i32
    %209 = tpu.dynamic_rotate %177 by %c16_i32_119 dim 1 : vector<4x512xf32>, i32 -> vector<4x512xf32>
    %210 = vector.extract_strided_slice %0 {offsets = [1, 0], sizes = [1, 512], strides = [1, 1]} : vector<9x512xf32> to vector<1x512xf32>
    %211 = vector.broadcast %210 : vector<1x512xf32> to vector<4x512xf32>
    %212 = arith.mulf %209, %211 : vector<4x512xf32>
    %c4_120 = arith.constant 4 : index
    %c0_121 = arith.constant 0 : index
    %213 = vector.load %arg16[%c4_120, %c0_121] : memref<108x512xf32, #tpu.memory_space<vmem>>, vector<4x512xf32>
    tpu.vector_store %arg16[%c4_120, %c0_121], %212 {strides = array<i32>} : memref<108x512xf32, #tpu.memory_space<vmem>>, vector<4x512xf32>,
    %c15_i32_122 = arith.constant 15 : i32
    %214 = tpu.dynamic_rotate %177 by %c15_i32_122 dim 1 : vector<4x512xf32>, i32 -> vector<4x512xf32>
    %215 = vector.extract_strided_slice %0 {offsets = [2, 0], sizes = [1, 512], strides = [1, 1]} : vector<9x512xf32> to vector<1x512xf32>
    %216 = vector.broadcast %215 : vector<1x512xf32> to vector<4x512xf32>
    %217 = arith.mulf %214, %216 : vector<4x512xf32>
    %c8_123 = arith.constant 8 : index
    %c0_124 = arith.constant 0 : index
    %218 = vector.load %arg16[%c8_123, %c0_124] : memref<108x512xf32, #tpu.memory_space<vmem>>, vector<4x512xf32>
    tpu.vector_store %arg16[%c8_123, %c0_124], %217 {strides = array<i32>} : memref<108x512xf32, #tpu.memory_space<vmem>>, vector<4x512xf32>,
    %c1_i32_125 = arith.constant 1 : i32
    %219 = tpu.dynamic_rotate %177 by %c1_i32_125 dim 1 : vector<4x512xf32>, i32 -> vector<4x512xf32>
    %220 = vector.extract_strided_slice %0 {offsets = [3, 0], sizes = [1, 512], strides = [1, 1]} : vector<9x512xf32> to vector<1x512xf32>
    %221 = vector.broadcast %220 : vector<1x512xf32> to vector<4x512xf32>
    %222 = arith.mulf %219, %221 : vector<4x512xf32>
    %c12_126 = arith.constant 12 : index
    %c0_127 = arith.constant 0 : index
    %223 = vector.load %arg16[%c12_126, %c0_127] : memref<108x512xf32, #tpu.memory_space<vmem>>, vector<4x512xf32>
    tpu.vector_store %arg16[%c12_126, %c0_127], %222 {strides = array<i32>} : memref<108x512xf32, #tpu.memory_space<vmem>>, vector<4x512xf32>,
    %c16_128 = arith.constant 16 : index
    %c0_129 = arith.constant 0 : index
    %224 = vector.load %arg16[%c16_128, %c0_129] : memref<108x512xf32, #tpu.memory_space<vmem>>, vector<4x512xf32>
    tpu.vector_store %arg16[%c16_128, %c0_129], %177 {strides = array<i32>} : memref<108x512xf32, #tpu.memory_space<vmem>>, vector<4x512xf32>,
    %c511_i32_130 = arith.constant 511 : i32
    %225 = tpu.dynamic_rotate %177 by %c511_i32_130 dim 1 : vector<4x512xf32>, i32 -> vector<4x512xf32>
    %226 = vector.extract_strided_slice %0 {offsets = [5, 0], sizes = [1, 512], strides = [1, 1]} : vector<9x512xf32> to vector<1x512xf32>
    %227 = vector.broadcast %226 : vector<1x512xf32> to vector<4x512xf32>
    %228 = arith.mulf %225, %227 : vector<4x512xf32>
    %c20_131 = arith.constant 20 : index
    %c0_132 = arith.constant 0 : index
    %229 = vector.load %arg16[%c20_131, %c0_132] : memref<108x512xf32, #tpu.memory_space<vmem>>, vector<4x512xf32>
    tpu.vector_store %arg16[%c20_131, %c0_132], %228 {strides = array<i32>} : memref<108x512xf32, #tpu.memory_space<vmem>>, vector<4x512xf32>,
    %c497_i32_133 = arith.constant 497 : i32
    %230 = tpu.dynamic_rotate %177 by %c497_i32_133 dim 1 : vector<4x512xf32>, i32 -> vector<4x512xf32>
    %231 = vector.extract_strided_slice %0 {offsets = [6, 0], sizes = [1, 512], strides = [1, 1]} : vector<9x512xf32> to vector<1x512xf32>
    %232 = vector.broadcast %231 : vector<1x512xf32> to vector<4x512xf32>
    %233 = arith.mulf %230, %232 : vector<4x512xf32>
    %c24_134 = arith.constant 24 : index
    %c0_135 = arith.constant 0 : index
    %234 = vector.load %arg16[%c24_134, %c0_135] : memref<108x512xf32, #tpu.memory_space<vmem>>, vector<4x512xf32>
    tpu.vector_store %arg16[%c24_134, %c0_135], %233 {strides = array<i32>} : memref<108x512xf32, #tpu.memory_space<vmem>>, vector<4x512xf32>,
    %c496_i32_136 = arith.constant 496 : i32
    %235 = tpu.dynamic_rotate %177 by %c496_i32_136 dim 1 : vector<4x512xf32>, i32 -> vector<4x512xf32>
    %236 = vector.extract_strided_slice %0 {offsets = [7, 0], sizes = [1, 512], strides = [1, 1]} : vector<9x512xf32> to vector<1x512xf32>
    %237 = vector.broadcast %236 : vector<1x512xf32> to vector<4x512xf32>
    %238 = arith.mulf %235, %237 : vector<4x512xf32>
    %c28_137 = arith.constant 28 : index
    %c0_138 = arith.constant 0 : index
    %239 = vector.load %arg16[%c28_137, %c0_138] : memref<108x512xf32, #tpu.memory_space<vmem>>, vector<4x512xf32>
    tpu.vector_store %arg16[%c28_137, %c0_138], %238 {strides = array<i32>} : memref<108x512xf32, #tpu.memory_space<vmem>>, vector<4x512xf32>,
    %c495_i32_139 = arith.constant 495 : i32
    %240 = tpu.dynamic_rotate %177 by %c495_i32_139 dim 1 : vector<4x512xf32>, i32 -> vector<4x512xf32>
    %241 = vector.extract_strided_slice %0 {offsets = [8, 0], sizes = [1, 512], strides = [1, 1]} : vector<9x512xf32> to vector<1x512xf32>
    %242 = vector.broadcast %241 : vector<1x512xf32> to vector<4x512xf32>
    %243 = arith.mulf %240, %242 : vector<4x512xf32>
    %c32_140 = arith.constant 32 : index
    %c0_141 = arith.constant 0 : index
    %244 = vector.load %arg16[%c32_140, %c0_141] : memref<108x512xf32, #tpu.memory_space<vmem>>, vector<4x512xf32>
    tpu.vector_store %arg16[%c32_140, %c0_141], %243 {strides = array<i32>} : memref<108x512xf32, #tpu.memory_space<vmem>>, vector<4x512xf32>,
    %c0_142 = arith.constant 0 : index
    %c0_143 = arith.constant 0 : index
    %245 = vector.load %arg16[%c0_142, %c0_143] : memref<108x512xf32, #tpu.memory_space<vmem>>, vector<36x512xf32>
    %cst_144 = arith.constant dense<0.000000e+00> : vector<4x512xf32>
    %246 = tpu.matmul %203, %245, %cst_144 {dimension_numbers = #tpu.dot_dimension_numbers<[1], [0], [0], [1], [0, 0, 1, 1], [], []>} : vector<4x36xf32>, vector<36x512xf32>, vector<4x512xf32> -> vector<4x512xf32>
    %247 = vector.extract_strided_slice %1 {offsets = [0, 4], sizes = [4, 1], strides = [1, 1]} : vector<4x8xf32> to vector<4x1xf32>
    %248 = vector.extract_strided_slice %1 {offsets = [0, 5], sizes = [4, 1], strides = [1, 1]} : vector<4x8xf32> to vector<4x1xf32>
    %cst_145 = arith.constant dense<0.000000e+00> : vector<4x1xf32>
    %249 = tpu.matmul %246, %4, %cst_145 {dimension_numbers = #tpu.dot_dimension_numbers<[1], [0], [0], [1], [0, 0, 1, 1], [], []>} : vector<4x512xf32>, vector<512x1xf32>, vector<4x1xf32> -> vector<4x1xf32>
    %cst_146 = arith.constant 0.001953125 : f32
    %250 = vector.broadcast %cst_146 : f32 to vector<4x1xf32>
    %251 = arith.mulf %249, %250 : vector<4x1xf32>
    %252 = arith.mulf %246, %246 : vector<4x512xf32>
    %cst_147 = arith.constant dense<0.000000e+00> : vector<4x1xf32>
    %253 = tpu.matmul %252, %4, %cst_147 {dimension_numbers = #tpu.dot_dimension_numbers<[1], [0], [0], [1], [0, 0, 1, 1], [], []>} : vector<4x512xf32>, vector<512x1xf32>, vector<4x1xf32> -> vector<4x1xf32>
    %cst_148 = arith.constant 0.001953125 : f32
    %254 = vector.broadcast %cst_148 : f32 to vector<4x1xf32>
    %255 = arith.mulf %253, %254 : vector<4x1xf32>
    %256 = arith.mulf %251, %251 : vector<4x1xf32>
    %257 = arith.subf %255, %256 : vector<4x1xf32>
    %cst_149 = arith.constant 0.000000e+00 : f32
    %258 = vector.broadcast %cst_149 : f32 to vector<4x1xf32>
    %259 = arith.maximumf %257, %258 : vector<4x1xf32>
    %cst_150 = arith.constant 9.99999974E-6 : f32
    %260 = vector.broadcast %cst_150 : f32 to vector<4x1xf32>
    %261 = arith.addf %259, %260 : vector<4x1xf32>
    %262 = math.rsqrt %261 : vector<4x1xf32>
    %263 = arith.mulf %247, %262 : vector<4x1xf32>
    %264 = vector.broadcast %263 : vector<4x1xf32> to vector<4x512xf32>
    %265 = arith.mulf %246, %264 : vector<4x512xf32>
    %266 = arith.mulf %251, %263 : vector<4x1xf32>
    %267 = arith.subf %248, %266 : vector<4x1xf32>
    %268 = vector.broadcast %267 : vector<4x1xf32> to vector<4x512xf32>
    %269 = arith.addf %265, %268 : vector<4x512xf32>
    %270 = arith.addf %269, %202 : vector<4x512xf32>
    %cst_151 = arith.constant 0.000000e+00 : f32
    %271 = vector.broadcast %cst_151 : f32 to vector<4x512xf32>
    %272 = arith.maximumf %270, %271 : vector<4x512xf32>
    %c0_152 = arith.constant 0 : index
    %c0_153 = arith.constant 0 : index
    %273 = vector.load %arg13[%c0_152, %c0_153] : memref<4x512xf32, #tpu.memory_space<vmem>>, vector<4x512xf32>
    tpu.vector_store %arg13[%c0_152, %c0_153], %272 {strides = array<i32>} : memref<4x512xf32, #tpu.memory_space<vmem>>, vector<4x512xf32>,
    return
  }
  func.func @transform_0(%arg0: i32) -> (i32, i32, i32) {
    %c0_i32 = arith.constant 0 : i32
    %c0_i32_0 = arith.constant 0 : i32
    %c0_i32_1 = arith.constant 0 : i32
    %c0_i32_2 = arith.constant 0 : i32
    return %c0_i32, %c0_i32_0, %c0_i32_1 : i32, i32, i32
  }
  func.func @transform_1(%arg0: i32) -> (i32, i32, i32) {
    %c0_i32 = arith.constant 0 : i32
    %c0_i32_0 = arith.constant 0 : i32
    %c0_i32_1 = arith.constant 0 : i32
    %c0_i32_2 = arith.constant 0 : i32
    return %c0_i32, %c0_i32_0, %c0_i32_1 : i32, i32, i32
  }
  func.func @transform_2(%arg0: i32) -> (i32, i32, i32) {
    %c0_i32 = arith.constant 0 : i32
    %c0_i32_0 = arith.constant 0 : i32
    %c0_i32_1 = arith.constant 0 : i32
    %c0_i32_2 = arith.constant 0 : i32
    return %c0_i32, %c0_i32_0, %c0_i32_1 : i32, i32, i32
  }
  func.func @transform_3(%arg0: i32) -> (i32, i32) {
    %c0_i32 = arith.constant 0 : i32
    %c0_i32_0 = arith.constant 0 : i32
    %c0_i32_1 = arith.constant 0 : i32
    return %c0_i32, %c0_i32_0 : i32, i32
  }
  func.func @transform_4(%arg0: i32) -> (i32, i32) {
    %c0_i32 = arith.constant 0 : i32
    %c0_i32_0 = arith.constant 0 : i32
    %c0_i32_1 = arith.constant 0 : i32
    return %c0_i32, %c0_i32_0 : i32, i32
  }
  func.func @transform_5(%arg0: i32) -> (i32, i32) {
    %c0_i32 = arith.constant 0 : i32
    %c0_i32_0 = arith.constant 0 : i32
    %c0_i32_1 = arith.constant 0 : i32
    return %c0_i32, %c0_i32_0 : i32, i32
  }
  func.func @transform_6(%arg0: i32) -> (i32, i32) {
    %c0_i32 = arith.constant 0 : i32
    %c0_i32_0 = arith.constant 0 : i32
    %c0_i32_1 = arith.constant 0 : i32
    return %c0_i32, %c0_i32_0 : i32, i32
  }
  func.func @transform_7(%arg0: i32) -> (i32, i32) {
    %c0_i32 = arith.constant 0 : i32
    %c0_i32_0 = arith.constant 0 : i32
    %c0_i32_1 = arith.constant 0 : i32
    return %c0_i32, %c0_i32_0 : i32, i32
  }
  func.func @transform_8(%arg0: i32) -> (i32, i32) {
    %c0_i32 = arith.constant 0 : i32
    %c0_i32_0 = arith.constant 0 : i32
    %c0_i32_1 = arith.constant 0 : i32
    return %c0_i32, %c0_i32_0 : i32, i32
  }
  func.func @transform_9(%arg0: i32) -> (i32, i32) {
    %c0_i32 = arith.constant 0 : i32
    %c0_i32_0 = arith.constant 0 : i32
    %c0_i32_1 = arith.constant 0 : i32
    return %c0_i32, %c0_i32_0 : i32, i32
  }
  func.func @transform_10(%arg0: i32) -> (i32, i32) {
    %c0_i32 = arith.constant 0 : i32
    %c0_i32_0 = arith.constant 0 : i32
    %c0_i32_1 = arith.constant 0 : i32
    return %c0_i32, %c0_i32_0 : i32, i32
  }
  func.func @transform_11(%arg0: i32) -> (i32, i32) {
    %c0_i32 = arith.constant 0 : i32
    %c0_i32_0 = arith.constant 0 : i32
    %c0_i32_1 = arith.constant 0 : i32
    return %c0_i32, %c0_i32_0 : i32, i32
  }
  func.func @transform_12(%arg0: i32) -> (i32, i32) {
    %c0_i32 = arith.constant 0 : i32
    %c0_i32_0 = arith.constant 0 : i32
    %c0_i32_1 = arith.constant 0 : i32
    return %c0_i32, %c0_i32_0 : i32, i32
  }
}

</mosaic_0001>

<bundles_post_ra>
// kernel: pub_forward.1
= control target key start
LH: loop header
LB: loop body
LE: loop exit
PB: predicated region body
PF: predicated region fallthrough
CT: control target
= control target key end

     0   :  { %vm102_vm0 = vcmask 523264   ;;  %vm149_vm1 = vcmask 1043456   ;;  %s3154_s21 = smov 17   ;;  %s3156_s25 = smov 15   ;;  %vm992_vm10 = vcmask 293888   ;;  %vm1806_vm14 = vcmask 883712   ;;  %s5682_s3 = inlined_call_operand.vmem [shape: f32[64,256], index: 3, kind: input, shape index: {}, may-alias: {3,4}]   ;;  %s5683_s1 = inlined_call_operand.vmem [shape: f32[2,512,64], index: 1, kind: input, shape index: {}]   ;;  %s5684_s0 = inlined_call_operand.vmem [shape: f32[2,4,64], index: 0, kind: input, shape index: {}]   ;;  %s5685_s7 = inlined_call_operand.vmem [shape: f32[4,512], index: 7, kind: input, shape index: {}]   ;;  %s5686_s2 = inlined_call_operand.vmem [shape: f32[2,4,256], index: 2, kind: input, shape index: {}]   ;;  %s5687_s4 = inlined_call_operand.vmem [shape: f32[64,256], index: 4, kind: input, shape index: {}, may-alias: {3,4}]   ;;  %s5688_s5 = inlined_call_operand.vmem [shape: f32[9,512], index: 5, kind: input, shape index: {}]   ;;  %s5689_s6 = inlined_call_operand.vmem [shape: f32[4,36], index: 6, kind: input, shape index: {}]   ;;  %s5690_s11 = inlined_call_operand.vmem [shape: f32[4,8], index: 11, kind: input, shape index: {}]   ;;  %s5691_s8 = inlined_call_operand.vmem [shape: f32[4,108], index: 8, kind: input, shape index: {}]   ;;  %s5692_s10 = inlined_call_operand.vmem [shape: f32[4,12], index: 10, kind: input, shape index: {}]   ;;  %s5693_s9 = inlined_call_operand.vmem [shape: f32[4,36], index: 9, kind: input, shape index: {}]   ;;  %s5694_s12 = inlined_call_operand.vmem [shape: f32[4,512], index: 12, kind: output, shape index: {}]  }
   0x1   :  { %v3248_v0 = vld [vmem:[%s5682_s3 + $0x70] sm:$0xff]  ;;  %v3253_v1 = vld [vmem:[%s5682_s3 + $0x78] sm:$0xff]  ;;  %v3258_v2 = vld [vmem:[%s5682_s3 + $0x60] sm:$0xff]  ;;  %s3159_s26 = smov 113   ;;  %s3160_s27 = smov 112  }
   0x2   :  { %114 = vmatpush.msra.mxu0 %v3248_v0  ;;  %134 = vmatpush.msra.mxu1 %v3253_v1  ;;  %v3265_v3 = vld [vmem:[%s5682_s3 + $0x68] sm:$0xff]  ;;  %v3270_v4 = vld [vmem:[%s5682_s3 + $0x50] sm:$0xff]  ;;  %v3275_v5 = vld [vmem:[%s5682_s3 + $0x58] sm:$0xff]  ;;  %s3161_s28 = smov 111   ;;  %s3167_s23 = smov 126  }
   0x3   :  { %v167_v6 = vld [vmem:[%s5683_s1 + $0x70] sm:$0xff]  ;;  %v168_v7 = vld [vmem:[%s5683_s1 + $0x78] sm:$0xff]  ;;  %v3294_v10 = vld [vmem:[%s5682_s3 + $0x40] sm:$0xff]  ;;  %s3176_s18 = smov 124   ;;  %s3178_s19 = smov 5  }
   0x4   :  { %115 = vmatpush.msra.mxu0 %v3258_v2  ;;  %135 = vmatpush.msra.mxu1 %v3265_v3  ;;  %v183_v8 = vld [vmem:[%s5683_s1 + $0xf0] sm:$0xff]  ;;  %v184_v9 = vld [vmem:[%s5683_s1 + $0xf8] sm:$0xff]  ;;  %v3299_v11 = vld [vmem:[%s5682_s3 + $0x48] sm:$0xff]  ;;  %v224_v12 = vpack.c.bf16 %v168_v7, %v167_v6 }
   0x5   :  { %v232_v13 = vpack.c.bf16 %v184_v9, %v183_v8  ;;  %v3306_v14 = vld [vmem:[%s5682_s3 + $0x30] sm:$0xff]  ;;  %v165_v15 = vld [vmem:[%s5683_s1 + $0x60] sm:$0xff]  ;;  %v166_v16 = vld [vmem:[%s5683_s1 + $0x68] sm:$0xff] }
   0x6   :  { %116 = vmatpush.msra.mxu0 %v3270_v4  ;;  %136 = vmatpush.msra.mxu1 %v3275_v5  ;;  %v3317_v17 = vld [vmem:[%s5682_s3 + $0x38] sm:$0xff]  ;;  %v223_v18 = vpack.c.bf16 %v166_v16, %v165_v15  ;;  %v181_v19 = vld [vmem:[%s5683_s1 + $0xe0] sm:$0xff]  ;;  %v182_v20 = vld [vmem:[%s5683_s1 + $0xe8] sm:$0xff] }
   0x7   :  { %249 = vmatpush.bf16.msra.mxu2 %v224_v12  ;;  %262 = vmatpush.bf16.msra.mxu3 %v232_v13  ;;  %v3330_v21 = vld [vmem:[%s5682_s3 + $0x20] sm:$0xff]  ;;  %v3335_v22 = vld [vmem:[%s5682_s3 + $0x28] sm:$0xff]  ;;  %v231_v23 = vpack.c.bf16 %v182_v20, %v181_v19  ;;  %v3340_v24 = vld [vmem:[%s5682_s3 + $0x10] sm:$0xff] }
   0x8   :  { %117 = vmatpush.msra.mxu0 %v3294_v10  ;;  %137 = vmatpush.msra.mxu1 %v3299_v11  ;;  %v3345_v25 = vld [vmem:[%s5682_s3 + $0x18] sm:$0xff]  ;;  %v163_v26 = vld [vmem:[%s5683_s1 + $0x50] sm:$0xff]  ;;  %v3364_v30 = vld [vmem:[%s5682_s3] sm:$0xff] }
   0x9   :  { %v164_v27 = vld [vmem:[%s5683_s1 + $0x58] sm:$0xff]  ;;  %v179_v28 = vld [vmem:[%s5683_s1 + $0xd0] sm:$0xff]  ;;  %v161_v37 = vld [vmem:[%s5683_s1 + $0x40] sm:$0xff] }
   0xa   :  { %118 = vmatpush.msra.mxu0 %v3306_v14  ;;  %138 = vmatpush.msra.mxu1 %v3317_v17  ;;  %v180_v29 = vld [vmem:[%s5683_s1 + $0xd8] sm:$0xff]  ;;  %v222_v31 = vpack.c.bf16 %v164_v27, %v163_v26  ;;  %v199_v33 = vld [vmem:[%s5683_s1 + $0x170] sm:$0xff]  ;;  %v162_v38 = vld [vmem:[%s5683_s1 + $0x48] sm:$0xff] }
   0xb   :  { %250 = vmatpush.bf16.msra.mxu2 %v223_v18  ;;  %263 = vmatpush.bf16.msra.mxu3 %v231_v23  ;;  %v230_v32 = vpack.c.bf16 %v180_v29, %v179_v28  ;;  %v200_v34 = vld [vmem:[%s5683_s1 + $0x178] sm:$0xff]  ;;  %v215_v35 = vld [vmem:[%s5683_s1 + $0x1f0] sm:$0xff]  ;;  %v3389_v39 = vld [vmem:[%s5682_s3 + $0x8] sm:$0xff]  ;;  %v221_v47 = vpack.c.bf16 %v162_v38, %v161_v37 }
   0xc   :  { %119 = vmatpush.msra.mxu0 %v3330_v21  ;;  %139 = vmatpush.msra.mxu1 %v3335_v22  ;;  %v216_v36 = vld [vmem:[%s5683_s1 + $0x1f8] sm:$0xff]  ;;  %v240_v40 = vpack.c.bf16 %v200_v34, %v199_v33  ;;  %v177_v41 = vld [vmem:[%s5683_s1 + $0xc0] sm:$0xff]  ;;  %v178_v42 = vld [vmem:[%s5683_s1 + $0xc8] sm:$0xff] }
   0xd   :  { %v101_v43 = vld [vmem:[%s5684_s0] sm:$0xf]  ;;  %v248_v44 = vpack.c.bf16 %v216_v36, %v215_v35  ;;  %v198_v46 = vld [vmem:[%s5683_s1 + $0x168] sm:$0xff]  ;;  %v229_v48 = vpack.c.bf16 %v178_v42, %v177_v41  ;;  %v159_v51 = vld [vmem:[%s5683_s1 + $0x30] sm:$0xff] }
   0xe   :  { %120 = vmatpush.msra.mxu0 %v3340_v24  ;;  %140 = vmatpush.msra.mxu1 %v3345_v25  ;;  %v197_v45 = vld [vmem:[%s5683_s1 + $0x160] sm:$0xff]  ;;  %v214_v50 = vld [vmem:[%s5683_s1 + $0x1e8] sm:$0xff]  ;;  %v160_v52 = vld [vmem:[%s5683_s1 + $0x38] sm:$0xff] }
   0xf   :  { %251 = vmatpush.bf16.msra.mxu2 %v222_v31  ;;  %264 = vmatpush.bf16.msra.mxu3 %v230_v32  ;;  %v213_v49 = vld [vmem:[%s5683_s1 + $0x1e0] sm:$0xff]  ;;  %v175_v53 = vld [vmem:[%s5683_s1 + $0xb0] sm:$0xff]  ;;  %v176_v54 = vld [vmem:[%s5683_s1 + $0xb8] sm:$0xff]  ;;  %v239_v55 = vpack.c.bf16 %v198_v46, %v197_v45  ;;  %v220_v59 = vpack.c.bf16 %v160_v52, %v159_v51 }
  0x10   :  { %121 = vmatpush.msra.mxu0 %v3364_v30  ;;  %141 = vmatpush.msra.mxu1 %v3389_v39  ;;  %v247_v56 = vpack.c.bf16 %v214_v50, %v213_v49  ;;  %v195_v57 = vld [vmem:[%s5683_s1 + $0x150] sm:$0xff]  ;;  %v196_v58 = vld [vmem:[%s5683_s1 + $0x158] sm:$0xff]  ;;  %v228_v60 = vpack.c.bf16 %v176_v54, %v175_v53  ;;  %v157_v63 = vld [vmem:[%s5683_s1 + $0x20] sm:$0xff] }
  0x11   :  { %2992 = vmatmul.msk.f32.vlgmr.msra.gmra.mxu1 %vm102_vm0, %v101_v43  ;;  %2991 = vmatmul.msk.f32.vlgmr.msra.gmra.mxu0 %vm102_vm0, %v101_v43  ;;  %v211_v61 = vld [vmem:[%s5683_s1 + $0x1d0] sm:$0xff]  ;;  %v212_v62 = vld [vmem:[%s5683_s1 + $0x1d8] sm:$0xff]  ;;  %v158_v6 = vld [vmem:[%s5683_s1 + $0x28] sm:$0xff]  ;;  %v238_v9 = vpack.c.bf16 %v196_v58, %v195_v57 }
  0x12   :  { %275 = vmatpush.bf16.msrb.mxu0 %v240_v40  ;;  %288 = vmatpush.bf16.msrb.mxu1 %v248_v44  ;;  %v173_v7 = vld [vmem:[%s5683_s1 + $0xa0] sm:$0xff]  ;;  %v174_v8 = vld [vmem:[%s5683_s1 + $0xa8] sm:$0xff]  ;;  %v246_v12 = vpack.c.bf16 %v212_v62, %v211_v61  ;;  %v219_v16 = vpack.c.bf16 %v158_v6, %v157_v63  ;;  %v155_v23 = vld [vmem:[%s5683_s1 + $0x10] sm:$0xff] }
  0x13   :  { %252 = vmatpush.bf16.msra.mxu2 %v221_v47  ;;  %265 = vmatpush.bf16.msra.mxu3 %v229_v48  ;;  %v193_v13 = vld [vmem:[%s5683_s1 + $0x140] sm:$0xff]  ;;  %v194_v15 = vld [vmem:[%s5683_s1 + $0x148] sm:$0xff]  ;;  %v227_v18 = vpack.c.bf16 %v174_v8, %v173_v7  ;;  %v156_v26 = vld [vmem:[%s5683_s1 + $0x18] sm:$0xff] }
  0x14   :  { %v209_v19 = vld [vmem:[%s5683_s1 + $0x1c0] sm:$0xff]  ;;  %v210_v20 = vld [vmem:[%s5683_s1 + $0x1c8] sm:$0xff]  ;;  %v171_v27 = vld [vmem:[%s5683_s1 + $0x90] sm:$0xff]  ;;  %v237_v29 = vpack.c.bf16 %v194_v15, %v193_v13  ;;  %v218_v35 = vpack.c.bf16 %v156_v26, %v155_v23 }
  0x15   :  { %v172_v28 = vld [vmem:[%s5683_s1 + $0x98] sm:$0xff]  ;;  %v82_v31 = vld [vmem:[%s5685_s7] sm:$0xff]  ;;  %v245_v32 = vpack.c.bf16 %v210_v20, %v209_v19  ;;  %v191_v33 = vld [vmem:[%s5683_s1 + $0x130] sm:$0xff] }
  0x16   :  { %276 = vmatpush.bf16.msrb.mxu0 %v239_v55  ;;  %289 = vmatpush.bf16.msrb.mxu1 %v247_v56  ;;  %v192_v34 = vld [vmem:[%s5683_s1 + $0x138] sm:$0xff]  ;;  %86 = vst [vmem:[#allocation1] ss:$2 sm:$0xff] %v82_v31  ;;  %v226_v36 = vpack.c.bf16 %v172_v28, %v171_v27  ;;  %v207_v37 = vld [vmem:[%s5683_s1 + $0x1b0] sm:$0xff]  ;;  %v153_v40 = vld [vmem:[%s5683_s1] sm:$0xff] }
  0x17   :  { %253 = vmatpush.bf16.msra.mxu2 %v220_v59  ;;  %266 = vmatpush.bf16.msra.mxu3 %v228_v60  ;;  %v208_v38 = vld [vmem:[%s5683_s1 + $0x1b8] sm:$0xff]  ;;  %v154_v41 = vld [vmem:[%s5683_s1 + $0x8] sm:$0xff]  ;;  %v169_v42 = vld [vmem:[%s5683_s1 + $0x80] sm:$0xff]  ;;  %v236_v44 = vpack.c.bf16 %v192_v34, %v191_v33 }
  0x18   :  { %v170_v43 = vld [vmem:[%s5683_s1 + $0x88] sm:$0xff]  ;;  %v244_v46 = vpack.c.bf16 %v208_v38, %v207_v37  ;;  %v189_v47 = vld [vmem:[%s5683_s1 + $0x120] sm:$0xff]  ;;  %v217_v49 = vpack.c.bf16 %v154_v41, %v153_v40  ;;  %v187_v59 = vld [vmem:[%s5683_s1 + $0x110] sm:$0xff] }
  0x19   :  { %v83_v45 = vld [vmem:[%s5685_s7 + $0x8] sm:$0xff]  ;;  %v225_v50 = vpack.c.bf16 %v170_v43, %v169_v42  ;;  %v205_v51 = vld [vmem:[%s5683_s1 + $0x1a0] sm:$0xff]  ;;  %v188_v60 = vld [vmem:[%s5683_s1 + $0x118] sm:$0xff] }
  0x1a   :  { %277 = vmatpush.bf16.msrb.mxu0 %v238_v9  ;;  %290 = vmatpush.bf16.msrb.mxu1 %v246_v12  ;;  %v190_v48 = vld [vmem:[%s5683_s1 + $0x128] sm:$0xff]  ;;  %88 = vst [vmem:[#allocation1 + $0x10] ss:$2 sm:$0xff] %v83_v45  ;;  %v347_v53 = vld [vmem:[%s5686_s2] sm:$0xff]  ;;  %v203_v62 = vld [vmem:[%s5683_s1 + $0x190] sm:$0xff]  ;;  %v234_v6 = vpack.c.bf16 %v188_v60, %v187_v59 }
  0x1b   :  { %254 = vmatpush.bf16.msra.mxu2 %v219_v16  ;;  %267 = vmatpush.bf16.msra.mxu3 %v227_v18  ;;  %v206_v52 = vld [vmem:[%s5683_s1 + $0x1a8] sm:$0xff]  ;;  %v235_v54 = vpack.c.bf16 %v190_v48, %v189_v47  ;;  %v204_v63 = vld [vmem:[%s5683_s1 + $0x198] sm:$0xff]  ;;  %v185_v8 = vld [vmem:[%s5683_s1 + $0x100] sm:$0xff] }
  0x1c   :  { %v243_v57 = vpack.c.bf16 %v206_v52, %v205_v51  ;;  %v242_v7 = vpack.c.bf16 %v204_v63, %v203_v62  ;;  %v186_v9 = vld [vmem:[%s5683_s1 + $0x108] sm:$0xff]  ;;  %v201_v13 = vld [vmem:[%s5683_s1 + $0x180] sm:$0xff]  ;;  %v3012_v33 = vld [vmem:[%s5683_s1 + $0x270] sm:$0xff] }
  0x1d   :  { %v89_v55 = vld.sshfl [vmem:[#allocation1] sm:$0xff pattern:$0x75316420]  ;;  %v90_v56 = vld.sshfl [vmem:[#allocation1 + $0x8] sm:$0xff pattern:$0x75316420]  ;;  %v233_v20 = vpack.c.bf16 %v186_v9, %v185_v8 }
  0x1e   :  { %278 = vmatpush.bf16.msrb.mxu0 %v237_v29  ;;  %291 = vmatpush.bf16.msrb.mxu1 %v245_v32  ;;  %v3523_v58 = vpack.c.bf16 %v89_v55, %v89_v55  ;;  %350 = vst [vmem:[#allocation1 + $0x1] ss:$2 sm:$0xff] %v347_v53  ;;  %v3531_v61 = vpack.c.bf16 %v90_v56, %v90_v56  ;;  %v3064_v12 = vld [vmem:[%s5686_s2 + $0x8] sm:$0xff]  ;;  %v3661_v29 = vld [vmem:[%s5687_s4 + $0x18] sm:$0xff]  ;;  %v3668_v31 = vld [vmem:[%s5687_s4] sm:$0xff]  ;;  %s3155_s2 = smov 16  }
  0x1f   :  { %255 = vmatpush.bf16.msra.mxu2 %v218_v35  ;;  %268 = vmatpush.bf16.msra.mxu3 %v226_v36  ;;  %v202_v15 = vld [vmem:[%s5683_s1 + $0x188] sm:$0xff]  ;;  %v3013_v34 = vld [vmem:[%s5683_s1 + $0x278] sm:$0xff]  ;;  %v3028_v35 = vld [vmem:[%s5683_s1 + $0x2f0] sm:$0xff] }
  0x20   :  { %v241_v23 = vpack.c.bf16 %v202_v15, %v201_v13  ;;  %v3673_v32 = vld [vmem:[%s5687_s4 + $0x8] sm:$0xff]  ;;  %v3029_v36 = vld [vmem:[%s5683_s1 + $0x2f8] sm:$0xff]  ;;  %v480_v37 = vpack.c.bf16 %v3013_v34, %v3012_v33  ;;  %v3010_v40 = vld [vmem:[%s5683_s1 + $0x260] sm:$0xff] }
  0x21   :  { %v91_v16 = vld.sshfl [vmem:[#allocation1 + $0x10] sm:$0xff pattern:$0x75316420]  ;;  %v92_v26 = vld.sshfl [vmem:[#allocation1 + $0x18] sm:$0xff pattern:$0x75316420]  ;;  %v488_v38 = vpack.c.bf16 %v3029_v36, %v3028_v35 }
  0x22   :  { %279 = vmatpush.bf16.msrb.mxu0 %v236_v44  ;;  %292 = vmatpush.bf16.msrb.mxu1 %v244_v46  ;;  %v3556_v27 = vpack.c.bf16 %v91_v16, %v91_v16  ;;  %v3558_v28 = vpack.c.bf16 %v92_v26, %v92_v26  ;;  %v3011_v41 = vld [vmem:[%s5683_s1 + $0x268] sm:$0xff]  ;;  %v3026_v42 = vld [vmem:[%s5683_s1 + $0x2e0] sm:$0xff]  ;;  %v3008_v46 = vld [vmem:[%s5683_s1 + $0x250] sm:$0xff] }
  0x23   :  { %256 = vmatpush.bf16.msra.mxu2 %v217_v49  ;;  %269 = vmatpush.bf16.msra.mxu3 %v225_v50  ;;  %v3027_v43 = vld [vmem:[%s5683_s1 + $0x2e8] sm:$0xff]  ;;  %v479_v44 = vpack.c.bf16 %v3011_v41, %v3010_v40  ;;  %v3009_v47 = vld [vmem:[%s5683_s1 + $0x258] sm:$0xff]  ;;  %v3024_v48 = vld [vmem:[%s5683_s1 + $0x2d0] sm:$0xff] }
  0x24   :  { %v487_v45 = vpack.c.bf16 %v3027_v43, %v3026_v42  ;;  %v478_v49 = vpack.c.bf16 %v3009_v47, %v3008_v46  ;;  %v3025_v50 = vld [vmem:[%s5683_s1 + $0x2d8] sm:$0xff]  ;;  %v3044_v51 = vld [vmem:[%s5683_s1 + $0x370] sm:$0xff]  ;;  %v3007_v60 = vld [vmem:[%s5683_s1 + $0x248] sm:$0xff] }
  0x25   :  { %v351_v18 = vld.sshfl [vmem:[#allocation1] sm:$0xff pattern:$0x75316420]  ;;  %v352_v19 = vld.sshfl [vmem:[#allocation1 + $0x8] sm:$0xff pattern:$0x75316420]  ;;  %v486_v53 = vpack.c.bf16 %v3025_v50, %v3024_v48 }
  0x26   :  { %280 = vmatpush.bf16.msrb.mxu0 %v235_v54  ;;  %293 = vmatpush.bf16.msrb.mxu1 %v243_v57  ;;  %607 = vst [vmem:[#allocation1 + $0x1] ss:$2 sm:$0xff] %v3064_v12  ;;  %v3045_v52 = vld [vmem:[%s5683_s1 + $0x378] sm:$0xff]  ;;  %v3060_v55 = vld [vmem:[%s5683_s1 + $0x3f0] sm:$0xff]  ;;  %v3006_v57 = vld [vmem:[%s5683_s1 + $0x240] sm:$0xff] }
  0x27   :  { %257 = vmatmul.bf16.vlgmr.msra.gmra.mxu2 %v3523_v58  ;;  %270 = vmatmul.bf16.vlgmr.msra.gmra.mxu3 %v3531_v61  ;;  %355 = vst [vmem:[#allocation3 + $0x8] sm:$0xf0] %v351_v18  ;;  %v496_v54 = vpack.c.bf16 %v3045_v52, %v3044_v51  ;;  %v3061_v56 = vld [vmem:[%s5683_s1 + $0x3f8] sm:$0xff]  ;;  %v3022_v62 = vld [vmem:[%s5683_s1 + $0x2c0] sm:$0xff]  ;;  %v3023_v63 = vld [vmem:[%s5683_s1 + $0x2c8] sm:$0xff] }
  0x28   :  { %356 = vst [vmem:[#allocation3] sm:$0xf0] %v352_v19  ;;  %v504_v59 = vpack.c.bf16 %v3061_v56, %v3060_v55  ;;  %v3042_v8 = vld [vmem:[%s5683_s1 + $0x360] sm:$0xff]  ;;  %v3043_v9 = vld [vmem:[%s5683_s1 + $0x368] sm:$0xff]  ;;  %v3004_v18 = vld [vmem:[%s5683_s1 + $0x230] sm:$0xff] }
  0x29   :  { %v495_v12 = vpack.c.bf16 %v3043_v9, %v3042_v8  ;;  %v3058_v13 = vld [vmem:[%s5683_s1 + $0x3e0] sm:$0xff]  ;;  %v3059_v15 = vld [vmem:[%s5683_s1 + $0x3e8] sm:$0xff]  ;;  %v3005_v19 = vld [vmem:[%s5683_s1 + $0x238] sm:$0xff] }
  0x2a   :  { %281 = vmatpush.bf16.msrb.mxu0 %v234_v6  ;;  %294 = vmatpush.bf16.msrb.mxu1 %v242_v7  ;;  %v477_v6 = vpack.c.bf16 %v3007_v60, %v3006_v57  ;;  %v485_v7 = vpack.c.bf16 %v3023_v63, %v3022_v62  ;;  %v503_v16 = vpack.c.bf16 %v3059_v15, %v3058_v13  ;;  %v3021_v26 = vld [vmem:[%s5683_s1 + $0x2b8] sm:$0xff]  ;;  %v3056_v34 = vld [vmem:[%s5683_s1 + $0x3d0] sm:$0xff]  ;;  %v3002_v41 = vld [vmem:[%s5683_s1 + $0x220] sm:$0xff] }
  0x2b   :  { %v3057_v35 = vld [vmem:[%s5683_s1 + $0x3d8] sm:$0xff]  ;;  %v3003_v42 = vld [vmem:[%s5683_s1 + $0x228] sm:$0xff]  ;;  %v3018_v43 = vld [vmem:[%s5683_s1 + $0x2a0] sm:$0xff] }
  0x2c   :  { %v3038_v46 = vld [vmem:[%s5683_s1 + $0x340] sm:$0xff]  ;;  %v3039_v47 = vld [vmem:[%s5683_s1 + $0x348] sm:$0xff]  ;;  %v3001_v55 = vld [vmem:[%s5683_s1 + $0x218] sm:$0xff] }
  0x2d   :  { %v493_v50 = vpack.c.bf16 %v3039_v47, %v3038_v46  ;;  %v3054_v51 = vld [vmem:[%s5683_s1 + $0x3c0] sm:$0xff]  ;;  %v3055_v52 = vld [vmem:[%s5683_s1 + $0x3c8] sm:$0xff]  ;;  %v3016_v56 = vld [vmem:[%s5683_s1 + $0x290] sm:$0xff] }
  0x2e   :  { %282 = vmatpush.bf16.msrb.mxu0 %v233_v20  ;;  %295 = vmatpush.bf16.msrb.mxu1 %v241_v23  ;;  %v3020_v20 = vld [vmem:[%s5683_s1 + $0x2b0] sm:$0xff]  ;;  %v476_v23 = vpack.c.bf16 %v3005_v19, %v3004_v18  ;;  %v3037_v62 = vld [vmem:[%s5683_s1 + $0x338] sm:$0xff]  ;;  %v2999_v13 = vld [vmem:[%s5683_s1 + $0x208] sm:$0xff] }
  0x2f   :  { %v3036_v60 = vld [vmem:[%s5683_s1 + $0x330] sm:$0xff]  ;;  %v3053_v8 = vld [vmem:[%s5683_s1 + $0x3b8] sm:$0xff]  ;;  %v3014_v15 = vld [vmem:[%s5683_s1 + $0x280] sm:$0xff] }
  0x30   :  { %v3046_v46 = vld [vmem:[%s5683_s1 + $0x380] sm:$0xff]  ;;  %v3047_v47 = vld [vmem:[%s5683_s1 + $0x388] sm:$0xff] }
  0x31   :  { %283 = vmatmul.bf16.vlgmr.msrb.gmra.mxu0 %v3556_v27  ;;  %296 = vmatmul.bf16.vlgmr.msrb.gmra.mxu1 %v3558_v28 }
  0x32   :  { %370 = vmatpush.msra.mxu0 %v3248_v0  ;;  %390 = vmatpush.msra.mxu1 %v3253_v1  ;;  %v2995_v0 = vld [vmem:[%s5684_s0 + $0x4] sm:$0xf]  ;;  %v3586_v1 = vld [vmem:[%s5687_s4 + $0x70] sm:$0xff]  ;;  %s3158_s0 = smov 127  }
  0x33   :  { %313 = vmatpush.msrb.mxu2 %v3586_v1 }
  0x34   :  { %371 = vmatpush.msra.mxu0 %v3258_v2  ;;  %391 = vmatpush.msra.mxu1 %v3265_v3  ;;  %v3591_v2 = vld [vmem:[%s5687_s4 + $0x78] sm:$0xff]  ;;  %v3598_v3 = vld [vmem:[%s5687_s4 + $0x60] sm:$0xff] }
  0x35   :  { %333 = vmatpush.msrb.mxu3 %v3591_v2  ;;  %314 = vmatpush.msrb.mxu2 %v3598_v3 }
  0x36   :  { %372 = vmatpush.msra.mxu0 %v3270_v4  ;;  %392 = vmatpush.msra.mxu1 %v3275_v5  ;;  %v3603_v4 = vld [vmem:[%s5687_s4 + $0x68] sm:$0xff]  ;;  %v608_v5 = vld.sshfl [vmem:[#allocation1] sm:$0xff pattern:$0x75316420] }
  0x37   :  { %334 = vmatpush.msrb.mxu3 %v3603_v4  ;;  %612 = vst [vmem:[#allocation3 + $0x38] sm:$0xf0] %v608_v5  ;;  %v3041_v5 = vld [vmem:[%s5683_s1 + $0x358] sm:$0xff] }
  0x38   :  { %373 = vmatpush.msra.mxu0 %v3294_v10  ;;  %393 = vmatpush.msra.mxu1 %v3299_v11  ;;  %v609_v10 = vld.sshfl [vmem:[#allocation1 + $0x8] sm:$0xff pattern:$0x75316420]  ;;  %v3610_v11 = vld [vmem:[%s5687_s4 + $0x50] sm:$0xff] }
  0x39   :  { %613 = vst [vmem:[#allocation3 + $0x18] sm:$0xf0] %v609_v10  ;;  %315 = vmatpush.msrb.mxu2 %v3610_v11  ;;  %v484_v10 = vpack.c.bf16 %v3021_v26, %v3020_v20  ;;  %v3015_v20 = vld [vmem:[%s5683_s1 + $0x288] sm:$0xff] }
  0x3a   :  { %374 = vmatpush.msra.mxu0 %v3306_v14  ;;  %394 = vmatpush.msra.mxu1 %v3317_v17  ;;  %v3615_v14 = vld [vmem:[%s5687_s4 + $0x58] sm:$0xff]  ;;  %v3620_v17 = vld [vmem:[%s5687_s4 + $0x40] sm:$0xff]  ;;  %v481_v26 = vpack.c.bf16 %v3015_v20, %v3014_v15 }
  0x3b   :  { %335 = vmatpush.msrb.mxu3 %v3615_v14  ;;  %316 = vmatpush.msrb.mxu2 %v3620_v17 }
  0x3c   :  { %375 = vmatpush.msra.mxu0 %v3330_v21  ;;  %395 = vmatpush.msra.mxu1 %v3335_v22  ;;  %v3627_v21 = vld [vmem:[%s5687_s4 + $0x48] sm:$0xff]  ;;  %v3632_v22 = vld [vmem:[%s5687_s4 + $0x30] sm:$0xff] }
  0x3d   :  { %336 = vmatpush.msrb.mxu3 %v3627_v21  ;;  %317 = vmatpush.msrb.mxu2 %v3632_v22 }
  0x3e   :  { %376 = vmatpush.msra.mxu0 %v3340_v24  ;;  %396 = vmatpush.msra.mxu1 %v3345_v25  ;;  %v3637_v24 = vld [vmem:[%s5687_s4 + $0x38] sm:$0xff]  ;;  %v3644_v25 = vld [vmem:[%s5687_s4 + $0x20] sm:$0xff] }
  0x3f   :  { %337 = vmatpush.msrb.mxu3 %v3637_v24  ;;  %318 = vmatpush.msrb.mxu2 %v3644_v25 }
  0x40   :  { %377 = vmatpush.msra.mxu0 %v3364_v30  ;;  %397 = vmatpush.msra.mxu1 %v3389_v39  ;;  %v3649_v30 = vld [vmem:[%s5687_s4 + $0x28] sm:$0xff]  ;;  %v3656_v39 = vld [vmem:[%s5687_s4 + $0x10] sm:$0xff] }
  0x41   :  { %2996 = vmatmul.msk.f32.vlgmr.msra.gmra.mxu0 %vm102_vm0, %v2995_v0  ;;  %2997 = vmatmul.msk.f32.vlgmr.msra.gmra.mxu1 %vm102_vm0, %v2995_v0  ;;  %v3040_v0 = vld [vmem:[%s5683_s1 + $0x350] sm:$0xff] }
  0x42   :  { %338 = vmatpush.msrb.mxu3 %v3649_v30  ;;  %319 = vmatpush.msrb.mxu2 %v3656_v39  ;;  %v494_v33 = vpack.c.bf16 %v3041_v5, %v3040_v0  ;;  %v3035_v0 = vld [vmem:[%s5683_s1 + $0x328] sm:$0xff]  ;;  %v3050_v5 = vld [vmem:[%s5683_s1 + $0x3a0] sm:$0xff] }
  0x43   :  { %531 = vmatpush.bf16.msrb.mxu0 %v496_v54  ;;  %544 = vmatpush.bf16.msrb.mxu1 %v504_v59  ;;  %v3000_v54 = vld [vmem:[%s5683_s1 + $0x210] sm:$0xff]  ;;  %v3017_v59 = vld [vmem:[%s5683_s1 + $0x298] sm:$0xff] }
  0x44   :  { %339 = vmatpush.msrb.mxu3 %v3661_v29  ;;  %320 = vmatpush.msrb.mxu2 %v3668_v31  ;;  %v474_v57 = vpack.c.bf16 %v3001_v55, %v3000_v54  ;;  %v482_v63 = vpack.c.bf16 %v3017_v59, %v3016_v56 }
  0x46   :  { %340 = vmatpush.msrb.mxu3 %v3673_v32  ;;  %505 = vmatpush.bf16.msra.mxu2 %v480_v37  ;;  %v502_v37 = vpack.c.bf16 %v3057_v35, %v3056_v34  ;;  %v3032_v35 = vld [vmem:[%s5683_s1 + $0x310] sm:$0xff] }
  0x47   :  { %532 = vmatpush.bf16.msrb.mxu0 %v495_v12  ;;  %545 = vmatpush.bf16.msrb.mxu1 %v503_v16  ;;  %v2998_v12 = vld [vmem:[%s5683_s1 + $0x200] sm:$0xff] }
  0x48   :  { %518 = vmatpush.bf16.msra.mxu3 %v488_v38  ;;  %v473_v19 = vpack.c.bf16 %v2999_v13, %v2998_v12 }
  0x4a   :  { %506 = vmatpush.bf16.msra.mxu2 %v479_v44  ;;  %v475_v44 = vpack.c.bf16 %v3003_v42, %v3002_v41  ;;  %v3030_v42 = vld [vmem:[%s5683_s1 + $0x300] sm:$0xff] }
  0x4b   :  { %533 = vmatpush.bf16.msrb.mxu0 %v494_v33  ;;  %546 = vmatpush.bf16.msrb.mxu1 %v502_v37  ;;  %v3048_v37 = vld [vmem:[%s5683_s1 + $0x390] sm:$0xff] }
  0x4c   :  { %519 = vmatpush.bf16.msra.mxu3 %v487_v45  ;;  %v3019_v45 = vld [vmem:[%s5683_s1 + $0x2a8] sm:$0xff] }
  0x4e   :  { %507 = vmatpush.bf16.msra.mxu2 %v478_v49  ;;  %v483_v49 = vpack.c.bf16 %v3019_v45, %v3018_v43  ;;  %v3031_v43 = vld [vmem:[%s5683_s1 + $0x308] sm:$0xff] }
  0x4f   :  { %534 = vmatpush.bf16.msrb.mxu0 %v493_v50  ;;  %v497_v50 = vpack.c.bf16 %v3047_v47, %v3046_v46 }
  0x50   :  { %520 = vmatpush.bf16.msra.mxu3 %v486_v53  ;;  %v501_v53 = vpack.c.bf16 %v3055_v52, %v3054_v51 }
  0x52   :  { %508 = vmatpush.bf16.msra.mxu2 %v477_v6  ;;  %547 = vmatpush.bf16.msrb.mxu1 %v501_v53  ;;  %v492_v6 = vpack.c.bf16 %v3037_v62, %v3036_v60 }
  0x54   :  { %521 = vmatpush.bf16.msra.mxu3 %v485_v7  ;;  %v3052_v7 = vld [vmem:[%s5683_s1 + $0x3b0] sm:$0xff]  ;;  %535 = vmatpush.bf16.msrb.mxu0 %v492_v6 }
  0x55   :  { %v500_v9 = vpack.c.bf16 %v3053_v8, %v3052_v7 }
  0x56   :  { %509 = vmatpush.bf16.msra.mxu2 %v476_v23  ;;  %v3034_v23 = vld [vmem:[%s5683_s1 + $0x320] sm:$0xff] }
  0x57   :  { %548 = vmatpush.bf16.msrb.mxu1 %v500_v9  ;;  %v491_v33 = vpack.c.bf16 %v3035_v0, %v3034_v23 }
  0x58   :  { %522 = vmatpush.bf16.msra.mxu3 %v484_v10  ;;  %v3051_v10 = vld [vmem:[%s5683_s1 + $0x3a8] sm:$0xff] }
  0x59   :  { %v499_v34 = vpack.c.bf16 %v3051_v10, %v3050_v5  ;;  %536 = vmatpush.bf16.msrb.mxu0 %v491_v33  ;;  %v638_v5 = vlaneseq  ;;  %v3940_v33 = vld [vmem:[%s5688_s5 + $0x8] sm:$0xff] }
  0x5a   :  { %510 = vmatpush.bf16.msra.mxu2 %v475_v44 }
  0x5b   :  { %549 = vmatpush.bf16.msrb.mxu1 %v499_v34  ;;  %v3935_v10 = vand.u32 127, %v638_v5  ;;  %v3944_v34 = vperm.slane %v3940_v33, 0 }
  0x5c   :  { %523 = vmatpush.bf16.msra.mxu3 %v483_v49  ;;  %v489_v49 = vpack.c.bf16 %v3031_v43, %v3030_v42 }
  0x5d   :  { %vm640_vm2 = vcmp.lt.s32.totalorder %v3935_v10, 17  ;;  %vm676_vm3 = vcmp.lt.s32.totalorder %v3935_v10, 16  ;;  %vm724_vm4 = vcmp.lt.s32.totalorder %v3935_v10, 15  ;;  %vm760_vm5 = vcmp.lt.s32.totalorder %v3935_v10, 1 }
  0x5e   :  { %511 = vmatpush.bf16.msra.mxu2 %v474_v57  ;;  %vm823_vm6 = vcmp.lt.s32.totalorder %v3935_v10, 127  ;;  %vm871_vm7 = vcmp.lt.s32.totalorder %v3935_v10, 113  ;;  %vm907_vm8 = vcmp.lt.s32.totalorder %v3935_v10, 112  ;;  %vm955_vm9 = vcmp.lt.s32.totalorder %v3935_v10, 111 }
  0x60   :  { %524 = vmatpush.bf16.msra.mxu3 %v482_v63 }
  0x62   :  { %512 = vmatpush.bf16.msra.mxu2 %v473_v19 }
  0x64   :  { %525 = vmatpush.bf16.msra.mxu3 %v481_v26 }
  0x8e   :  { %v143_v36 = vpop.f32.mrf.mxu1  ;;  %v123_v40 = vpop.f32.mrf.mxu0 }
  0x8f   :  { %v148_v38 = vrot.slane %v143_v36, 4  ;;  %v3033_v36 = vld [vmem:[%s5683_s1 + $0x318] sm:$0xff] }
  0x91   :  { %v3794_v48 = vsel %vm149_vm1, %v123_v40, %v148_v38  ;;  %v3049_v38 = vld [vmem:[%s5683_s1 + $0x398] sm:$0xff]  ;;  %v490_v40 = vpack.c.bf16 %v3033_v36, %v3032_v35  ;;  %s3157_s1 = smov 1  }
  0x92   :  { %619 = vst [vmem:[#allocation1] ss:$2 sm:$0xff] %v3794_v48  ;;  %v498_v41 = vpack.c.bf16 %v3049_v38, %v3048_v37 }
  0x93   :  { %537 = vmatpush.bf16.msrb.mxu0 %v490_v40 }
  0x94   :  { %550 = vmatpush.bf16.msrb.mxu1 %v498_v41  ;;  %v3960_v41 = vperm.slane %v3940_v33, 1 }
  0x97   :  { %538 = vmatpush.bf16.msrb.mxu0 %v489_v49  ;;  %v3974_v49 = vperm.slane %v3940_v33, 2 }
  0x98   :  { %551 = vmatpush.bf16.msrb.mxu1 %v497_v50 }
  0x99   :  { %v623_v16 = vld.sshfl [vmem:[#allocation1 + $0x8] sm:$0xff pattern:$0x75316420]  ;;  %v622_v18 = vld.sshfl [vmem:[#allocation1] sm:$0xff pattern:$0x75316420] }
  0x9a   :  { %632 = vrot.lane.b32.xlu1 %v623_v16, %s3154_s21  ;;  %630 = vrot.lane.b32.xlu0 %v622_v18, %s3154_s21  ;;  %657 = vst [vmem:[#allocation1] ss:$2 sm:$0xff] %v3794_v48 }
  0x9b   :  { %539 = vmatmul.bf16.vlgmr.msrb.gmra.mxu0 %v3556_v27  ;;  %552 = vmatmul.bf16.vlgmr.msrb.gmra.mxu1 %v3558_v28 }
  0xa1   :  { %v661_v44 = vld.sshfl [vmem:[#allocation1 + $0x8] sm:$0xff pattern:$0x75316420]  ;;  %v660_v45 = vld.sshfl [vmem:[#allocation1] sm:$0xff pattern:$0x75316420] }
  0xa2   :  { %670 = vrot.lane.b32.xlu1 %v661_v44, %s3155_s2  ;;  %668 = vrot.lane.b32.xlu0 %v660_v45, %s3155_s2  ;;  %705 = vst [vmem:[#allocation1] ss:$2 sm:$0xff] %v3794_v48 }
  0xa9   :  { %v709_v51 = vld.sshfl [vmem:[#allocation1 + $0x8] sm:$0xff pattern:$0x75316420]  ;;  %v708_v52 = vld.sshfl [vmem:[#allocation1] sm:$0xff pattern:$0x75316420] }
  0xaa   :  { %v258_v53 = vpop.f32.mrf.mxu2  ;;  %718 = vrot.lane.b32.xlu1 %v709_v51, %s3156_s25  ;;  %716 = vrot.lane.b32.xlu0 %v708_v52, %s3156_s25  ;;  %741 = vst [vmem:[#allocation1] ss:$2 sm:$0xff] %v3794_v48  ;;  %v271_v54 = vpop.f32.mrf.mxu3 }
  0xab   :  { %v272_v55 = vadd.f32 %v271_v54, %v258_v53  ;;  %v3987_v54 = vperm.slane %v3940_v33, 3 }
  0xad   :  { %5718 = vst [vmem:[#allocation5_spill] sm:$0xff] %v3987_v54 }
  0xae   :  { %v284_v56 = vpop.f32.mrf.mxu0  ;;  %v297_v59 = vpop.f32.mrf.mxu1 }
  0xaf   :  { %v285_v57 = vadd.f32 %v284_v56, %v272_v55 }
  0xb1   :  { %v298_v60 = vadd.f32 %v297_v59, %v285_v57  ;;  %v745_v62 = vld.sshfl [vmem:[#allocation1 + $0x8] sm:$0xff pattern:$0x75316420]  ;;  %v744_v63 = vld.sshfl [vmem:[#allocation1] sm:$0xff pattern:$0x75316420] }
  0xb2   :  { %v260_v6 = vpop.f32.mrf.mxu2  ;;  %754 = vrot.lane.b32.xlu1 %v745_v62, %s3157_s1  ;;  %752 = vrot.lane.b32.xlu0 %v744_v63, %s3157_s1  ;;  %789 = vst [vmem:[#allocation1] ss:$2 sm:$0xff] %v3794_v48  ;;  %v273_v8 = vpop.f32.mrf.mxu3 }
  0xb3   :  { %v301_v7 = vmax.f32 %v298_v60, 0.0  ;;  %v4000_v60 = vld [vmem:[%s5688_s5] sm:$0xff] }
  0xb5   :  { %2993 = vmatmul.msk.f32.vlgmr.msrb.gmra.mxu2 %vm102_vm0, %v301_v7  ;;  %2994 = vmatmul.msk.f32.vlgmr.msrb.gmra.mxu3 %vm102_vm0, %v301_v7  ;;  %v4003_v7 = vperm.slane %v4000_v60, 1 }
  0xb6   :  { %v286_v27 = vpop.f32.mrf.mxu0  ;;  %569 = vmatpush.msrb.mxu2 %v3586_v1  ;;  %589 = vmatpush.msrb.mxu3 %v3591_v2  ;;  %v299_v28 = vpop.f32.mrf.mxu1 }
  0xb8   :  { %570 = vmatpush.msrb.mxu2 %v3598_v3  ;;  %590 = vmatpush.msrb.mxu3 %v3603_v4 }
  0xb9   :  { %v792_v9 = vld.sshfl [vmem:[#allocation1] sm:$0xff pattern:$0x75316420]  ;;  %v793_v12 = vld.sshfl [vmem:[#allocation1 + $0x8] sm:$0xff pattern:$0x75316420] }
  0xba   :  { %571 = vmatpush.msrb.mxu2 %v3610_v11  ;;  %591 = vmatpush.msrb.mxu3 %v3615_v14  ;;  %800 = vst [vmem:[#allocation4 + $0xd8] sm:$0xf] %v792_v9 }
  0xbb   :  { %801 = vst [vmem:[#allocation4 + $0x30] sm:$0xf] %v793_v12 }
  0xbc   :  { %572 = vmatpush.msrb.mxu2 %v3620_v17  ;;  %592 = vmatpush.msrb.mxu3 %v3627_v21  ;;  %804 = vst [vmem:[#allocation1] ss:$2 sm:$0xff] %v3794_v48 }
  0xbd   :  { %513 = vmatmul.bf16.vlgmr.msra.gmra.mxu2 %v3523_v58  ;;  %526 = vmatmul.bf16.vlgmr.msra.gmra.mxu3 %v3531_v61 }
  0xbe   :  { %573 = vmatpush.msrb.mxu2 %v3632_v22  ;;  %593 = vmatpush.msrb.mxu3 %v3637_v24  ;;  %v399_v1 = vpop.f32.mrf.mxu1  ;;  %v379_v2 = vpop.f32.mrf.mxu0 }
  0xbf   :  { %v404_v3 = vrot.slane %v399_v1, 4 }
  0xc0   :  { %574 = vmatpush.msrb.mxu2 %v3644_v25  ;;  %594 = vmatpush.msrb.mxu3 %v3649_v30 }
  0xc1   :  { %v405_v4 = vsel %vm149_vm1, %v379_v2, %v404_v3  ;;  %v4012_v2 = vperm.slane %v4000_v60, 2 }
  0xc2   :  { %575 = vmatpush.msrb.mxu2 %v3656_v39  ;;  %595 = vmatpush.msrb.mxu3 %v3661_v29  ;;  %621 = vst [vmem:[#allocation1 + $0x10] ss:$2 sm:$0xff] %v405_v4 }
  0xc3   :  { %v808_v58 = vld.sshfl [vmem:[#allocation1 + $0x8] sm:$0xff pattern:$0x75316420]  ;;  %v807_v61 = vld.sshfl [vmem:[#allocation1] sm:$0xff pattern:$0x75316420] }
  0xc4   :  { %576 = vmatpush.msrb.mxu2 %v3668_v31  ;;  %596 = vmatpush.msrb.mxu3 %v3673_v32  ;;  %852 = vst [vmem:[#allocation1] ss:$2 sm:$0xff] %v3794_v48 }
  0xc5   :  { %817 = vrot.lane.b32.xlu1 %v808_v58, %s3158_s0  ;;  %815 = vrot.lane.b32.xlu0 %v807_v61, %s3158_s0 }
  0xc9   :  { %v3914_v11 = vld.sshfl [vmem:[#allocation1 + $0x10] sm:$0xff pattern:$0x75316420]  ;;  %v3916_v14 = vld.sshfl [vmem:[#allocation1 + $0x18] sm:$0xff pattern:$0x75316420] }
  0xca   :  { %659 = vst [vmem:[#allocation1 + $0x10] ss:$2 sm:$0xff] %v405_v4 }
  0xcb   :  { %v856_v17 = vld.sshfl [vmem:[#allocation1 + $0x8] sm:$0xff pattern:$0x75316420]  ;;  %v855_v21 = vld.sshfl [vmem:[#allocation1] sm:$0xff pattern:$0x75316420] }
  0xcc   :  { %888 = vst [vmem:[#allocation1] ss:$2 sm:$0xff] %v3794_v48 }
  0xcd   :  { %865 = vrot.lane.b32.xlu1 %v856_v17, %s3159_s26  ;;  %863 = vrot.lane.b32.xlu0 %v855_v21, %s3159_s26 }
  0xd1   :  { %v663_v22 = vld.sshfl [vmem:[#allocation1 + $0x18] sm:$0xff pattern:$0x75316420]  ;;  %v3921_v24 = vld.sshfl [vmem:[#allocation1 + $0x10] sm:$0xff pattern:$0x75316420] }
  0xd2   :  { %674 = vrot.lane.b32.xlu2 %v663_v22, %s3155_s2  ;;  %707 = vst [vmem:[#allocation1 + $0x10] ss:$2 sm:$0xff] %v405_v4 }
  0xd3   :  { %v891_v25 = vld.sshfl [vmem:[#allocation1] sm:$0xff pattern:$0x75316420]  ;;  %v892_v30 = vld.sshfl [vmem:[#allocation1 + $0x8] sm:$0xff pattern:$0x75316420] }
  0xd4   :  { %936 = vst [vmem:[#allocation1] ss:$2 sm:$0xff] %v3794_v48 }
  0xd5   :  { %899 = vrot.lane.b32.xlu0 %v891_v25, %s3160_s27 }
  0xd9   :  { %v711_v39 = vld.sshfl [vmem:[#allocation1 + $0x18] sm:$0xff pattern:$0x75316420]  ;;  %v710_v29 = vld.sshfl [vmem:[#allocation1 + $0x10] sm:$0xff pattern:$0x75316420] }
  0xda   :  { %722 = vrot.lane.b32.xlu2 %v711_v39, %s3156_s25  ;;  %743 = vst [vmem:[#allocation1 + $0x10] ss:$2 sm:$0xff] %v405_v4 }
  0xdb   :  { %v939_v31 = vld.sshfl [vmem:[#allocation1] sm:$0xff pattern:$0x75316420]  ;;  %v940_v15 = vld.sshfl [vmem:[#allocation1 + $0x8] sm:$0xff pattern:$0x75316420] }
  0xdc   :  { %947 = vrot.lane.b32.xlu1 %v939_v31, %s3161_s28 }
  0xdd   :  { %901 = vrot.lane.b32.xlu0 %v892_v30, %s3160_s27  ;;  %v4031_v30 = vperm.slane %v4000_v60, 3 }
  0xe1   :  { %v746_v32 = vld.sshfl [vmem:[#allocation1 + $0x10] sm:$0xff pattern:$0x75316420]  ;;  %v747_v13 = vld.sshfl [vmem:[#allocation1 + $0x18] sm:$0xff pattern:$0x75316420] }
  0xe2   :  { %758 = vrot.lane.b32.xlu2 %v747_v13, %s3157_s1  ;;  %791 = vst [vmem:[#allocation1 + $0x10] ss:$2 sm:$0xff] %v405_v4 }
  0xe9   :  { %v794_v16 = vld.sshfl [vmem:[#allocation1 + $0x10] sm:$0xff pattern:$0x75316420]  ;;  %v795_v18 = vld.sshfl [vmem:[#allocation1 + $0x18] sm:$0xff pattern:$0x75316420] }
  0xea   :  { %802 = vst [vmem:[#allocation4 + $0xb0] sm:$0xf] %v794_v16  ;;  %949 = vrot.lane.b32.xlu2 %v940_v15, %s3161_s28 }
  0xeb   :  { %803 = vst [vmem:[#allocation4 + $0x158] sm:$0xf] %v795_v18 }
  0xec   :  { %806 = vst [vmem:[#allocation1 + $0x10] ss:$2 sm:$0xff] %v405_v4 }
  0xf3   :  { %v809_v48 = vld.sshfl [vmem:[#allocation1 + $0x10] sm:$0xff pattern:$0x75316420]  ;;  %v810_v19 = vld.sshfl [vmem:[#allocation1 + $0x18] sm:$0xff pattern:$0x75316420] }
  0xf4   :  { %819 = vrot.lane.b32.xlu2 %v809_v48, %s3158_s0  ;;  %854 = vst [vmem:[#allocation1 + $0x10] ss:$2 sm:$0xff] %v405_v4 }
  0xfb   :  { %v857_v20 = vld.sshfl [vmem:[#allocation1 + $0x10] sm:$0xff pattern:$0x75316420]  ;;  %v858_v23 = vld.sshfl [vmem:[#allocation1 + $0x18] sm:$0xff pattern:$0x75316420] }
  0xfc   :  { %867 = vrot.lane.b32.xlu2 %v857_v20, %s3159_s26  ;;  %890 = vst [vmem:[#allocation1 + $0x10] ss:$2 sm:$0xff] %v405_v4 }
 0x103   :  { %v894_v26 = vld.sshfl [vmem:[#allocation1 + $0x18] sm:$0xff pattern:$0x75316420]  ;;  %v893_v0 = vld.sshfl [vmem:[#allocation1 + $0x10] sm:$0xff pattern:$0x75316420] }
 0x104   :  { %905 = vrot.lane.b32.xlu0 %v894_v26, %s3160_s27  ;;  %903 = vrot.lane.b32.xlu1 %v893_v0, %s3160_s27  ;;  %938 = vst [vmem:[#allocation1 + $0x10] ss:$2 sm:$0xff] %v405_v4  ;;  %v4018_v4 = vperm.slane %v4000_v60, 5 }
 0x10b   :  { %v941_v35 = vld.sshfl [vmem:[#allocation1 + $0x10] sm:$0xff pattern:$0x75316420]  ;;  %v942_v42 = vld.sshfl [vmem:[#allocation1 + $0x18] sm:$0xff pattern:$0x75316420] }
 0x10c   :  { %869 = vrot.lane.b32.xlu0 %v858_v23, %s3159_s26  ;;  %951 = vrot.lane.b32.xlu2 %v941_v35, %s3161_s28  ;;  %v3948_v36 = vpop.permute.xlu1 %632  ;;  %v3950_v37 = vpop.permute.xlu0 %630 }
 0x10d   :  { %756 = vrot.lane.b32.xlu1 %v746_v32, %s3157_s1  ;;  %v643_v38 = vsel %vm640_vm2, %v3950_v37, %v3948_v36 }
 0x10e   :  { %v650_v40 = vmul.f32 %v3944_v34, %v643_v38 }
 0x110   :  { %654 = vst [vmem:[#allocation4 + $0x18] sm:$0xf] %v650_v40 }
 0x114   :  { %720 = vrot.lane.b32.xlu0 %v710_v29, %s3156_s25  ;;  %636 = vrot.lane.b32.xlu2 %v3916_v14, %s3154_s21  ;;  %v3965_v43 = vpop.permute.xlu1 %670  ;;  %v669_v44 = vpop.permute.xlu0 %668  ;;  %v4037_v29 = vperm.slane %v4000_v60, 6 }
 0x115   :  { %953 = vrot.lane.b32.xlu1 %v942_v42, %s3161_s28  ;;  %v679_v45 = vsel %vm676_vm3, %v669_v44, %v3965_v43 }
 0x116   :  { %v686_v46 = vmul.f32 %v3960_v41, %v679_v45 }
 0x118   :  { %v694_v47 = vrot.slane %v686_v46, 4  ;;  %v540_v63 = vpop.f32.mrf.mxu0  ;;  %v553_v6 = vpop.f32.mrf.mxu1  ;;  %v4070_v46 = vperm.slane %v3940_v33, 5 }
 0x11a   :  { %702 = vst [vmem:[#allocation4 + $0x18] sm:$0xf0] %v694_v47  ;;  %v4074_v47 = vperm.slane %v4000_v60, 7 }
 0x11c   :  { %821 = vrot.lane.b32.xlu2 %v810_v19, %s3158_s0  ;;  %v3977_v50 = vpop.permute.xlu1 %718  ;;  %v717_v51 = vpop.permute.xlu0 %716  ;;  %5721 = vst [vmem:[#allocation8_spill] sm:$0xff] %v4074_v47 }
 0x11d   :  { %634 = vrot.lane.b32.xlu1 %v3914_v11, %s3154_s21  ;;  %v727_v52 = vsel %vm724_vm4, %v717_v51, %v3977_v50 }
 0x11e   :  { %v734_v53 = vmul.f32 %v3974_v49, %v727_v52 }
 0x120   :  { %738 = vst [vmem:[#allocation4 + $0x68] sm:$0xf] %v734_v53  ;;  %v542_v12 = vpop.f32.mrf.mxu0  ;;  %v555_v1 = vpop.f32.mrf.mxu1 }
 0x121   :  { %v4103_v12 = vperm.slane %v3940_v33, 6 }
 0x124   :  { %672 = vrot.lane.b32.xlu2 %v3921_v24, %s3155_s2  ;;  %v3991_v55 = vpop.permute.xlu1 %754  ;;  %v753_v56 = vpop.permute.xlu0 %752 }
 0x125   :  { %v763_v57 = vsel %vm760_vm5, %v753_v56, %v3991_v55 }
 0x126   :  { %v770_v59 = vmul.f32 %v3987_v54, %v763_v57 }
 0x128   :  { %v778_v62 = vrot.slane %v770_v59, 4 }
 0x12a   :  { %786 = vst [vmem:[#allocation4 + $0x68] sm:$0xf0] %v778_v62 }
 0x12c   :  { %v4005_v8 = vpop.permute.xlu2 %674 }
 0x12d   :  { %v680_v27 = vsel %vm676_vm3, %v4005_v8, %v669_v44 }
 0x12e   :  { %v685_v28 = vmul.f32 %v4003_v7, %v680_v27 }
 0x130   :  { %v693_v9 = vrot.slane %v685_v28, 4 }
 0x132   :  { %701 = vst [vmem:[#allocation4 + $0x100] sm:$0xf0] %v693_v9 }
 0x134   :  { %v4014_v3 = vpop.permute.xlu2 %722 }
 0x135   :  { %v728_v58 = vsel %vm724_vm4, %v4014_v3, %v717_v51  ;;  %v4080_v51 = vld [vmem:[%s5688_s5 + $0x20] ss:$0 sm:$0xff] }
 0x136   :  { %v733_v61 = vmul.f32 %v4012_v2, %v728_v58 }
 0x137   :  { %v818_v11 = vpop.permute.xlu1 %817  ;;  %v4024_v14 = vpop.permute.xlu0 %815 }
 0x138   :  { %v826_v17 = vsel %vm823_vm6, %v4024_v14, %v818_v11  ;;  %v322_v21 = vpop.f32.mrf.mxu2  ;;  %v342_v22 = vpop.f32.mrf.mxu3  ;;  %737 = vst [vmem:[#allocation4 + $0xe8] sm:$0xf] %v733_v61 }
 0x139   :  { %v832_v24 = vmul.f32 %v4018_v4, %v826_v17  ;;  %345 = vst [vmem:[#allocation3 + $0x10] sm:$0xf] %v322_v21 }
 0x13a   :  { %346 = vst [vmem:[#allocation3 + $0x20] sm:$0xf] %v342_v22 }
 0x13b   :  { %v840_v25 = vrot.slane %v832_v24, 4  ;;  %v4121_v24 = vld [vmem:[%s5688_s5 + $0x28] ss:$0 sm:$0xff] }
 0x13c   :  { %v4033_v39 = vpop.permute.xlu2 %758 }
 0x13d   :  { %848 = vst [vmem:[#allocation4 + $0xd8] sm:$0xf0] %v840_v25  ;;  %v764_v31 = vsel %vm760_vm5, %v4033_v39, %v753_v56 }
 0x13e   :  { %v769_v32 = vmul.f32 %v4031_v30, %v764_v31 }
 0x13f   :  { %v866_v13 = vpop.permute.xlu1 %865  ;;  %v4043_v15 = vpop.permute.xlu0 %863 }
 0x140   :  { %v874_v16 = vsel %vm871_vm7, %v4043_v15, %v866_v13  ;;  %v514_v18 = vpop.f32.mrf.mxu2  ;;  %v527_v48 = vpop.f32.mrf.mxu3  ;;  %v777_v19 = vrot.slane %v769_v32, 4  ;;  %v4049_v26 = vld [vmem:[#allocation3 + $0x10] sm:$0xf] }
 0x141   :  { %v880_v20 = vmul.f32 %v4037_v29, %v874_v16  ;;  %v528_v23 = vadd.f32 %v527_v48, %v514_v18  ;;  %5719 = vst [vmem:[#allocation6_spill] sm:$0xff] %v4049_v26  ;;  %v4051_v0 = vld [vmem:[#allocation3 + $0x20] sm:$0xf]  ;;  %1712 = vrot.lane.b32.xlu2 %v4049_v26, %s3161_s28 }
 0x142   :  { %5720 = vst [vmem:[#allocation7_spill] sm:$0xff] %v4051_v0  ;;  %1648 = vrot.lane.b32.xlu0 %v4051_v0, %s3160_s27  ;;  %1716 = vrot.lane.b32.xlu1 %v4051_v0, %s3161_s28 }
 0x143   :  { %1530 = vst [vmem:[#allocation4 + $0x1a8] sm:$0xf] %v4049_v26  ;;  %v541_v5 = vadd.f32 %v540_v63, %v528_v23 }
 0x144   :  { %785 = vst [vmem:[#allocation4 + $0xe8] sm:$0xf0] %v777_v19  ;;  %v950_v38 = vpop.permute.xlu2 %949  ;;  %v980_v21 = vld [vmem:[#allocation4 + $0xd8] sm:$0xff] }
 0x145   :  { %884 = vst [vmem:[#allocation4 + $0x108] sm:$0xf] %v880_v20  ;;  %v554_v35 = vadd.f32 %v553_v6, %v541_v5  ;;  %v4144_v20 = vld [vmem:[%s5688_s5 + $0x18] sm:$0xff] }
 0x146   :  { %1531 = vst [vmem:[#allocation4 + $0x40] sm:$0xf] %v4051_v0  ;;  %v4161_v5 = vperm.slane %v4144_v20, 5 }
 0x147   :  { %v557_v40 = vmax.f32 %v554_v35, 0.0  ;;  %v4061_v42 = vpop.permute.xlu0 %899 }
 0x148   :  { %v516_v44 = vpop.f32.mrf.mxu2  ;;  %v529_v45 = vpop.f32.mrf.mxu3 }
 0x149   :  { %3062 = vmatmul.msk.f32.vlgmr.msrb.gmra.mxu2 %vm102_vm0, %v557_v40  ;;  %3063 = vmatmul.msk.f32.vlgmr.msrb.gmra.mxu3 %vm102_vm0, %v557_v40  ;;  %v4167_v44 = vperm.slane %v3940_v33, 7 }
 0x14a   :  { %1604 = vrot.lane.b32.xlu0 %v4049_v26, %s3159_s26  ;;  %1644 = vrot.lane.b32.xlu1 %v4049_v26, %s3160_s27 }
 0x14b   :  { %v976_v22 = vld [vmem:[#allocation4 + $0xe8] sm:$0xff]  ;;  %5722 = vst [vmem:[#allocation9_spill] sm:$0xff] %v4167_v44 }
 0x14e   :  { %v820_v52 = vpop.permute.xlu2 %819  ;;  %v4090_v59 = vpop.permute.xlu1 %947 }
 0x14f   :  { %v4082_v53 = vpop.permute.xlu0 %901  ;;  %v825_v56 = vsel %vm823_vm6, %v818_v11, %v820_v52  ;;  %v958_v6 = vsel %vm955_vm9, %v4090_v59, %v950_v38 }
 0x150   :  { %v910_v57 = vsel %vm907_vm8, %v4061_v42, %v4082_v53  ;;  %v833_v62 = vmul.f32 %v4070_v46, %v825_v56  ;;  %v964_v27 = vmul.f32 %v4080_v51, %v958_v6 }
 0x151   :  { %v916_v63 = vmul.f32 %v4074_v47, %v910_v57 }
 0x152   :  { %v841_v28 = vrot.slane %v833_v62, 4  ;;  %1540 = vrot.lane.b32.xlu0 %v4051_v0, %s3158_s0  ;;  %1608 = vrot.lane.b32.xlu1 %v4051_v0, %s3159_s26  ;;  %968 = vst [vmem:[#allocation4 + $0x188] sm:$0xf] %v964_v27 }
 0x153   :  { %v924_v9 = vrot.slane %v916_v63, 4 }
 0x154   :  { %849 = vst [vmem:[#allocation4 + $0x30] sm:$0xf0] %v841_v28 }
 0x155   :  { %932 = vst [vmem:[#allocation4 + $0x108] sm:$0xf0] %v924_v9 }
 0x156   :  { %v4105_v1 = vpop.permute.xlu2 %867 }
 0x157   :  { %v873_v58 = vsel %vm871_vm7, %v866_v13, %v4105_v1  ;;  %v4132_v13 = vperm.slane %v4000_v60, 0  ;;  %v4149_v60 = vld [vmem:[%s5688_s5 + $0x10] sm:$0xff] }
 0x158   :  { %v881_v61 = vmul.f32 %v4103_v12, %v873_v58  ;;  %v4158_v23 = vperm.slane %v4149_v60, 5  ;;  %v4164_v35 = vperm.slane %v4149_v60, 7 }
 0x159   :  { %v988_v11 = vld [vmem:[#allocation4 + $0x188] sm:$0xf] }
 0x15a   :  { %885 = vst [vmem:[#allocation4 + $0x110] sm:$0xf] %v881_v61  ;;  %1464 = vrot.lane.b32.xlu0 %v4051_v0, %s3157_s1  ;;  %1536 = vrot.lane.b32.xlu1 %v4049_v26, %s3158_s0 }
 0x15b   :  { %3065 = vmatpush.msk.msra.mxu2 %vm149_vm1, %v988_v11 }
 0x15c   :  { %v984_v17 = vld [vmem:[#allocation4 + $0x108] sm:$0xff] }
 0x15d   :  { %1020 = vmatpush.msra.mxu2 %v984_v17  ;;  %v4195_v17 = vperm.slane %v4149_v60, 6 }
 0x15f   :  { %1021 = vmatpush.msra.mxu2 %v980_v21  ;;  %5723 = vst [vmem:[#allocation10_spill] sm:$0xff] %v4195_v17  ;;  %v4198_v21 = vperm.slane %v4144_v20, 6 }
 0x161   :  { %1022 = vmatpush.msra.mxu2 %v976_v22  ;;  %5724 = vst [vmem:[#allocation11_spill] sm:$0xff] %v4198_v21 }
 0x162   :  { %1460 = vrot.lane.b32.xlu1 %v4049_v26, %s3157_s1 }
 0x166   :  { %v4123_v25 = vpop.permute.xlu2 %951 }
 0x167   :  { %v957_v31 = vsel %vm955_vm9, %v950_v38, %v4123_v25 }
 0x168   :  { %v965_v32 = vmul.f32 %v4121_v24, %v957_v31  ;;  %v4201_v31 = vperm.slane %v4149_v60, 1 }
 0x16a   :  { %969 = vst [vmem:[#allocation4 + $0x138] sm:$0xf] %v965_v32  ;;  %1420 = vrot.lane.b32.xlu1 %v4049_v26, %s3156_s25  ;;  %v4204_v32 = vperm.slane %v4144_v20, 1 }
 0x16c   :  { %5725 = vst [vmem:[#allocation12_spill] sm:$0xff] %v4204_v32 }
 0x16e   :  { %v4134_v16 = vpop.permute.xlu2 %636 }
 0x16f   :  { %v644_v18 = vsel %vm640_vm2, %v4134_v16, %v3950_v37  ;;  %v4155_v37 = vperm.slane %v4144_v20, 7 }
 0x170   :  { %v649_v48 = vmul.f32 %v4132_v13, %v644_v18 }
 0x171   :  { %v989_v19 = vld [vmem:[#allocation4 + $0x138] sm:$0xf] }
 0x172   :  { %653 = vst [vmem:[#allocation4 + $0x100] sm:$0xf] %v649_v48  ;;  %3067 = vmatpush.msk.msra.mxu3 %vm149_vm1, %v989_v19  ;;  %1356 = vrot.lane.b32.xlu1 %v4051_v0, %s3155_s2  ;;  %v4207_v19 = vperm.slane %v4149_v60, 3 }
 0x176   :  { %v906_v38 = vpop.permute.xlu0 %905  ;;  %v822_v40 = vpop.permute.xlu2 %821 }
 0x177   :  { %v911_v45 = vsel %vm907_vm8, %v906_v38, %v4061_v42  ;;  %v824_v56 = vsel %vm823_vm6, %v820_v52, %v822_v40  ;;  %v827_v57 = vsel %vm823_vm6, %v822_v40, %v4024_v14  ;;  %v904_v62 = vpop.permute.xlu1 %903  ;;  %v4185_v42 = vld [vmem:[%s5689_s6] sm:$0xf] }
 0x178   :  { %v919_v63 = vmul.f32 %v4155_v37, %v911_v45  ;;  %v834_v6 = vmul.f32 %v4158_v23, %v824_v56  ;;  %v835_v33 = vmul.f32 %v4161_v5, %v827_v57  ;;  %v908_v27 = vsel %vm907_vm8, %v904_v62, %v906_v38 }
 0x179   :  { %v909_v14 = vsel %vm907_vm8, %v4082_v53, %v904_v62  ;;  %v918_v52 = vmul.f32 %v4164_v35, %v908_v27  ;;  %v972_v28 = vld [vmem:[#allocation4 + $0x100] sm:$0xff]  ;;  %v4210_v38 = vperm.slane %v4144_v20, 3 }
 0x17a   :  { %v927_v9 = vrot.slane %v919_v63, 4  ;;  %v842_v58 = vrot.slane %v834_v6, 4  ;;  %v843_v61 = vrot.slane %v835_v33, 4  ;;  %v917_v11 = vmul.f32 %v4167_v44, %v909_v14  ;;  %1023 = vmatpush.msra.mxu2 %v972_v28 }
 0x17b   :  { %3066 = vmatmul.msk.f32.vlgmr.msra.gmra.mxu2 %vm992_vm10, %v4185_v42  ;;  %v926_v22 = vrot.slane %v918_v52, 4 }
 0x17c   :  { %935 = vst [vmem:[#allocation4 + $0x178] sm:$0xf0] %v927_v9  ;;  %v925_v53 = vrot.slane %v917_v11, 4 }
 0x17d   :  { %850 = vst [vmem:[#allocation4 + $0xb0] sm:$0xf0] %v842_v58  ;;  %v4237_v58 = vperm.slane %v4149_v60, 2 }
 0x17e   :  { %851 = vst [vmem:[#allocation4 + $0x158] sm:$0xf0] %v843_v61  ;;  %v870_v18 = vpop.permute.xlu0 %869  ;;  %v673_v48 = vpop.permute.xlu2 %672  ;;  %v4250_v61 = vld [vmem:[%s5688_s5 + $0x38] ss:$0 sm:$0xff] }
 0x17f   :  { %933 = vst [vmem:[#allocation4 + $0x110] sm:$0xf0] %v925_v53  ;;  %v872_v40 = vsel %vm871_vm7, %v4105_v1, %v870_v18  ;;  %v875_v45 = vsel %vm871_vm7, %v870_v18, %v4043_v15  ;;  %v677_v56 = vsel %vm676_vm3, %v673_v48, %v4005_v8  ;;  %v678_v57 = vsel %vm676_vm3, %v3965_v43, %v673_v48  ;;  %v757_v62 = vpop.permute.xlu1 %756 }
 0x180   :  { %934 = vst [vmem:[#allocation4 + $0x50] sm:$0xf0] %v926_v22  ;;  %v882_v63 = vmul.f32 %v4195_v17, %v872_v40  ;;  %v883_v6 = vmul.f32 %v4198_v21, %v875_v45  ;;  %v687_v1 = vmul.f32 %v4201_v31, %v678_v57  ;;  %v688_v33 = vmul.f32 %v4204_v32, %v677_v56  ;;  %v981_v56 = vld [vmem:[#allocation4 + $0x30] sm:$0xff] }
 0x181   :  { %v761_v15 = vsel %vm760_vm5, %v757_v62, %v4033_v39  ;;  %v762_v8 = vsel %vm760_vm5, %v3991_v55, %v757_v62  ;;  %5726 = vst [vmem:[#allocation13_spill] sm:$0xff] %v4237_v58  ;;  %v4240_v39 = vperm.slane %v4144_v20, 2  ;;  %v4245_v55 = vld [vmem:[%s5688_s5 + $0x30] ss:$0 sm:$0xff] }
 0x182   :  { %886 = vst [vmem:[#allocation4 + $0x50] sm:$0xf] %v882_v63  ;;  %v695_v43 = vrot.slane %v687_v1, 4  ;;  %v696_v27 = vrot.slane %v688_v33, 4  ;;  %v771_v14 = vmul.f32 %v4207_v19, %v762_v8  ;;  %v772_v52 = vmul.f32 %v4210_v38, %v761_v15 }
 0x183   :  { %887 = vst [vmem:[#allocation4 + $0x178] sm:$0xf] %v883_v6  ;;  %v973_v6 = vld [vmem:[#allocation4 + $0x18] sm:$0xff]  ;;  %v4269_v1 = vperm.slane %v4149_v60, 0 }
 0x184   :  { %703 = vst [vmem:[#allocation4 + $0x150] sm:$0xf0] %v695_v43  ;;  %v779_v28 = vrot.slane %v771_v14, 4  ;;  %v780_v9 = vrot.slane %v772_v52, 4 }
 0x185   :  { %5727 = vst [vmem:[#allocation14_spill] sm:$0xff] %v4240_v39  ;;  %v983_v52 = vld [vmem:[#allocation4 + $0x158] sm:$0xff] }
 0x186   :  { %704 = vst [vmem:[#allocation4 + $0xe0] sm:$0xf0] %v696_v27  ;;  %v985_v11 = vld [vmem:[#allocation4 + $0x110] sm:$0xff]  ;;  %v721_v53 = vpop.permute.xlu0 %720 }
 0x187   :  { %787 = vst [vmem:[#allocation4 + $0xf0] sm:$0xf0] %v779_v28  ;;  %1040 = vmatpush.msra.mxu3 %v985_v11  ;;  %v725_v22 = vsel %vm724_vm4, %v721_v53, %v4014_v3  ;;  %v726_v18 = vsel %vm724_vm4, %v3977_v50, %v721_v53  ;;  %v954_v48 = vpop.permute.xlu1 %953  ;;  %v977_v50 = vld [vmem:[#allocation4 + $0x68] sm:$0xff]  ;;  %v5695_v53 = vmov 1.0  }
 0x188   :  { %788 = vst [vmem:[#allocation4 + $0x120] sm:$0xf0] %v780_v9  ;;  %v735_v40 = vmul.f32 %v4237_v58, %v726_v18  ;;  %v736_v45 = vmul.f32 %v4240_v39, %v725_v22  ;;  %v956_v57 = vsel %vm955_vm9, %v4123_v25, %v954_v48  ;;  %v959_v62 = vsel %vm955_vm9, %v954_v48, %v4090_v59 }
 0x189   :  { %1041 = vmatpush.msra.mxu3 %v981_v56  ;;  %v966_v3 = vmul.f32 %v4245_v55, %v956_v57  ;;  %v967_v63 = vmul.f32 %v4250_v61, %v959_v62  ;;  %5728 = vst [vmem:[#allocation15_spill] sm:$0xff] %v4269_v1  ;;  %v4272_v25 = vperm.slane %v4144_v20, 0  ;;  %v986_v27 = vld [vmem:[#allocation4 + $0x50] sm:$0xff]  ;;  %1088 = vmatpush.msrb.mxu2 %v5695_v53 }
 0x18a   :  { %739 = vst [vmem:[#allocation4 + $0xf0] sm:$0xf] %v735_v40  ;;  %v987_v14 = vld [vmem:[#allocation4 + $0x178] sm:$0xff] }
 0x18b   :  { %740 = vst [vmem:[#allocation4 + $0x120] sm:$0xf] %v736_v45  ;;  %1042 = vmatpush.msra.mxu3 %v977_v50  ;;  %1089 = vmatpush.msrb.mxu2 %v5695_v53 }
 0x18c   :  { %970 = vst [vmem:[#allocation4 + $0x1b8] sm:$0xf] %v966_v3 }
 0x18d   :  { %971 = vst [vmem:[#allocation4 + $0xc8] sm:$0xf] %v967_v63  ;;  %1043 = vmatpush.msra.mxu3 %v973_v6  ;;  %1090 = vmatpush.msrb.mxu2 %v5695_v53 }
 0x18e   :  { %5729 = vst [vmem:[#allocation16_spill] sm:$0xff] %v4272_v25  ;;  %3068 = vmatmul.msk.f32.vlgmr.msra.gmra.mxu3 %vm992_vm10, %v4185_v42 }
 0x18f   :  { %v635_v59 = vpop.permute.xlu1 %634  ;;  %1108 = vmatpush.msrb.mxu3 %v5695_v53  ;;  %1091 = vmatpush.msrb.mxu2 %v5695_v53 }
 0x190   :  { %v641_v33 = vsel %vm640_vm2, %v635_v59, %v4134_v16  ;;  %v642_v15 = vsel %vm640_vm2, %v3948_v36, %v635_v59  ;;  %v982_v16 = vld [vmem:[#allocation4 + $0xb0] sm:$0xff] }
 0x191   :  { %v651_v8 = vmul.f32 %v4269_v1, %v642_v15  ;;  %v652_v60 = vmul.f32 %v4272_v25, %v641_v33  ;;  %v978_v36 = vld [vmem:[#allocation4 + $0xf0] sm:$0xff]  ;;  %1109 = vmatpush.msrb.mxu3 %v5695_v53  ;;  %1092 = vmatpush.msrb.mxu2 %v5695_v53 }
 0x192   :  { %v979_v28 = vld [vmem:[#allocation4 + $0x120] sm:$0xff] }
 0x193   :  { %655 = vst [vmem:[#allocation4 + $0x150] sm:$0xf] %v651_v8  ;;  %v990_v43 = vld [vmem:[#allocation4 + $0x1b8] sm:$0xf]  ;;  %1110 = vmatpush.msrb.mxu3 %v5695_v53  ;;  %1093 = vmatpush.msrb.mxu2 %v5695_v53 }
 0x194   :  { %656 = vst [vmem:[#allocation4 + $0xe0] sm:$0xf] %v652_v60  ;;  %3069 = vmatpush.msk.msra.mxu0 %vm149_vm1, %v990_v43  ;;  %v991_v20 = vld [vmem:[#allocation4 + $0xc8] sm:$0xf] }
 0x195   :  { %3071 = vmatpush.msk.msra.mxu1 %vm149_vm1, %v991_v20  ;;  %1111 = vmatpush.msrb.mxu3 %v5695_v53 }
 0x196   :  { %1060 = vmatpush.msra.mxu0 %v986_v27  ;;  %1094 = vmatpush.msrb.mxu2 %v5695_v53 }
 0x197   :  { %1080 = vmatpush.msra.mxu1 %v987_v14  ;;  %1112 = vmatpush.msrb.mxu3 %v5695_v53 }
 0x198   :  { %1061 = vmatpush.msra.mxu0 %v982_v16  ;;  %1095 = vmatpush.msrb.mxu2 %v5695_v53 }
 0x199   :  { %1081 = vmatpush.msra.mxu1 %v983_v52  ;;  %1113 = vmatpush.msrb.mxu3 %v5695_v53 }
 0x19a   :  { %1062 = vmatpush.msra.mxu0 %v978_v36  ;;  %v974_v9 = vld [vmem:[#allocation4 + $0x150] sm:$0xff]  ;;  %1096 = vmatpush.msrb.mxu2 %v5695_v53 }
 0x19b   :  { %1082 = vmatpush.msra.mxu1 %v979_v28  ;;  %v975_v11 = vld [vmem:[#allocation4 + $0xe0] sm:$0xff]  ;;  %1114 = vmatpush.msrb.mxu3 %v5695_v53 }
 0x19c   :  { %1063 = vmatpush.msra.mxu0 %v974_v9  ;;  %1097 = vmatpush.msrb.mxu2 %v5695_v53 }
 0x19d   :  { %1083 = vmatpush.msra.mxu1 %v975_v11  ;;  %3070 = vmatmul.msk.f32.vlgmr.msra.gmra.mxu0 %vm992_vm10, %v4185_v42 }
 0x19e   :  { %3072 = vmatmul.msk.f32.vlgmr.msra.gmra.mxu1 %vm992_vm10, %v4185_v42  ;;  %1128 = vmatpush.msrb.mxu0 %v5695_v53  ;;  %v4328_v42 = vpop.permute.xlu2 %1712 }
 0x19f   :  { %1148 = vmatpush.msrb.mxu1 %v5695_v53  ;;  %1115 = vmatpush.msrb.mxu3 %v5695_v53 }
 0x1a0   :  { %1129 = vmatpush.msrb.mxu0 %v5695_v53  ;;  %1098 = vmatpush.msrb.mxu2 %v5695_v53 }
 0x1a1   :  { %1149 = vmatpush.msrb.mxu1 %v5695_v53  ;;  %1116 = vmatpush.msrb.mxu3 %v5695_v53 }
 0x1a2   :  { %1130 = vmatpush.msrb.mxu0 %v5695_v53  ;;  %1099 = vmatpush.msrb.mxu2 %v5695_v53 }
 0x1a3   :  { %1150 = vmatpush.msrb.mxu1 %v5695_v53  ;;  %1117 = vmatpush.msrb.mxu3 %v5695_v53 }
 0x1a4   :  { %1131 = vmatpush.msrb.mxu0 %v5695_v53  ;;  %1100 = vmatpush.msrb.mxu2 %v5695_v53 }
 0x1a5   :  { %1151 = vmatpush.msrb.mxu1 %v5695_v53  ;;  %1118 = vmatpush.msrb.mxu3 %v5695_v53 }
 0x1a6   :  { %1132 = vmatpush.msrb.mxu0 %v5695_v53  ;;  %1101 = vmatpush.msrb.mxu2 %v5695_v53 }
 0x1a7   :  { %1152 = vmatpush.msrb.mxu1 %v5695_v53  ;;  %1119 = vmatpush.msrb.mxu3 %v5695_v53 }
 0x1a8   :  { %1133 = vmatpush.msrb.mxu0 %v5695_v53  ;;  %1102 = vmatpush.msrb.mxu2 %v5695_v53 }
 0x1a9   :  { %1153 = vmatpush.msrb.mxu1 %v5695_v53  ;;  %1120 = vmatpush.msrb.mxu3 %v5695_v53 }
 0x1aa   :  { %1134 = vmatpush.msrb.mxu0 %v5695_v53  ;;  %1103 = vmatpush.msrb.mxu2 %v5695_v53 }
 0x1ab   :  { %1154 = vmatpush.msrb.mxu1 %v5695_v53  ;;  %1121 = vmatpush.msrb.mxu3 %v5695_v53 }
 0x1ac   :  { %1135 = vmatpush.msrb.mxu0 %v5695_v53  ;;  %1173 = vmatpush.msra.mxu2 %v5695_v53 }
 0x1ad   :  { %1155 = vmatpush.msrb.mxu1 %v5695_v53  ;;  %1122 = vmatpush.msrb.mxu3 %v5695_v53 }
 0x1ae   :  { %1136 = vmatpush.msrb.mxu0 %v5695_v53  ;;  %1174 = vmatpush.msra.mxu2 %v5695_v53 }
 0x1af   :  { %1156 = vmatpush.msrb.mxu1 %v5695_v53  ;;  %1123 = vmatpush.msrb.mxu3 %v5695_v53 }
 0x1b0   :  { %1137 = vmatpush.msrb.mxu0 %v5695_v53  ;;  %1175 = vmatpush.msra.mxu2 %v5695_v53 }
 0x1b1   :  { %1157 = vmatpush.msrb.mxu1 %v5695_v53  ;;  %1193 = vmatpush.msra.mxu3 %v5695_v53 }
 0x1b2   :  { %1138 = vmatpush.msrb.mxu0 %v5695_v53  ;;  %1176 = vmatpush.msra.mxu2 %v5695_v53 }
 0x1b3   :  { %1158 = vmatpush.msrb.mxu1 %v5695_v53  ;;  %1194 = vmatpush.msra.mxu3 %v5695_v53 }
 0x1b4   :  { %v4330_v22 = vpop.permute.xlu1 %1716  ;;  %1139 = vmatpush.msrb.mxu0 %v5695_v53  ;;  %v4349_v40 = vpop.permute.xlu0 %1648  ;;  %1177 = vmatpush.msra.mxu2 %v5695_v53 }
 0x1b5   :  { %v1731_v18 = vsel %vm955_vm9, %v4328_v42, %v4330_v22  ;;  %1159 = vmatpush.msrb.mxu1 %v5695_v53  ;;  %1195 = vmatpush.msra.mxu3 %v5695_v53 }
 0x1b6   :  { %v1738_v48 = vmul.f32 %v4080_v51, %v1731_v18  ;;  %1140 = vmatpush.msrb.mxu0 %v5695_v53  ;;  %1178 = vmatpush.msra.mxu2 %v5695_v53 }
 0x1b7   :  { %1160 = vmatpush.msrb.mxu1 %v5695_v53  ;;  %1196 = vmatpush.msra.mxu3 %v5695_v53 }
 0x1b8   :  { %1746 = vst [vmem:[#allocation4 + $0x140] sm:$0xf] %v1738_v48  ;;  %1141 = vmatpush.msrb.mxu0 %v5695_v53  ;;  %1179 = vmatpush.msra.mxu2 %v5695_v53 }
 0x1b9   :  { %1161 = vmatpush.msrb.mxu1 %v5695_v53  ;;  %1197 = vmatpush.msra.mxu3 %v5695_v53 }
 0x1ba   :  { %1142 = vmatpush.msrb.mxu0 %v5695_v53  ;;  %1180 = vmatpush.msra.mxu2 %v5695_v53 }
 0x1bb   :  { %1162 = vmatpush.msrb.mxu1 %v5695_v53  ;;  %1198 = vmatpush.msra.mxu3 %v5695_v53 }
 0x1bc   :  { %v4355_v51 = vpop.permute.xlu1 %1644  ;;  %1143 = vmatpush.msrb.mxu0 %v5695_v53  ;;  %v4373_v45 = vpop.permute.xlu0 %1604  ;;  %1181 = vmatpush.msra.mxu2 %v5695_v53 }
 0x1bd   :  { %1163 = vmatpush.msrb.mxu1 %v5695_v53  ;;  %1199 = vmatpush.msra.mxu3 %v5695_v53 }
 0x1be   :  { %1213 = vmatpush.msra.mxu0 %v5695_v53  ;;  %1182 = vmatpush.msra.mxu2 %v5695_v53 }
 0x1bf   :  { %1233 = vmatpush.msra.mxu1 %v5695_v53  ;;  %1200 = vmatpush.msra.mxu3 %v5695_v53  ;;  %v1802_v33 = vld [vmem:[#allocation4 + $0x140] sm:$0xf] }
 0x1c0   :  { %1214 = vmatpush.msra.mxu0 %v5695_v53  ;;  %1183 = vmatpush.msra.mxu2 %v5695_v53 }
 0x1c1   :  { %1234 = vmatpush.msra.mxu1 %v5695_v53  ;;  %1201 = vmatpush.msra.mxu3 %v5695_v53 }
 0x1c2   :  { %1215 = vmatpush.msra.mxu0 %v5695_v53  ;;  %1184 = vmatpush.msra.mxu2 %v5695_v53 }
 0x1c3   :  { %1235 = vmatpush.msra.mxu1 %v5695_v53  ;;  %1202 = vmatpush.msra.mxu3 %v5695_v53 }
 0x1c4   :  { %v4375_v56 = vpop.permute.xlu1 %1608  ;;  %1216 = vmatpush.msra.mxu0 %v5695_v53  ;;  %1185 = vmatpush.msra.mxu2 %v5695_v53 }
 0x1c5   :  { %v1623_v57 = vsel %vm871_vm7, %v4373_v45, %v4375_v56  ;;  %1236 = vmatpush.msra.mxu1 %v5695_v53  ;;  %1203 = vmatpush.msra.mxu3 %v5695_v53 }
 0x1c6   :  { %v1630_v62 = vmul.f32 %v1623_v57, %v4037_v29  ;;  %1217 = vmatpush.msra.mxu0 %v5695_v53  ;;  %1186 = vmatpush.msra.mxu2 %v5695_v53 }
 0x1c7   :  { %1237 = vmatpush.msra.mxu1 %v5695_v53  ;;  %1204 = vmatpush.msra.mxu3 %v5695_v53 }
 0x1c8   :  { %1638 = vst [vmem:[#allocation4 + $0x28] sm:$0xf] %v1630_v62  ;;  %1218 = vmatpush.msra.mxu0 %v5695_v53  ;;  %1187 = vmatpush.msra.mxu2 %v5695_v53 }
 0x1c9   :  { %1238 = vmatpush.msra.mxu1 %v5695_v53  ;;  %1205 = vmatpush.msra.mxu3 %v5695_v53 }
 0x1ca   :  { %1219 = vmatpush.msra.mxu0 %v5695_v53  ;;  %1188 = vmatpush.msra.mxu2 %v5695_v53 }
 0x1cb   :  { %1239 = vmatpush.msra.mxu1 %v5695_v53  ;;  %1206 = vmatpush.msra.mxu3 %v5695_v53 }
 0x1cc   :  { %v578_v3 = vpop.f32.mrf.mxu2  ;;  %v598_v63 = vpop.f32.mrf.mxu3  ;;  %1220 = vmatpush.msra.mxu0 %v5695_v53 }
 0x1cd   :  { %601 = vst [vmem:[#allocation3 + $0x28] sm:$0xf] %v578_v3  ;;  %1240 = vmatpush.msra.mxu1 %v5695_v53  ;;  %1207 = vmatpush.msra.mxu3 %v5695_v53  ;;  %v4477_v27 = vpop.permute.xlu1 %1536 }
 0x1ce   :  { %602 = vst [vmem:[#allocation3 + $0x30] sm:$0xf] %v598_v63  ;;  %1221 = vmatpush.msra.mxu0 %v5695_v53 }
 0x1cf   :  { %1241 = vmatpush.msra.mxu1 %v5695_v53  ;;  %1208 = vmatpush.msra.mxu3 %v5695_v53 }
 0x1d0   :  { %1222 = vmatpush.msra.mxu0 %v5695_v53 }
 0x1d1   :  { %1242 = vmatpush.msra.mxu1 %v5695_v53 }
 0x1d2   :  { %1223 = vmatpush.msra.mxu0 %v5695_v53 }
 0x1d3   :  { %1243 = vmatpush.msra.mxu1 %v5695_v53 }
 0x1d4   :  { %v4412_v50 = vld [vmem:[#allocation3 + $0x28] sm:$0xf]  ;;  %1224 = vmatpush.msra.mxu0 %v5695_v53 }
 0x1d5   :  { %5730 = vst [vmem:[#allocation17_spill] sm:$0xff] %v4412_v50  ;;  %1720 = vrot.lane.b32.xlu2 %v4412_v50, %s3161_s28  ;;  %v4419_v6 = vld [vmem:[#allocation3 + $0x30] sm:$0xf]  ;;  %1244 = vmatpush.msra.mxu1 %v5695_v53  ;;  %v4483_v52 = vpop.permute.xlu1 %1460 }
 0x1d6   :  { %1532 = vst [vmem:[#allocation4 + $0xd0] sm:$0xf] %v4412_v50  ;;  %1616 = vrot.lane.b32.xlu1 %v4419_v6, %s3159_s26  ;;  %1225 = vmatpush.msra.mxu0 %v5695_v53 }
 0x1d7   :  { %5731 = vst [vmem:[#allocation18_spill] sm:$0xff] %v4419_v6  ;;  %1245 = vmatpush.msra.mxu1 %v5695_v53 }
 0x1d8   :  { %1533 = vst [vmem:[#allocation4 + $0x58] sm:$0xf] %v4419_v6  ;;  %1226 = vmatpush.msra.mxu0 %v5695_v53 }
 0x1d9   :  { %1246 = vmatpush.msra.mxu1 %v5695_v53 }
 0x1da   :  { %1227 = vmatpush.msra.mxu0 %v5695_v53 }
 0x1db   :  { %1247 = vmatpush.msra.mxu1 %v5695_v53 }
 0x1dc   :  { %1228 = vmatpush.msra.mxu0 %v5695_v53 }
 0x1dd   :  { %1652 = vrot.lane.b32.xlu2 %v4412_v50, %s3160_s27  ;;  %1248 = vmatpush.msra.mxu1 %v5695_v53  ;;  %v4492_v11 = vpop.permute.xlu1 %1420 }
 0x1de   :  { %1324 = vrot.lane.b32.xlu1 %v4419_v6, %s3154_s21 }
 0x1e5   :  { %1612 = vrot.lane.b32.xlu2 %v4412_v50, %s3159_s26  ;;  %v4497_v62 = vpop.permute.xlu1 %1356 }
 0x1e6   :  { %1428 = vrot.lane.b32.xlu1 %v4412_v50, %s3156_s25 }
 0x1ed   :  { %1544 = vrot.lane.b32.xlu2 %v4412_v50, %s3158_s0 }
 0x1fe   :  { %v4460_v59 = vpop.f32.mrf.mxu2 }
 0x1ff   :  { %1104 = vmatmul.f32.vlgmr.msrb.gmra.mxu2 %v4460_v59  ;;  %v1169_v15 = vmul.f32 %v4460_v59, %v4460_v59 }
 0x200   :  { %3073 = vmatpush.msk.msrb.mxu2 %vm149_vm1, %v1802_v33 }
 0x207   :  { %1189 = vmatmul.f32.vlgmr.msra.gmra.mxu2 %v1169_v15 }
 0x211   :  { %v4466_v8 = vpop.f32.mrf.mxu3 }
 0x212   :  { %1124 = vmatmul.f32.vlgmr.msrb.gmra.mxu3 %v4466_v8  ;;  %v1170_v60 = vmul.f32 %v4466_v8, %v4466_v8 }
 0x21a   :  { %v4471_v43 = vpop.f32.mrf.mxu0  ;;  %1209 = vmatmul.f32.vlgmr.msra.gmra.mxu3 %v1170_v60 }
 0x21b   :  { %1144 = vmatmul.f32.vlgmr.msrb.gmra.mxu0 %v4471_v43  ;;  %v4474_v20 = vpop.f32.mrf.mxu1  ;;  %v1171_v14 = vmul.f32 %v4471_v43, %v4471_v43 }
 0x21c   :  { %1164 = vmatmul.f32.vlgmr.msrb.gmra.mxu1 %v4474_v20  ;;  %v1172_v16 = vmul.f32 %v4474_v20, %v4474_v20 }
 0x223   :  { %1229 = vmatmul.f32.vlgmr.msra.gmra.mxu0 %v1171_v14 }
 0x224   :  { %1249 = vmatmul.f32.vlgmr.msra.gmra.mxu1 %v1172_v16 }
 0x22f   :  { %v4485_v36 = vpop.permute.xlu2 %1720 }
 0x230   :  { %v1729_v28 = vsel %vm955_vm9, %v4330_v22, %v4485_v36 }
 0x231   :  { %v1739_v9 = vmul.f32 %v4121_v24, %v1729_v28 }
 0x233   :  { %1747 = vst [vmem:[#allocation4 + $0x170] sm:$0xf] %v1739_v9 }
 0x237   :  { %v4494_v18 = vpop.permute.xlu2 %1652 }
 0x23a   :  { %v1803_v48 = vld [vmem:[#allocation4 + $0x170] sm:$0xf] }
 0x23b   :  { %3075 = vmatpush.msk.msrb.mxu3 %vm149_vm1, %v1803_v48 }
 0x23f   :  { %v1613_v57 = vpop.permute.xlu2 %1612 }
 0x240   :  { %v1621_v3 = vsel %vm871_vm7, %v4375_v56, %v1613_v57 }
 0x241   :  { %v1631_v63 = vmul.f32 %v1621_v3, %v4103_v12  ;;  %v3163_v3 = vmov 0  }
 0x242   :  { %3123 = vset.pattern.permute.xlu0 %v3163_v3 }
 0x243   :  { %1639 = vst [vmem:[#allocation4 + $0x20] sm:$0xf] %v1631_v63 }
 0x248   :  { %v1617_v22 = vpop.permute.xlu1 %1616 }
 0x249   :  { %v1619_v24 = vsel %vm871_vm7, %v1613_v57, %v1617_v22  ;;  %v1625_v33 = vsel %vm871_vm7, %v1617_v22, %v4373_v45 }
 0x24a   :  { %v1632_v15 = vmul.f32 %v1619_v24, %v4195_v17  ;;  %v1633_v60 = vmul.f32 %v1625_v33, %v4198_v21 }
 0x24c   :  { %1640 = vst [vmem:[#allocation4 + $0x60] sm:$0xf] %v1632_v15 }
 0x24d   :  { %1641 = vst [vmem:[#allocation4 + $0x48] sm:$0xf] %v1633_v60 }
 0x282   :  { %v1105_v14 = vpop.f32.mrf.mxu2 }
 0x28a   :  { %v1190_v53 = vpop.f32.mrf.mxu2 }
 0x295   :  { %v1125_v16 = vpop.f32.mrf.mxu3 }
 0x296   :  { %v1126_v56 = vadd.f32 %v1125_v16, %v1105_v14 }
 0x298   :  { %v1145_v28 = vpop.f32.mrf.mxu0 }
 0x299   :  { %v1146_v9 = vadd.f32 %v1145_v28, %v1126_v56  ;;  %v1165_v48 = vpop.f32.mrf.mxu1 }
 0x29b   :  { %v1166_v63 = vadd.f32 %v1165_v48, %v1146_v9 }
 0x29d   :  { %v1210_v57 = vpop.f32.mrf.mxu3  ;;  %v1168_v45 = vmul.f32 0.001953125, %v1166_v63 }
 0x29e   :  { %v1211_v25 = vadd.f32 %v1210_v57, %v1190_v53  ;;  %v49_v53 = vld [vmem:[%s5690_s11] sm:$0xf]  ;;  %v4538_v57 = vpop.permute.xlu0 %1540 }
 0x29f   :  { %v1254_v33 = vmul.f32 %v1168_v45, %v1168_v45 }
 0x2a0   :  { %v1230_v1 = vpop.f32.mrf.mxu0 }
 0x2a1   :  { %v1231_v22 = vadd.f32 %v1230_v1, %v1211_v25  ;;  %v1250_v24 = vpop.f32.mrf.mxu1 }
 0x2a3   :  { %v1251_v17 = vadd.f32 %v1250_v24, %v1231_v22  ;;  %v4544_v24 = vpop.permute.xlu1 %1324 }
 0x2a5   :  { %v1253_v15 = vmul.f32 0.001953125, %v1251_v17 }
 0x2a6   :  { %v4542_v22 = vpop.permute.xlu0 %1464 }
 0x2a7   :  { %v1255_v60 = vsub.f32 %v1253_v15, %v1254_v33 }
 0x2a9   :  { %v1256_v21 = vmax.f32 %v1255_v60, 0.0 }
 0x2ab   :  { %v1257_v32 = vadd.f32 1e-05, %v1256_v21  ;;  %v3164_v21 = vmov 1   ;;  %v1429_v60 = vpop.permute.xlu1 %1428 }
 0x2ac   :  { %3124 = vset.pattern.permute.xlu1 %v3164_v21 }
 0x2ad   :  { %3136 = vrsqrt.f32 %v1257_v32  ;;  %vm1264_vm12 = vweird.f32 %v1257_v32 }
 0x2b3   :  { %v3137_v14 = vpop.eup %3136 }
 0x2b4   :  { %v1259_v16 = vmul.f32 %v3137_v14, %v1257_v32  ;;  %vm1265_vm11 = vweird.f32 %v3137_v14  ;;  %v4536_v32 = vpop.permute.xlu2 %1544 }
 0x2b5   :  { %vm1266_vm13 = vmor %vm1264_vm12, %vm1265_vm11  ;;  %vm2119_vm12 = vcmask 97280  }
 0x2b6   :  { %v1260_v56 = vmul.f32 %v3137_v14, %v1259_v16 }
 0x2b8   :  { %v1261_v28 = vmul.f32 0.5, %v1260_v56 }
 0x2ba   :  { %v1262_v3 = vsub.f32 1.5, %v1261_v28 }
 0x2bc   :  { %v1263_v9 = vmul.f32 %v3137_v14, %v1262_v3 }
 0x2be   :  { %v1267_v1 = vsel %vm1266_vm13, %v3137_v14, %v1263_v9 }
 0x2bf   :  { %v1268_v25 = vmul.f32 %v1267_v1, %v49_v53 }
 0x2c1   :  { %1271 = vperm.xlu0 %3123, %v1268_v25   ;;  %v1278_v17 = vmul.f32 %v1268_v25, %v1168_v45 }
 0x2c3   :  { %1280 = vrot.lane.b32.xlu2 %v1278_v17, %s3157_s1 }
 0x2c9   :  { %1724 = vrot.lane.b32.xlu0 %v4419_v6, %s3161_s28 }
 0x2cb   :  { %1472 = vrot.lane.b32.xlu2 %v4419_v6, %s3157_s1 }
 0x2d1   :  { %1432 = vrot.lane.b32.xlu0 %v4419_v6, %s3156_s25 }
 0x2d3   :  { %1656 = vrot.lane.b32.xlu2 %v4419_v6, %s3160_s27 }
 0x2d9   :  { %1364 = vrot.lane.b32.xlu0 %v4419_v6, %s3155_s2 }
 0x2db   :  { %1424 = vrot.lane.b32.xlu2 %v4051_v0, %s3156_s25 }
 0x2e1   :  { %1548 = vrot.lane.b32.xlu0 %v4419_v6, %s3158_s0 }
 0x2e3   :  { %1352 = vrot.lane.b32.xlu2 %v4049_v26, %s3155_s2 }
 0x2e9   :  { %1316 = vrot.lane.b32.xlu0 %v4051_v0, %s3154_s21 }
 0x2eb   :  { %1312 = vrot.lane.b32.xlu2 %v4049_v26, %s3154_s21 }
 0x2f1   :  { %1468 = vrot.lane.b32.xlu0 %v4412_v50, %s3157_s1 }
 0x31d   :  { %v1281_v48 = vpop.permute.xlu2 %1280 }
 0x31e   :  { %v1283_v63 = vsub.f32 %v49_v53, %v1281_v48 }
 0x320   :  { %1286 = vperm.xlu1 %3124, %v1283_v63  }
 0x325   :  { %v4540_v45 = vpop.permute.xlu2 %1472 }
 0x32d   :  { %v4546_v33 = vpop.permute.xlu2 %1656 }
 0x333   :  { %v1272_v15 = vpop.permute.xlu0 %1271 }
 0x335   :  { %v1425_v14 = vpop.permute.xlu2 %1424 }
 0x336   :  { %v1437_v16 = vsel %vm724_vm4, %v1425_v14, %v1429_v60  ;;  %v1439_v56 = vsel %vm724_vm4, %v4492_v11, %v1425_v14 }
 0x337   :  { %v1447_v28 = vmul.f32 %v1439_v56, %v3974_v49  ;;  %v1448_v3 = vmul.f32 %v1437_v16, %v4237_v58 }
 0x339   :  { %1455 = vst [vmem:[#allocation4 + $0x138] sm:$0xf] %v1447_v28 }
 0x33a   :  { %1456 = vst [vmem:[#allocation4 + $0x1b8] sm:$0xf] %v1448_v3 }
 0x33b   :  { %v1725_v53 = vpop.permute.xlu0 %1724 }
 0x33c   :  { %v1727_v9 = vsel %vm955_vm9, %v4485_v36, %v1725_v53  ;;  %v1733_v1 = vsel %vm955_vm9, %v1725_v53, %v4328_v42 }
 0x33d   :  { %v1740_v25 = vmul.f32 %v4245_v55, %v1727_v9  ;;  %v1741_v17 = vmul.f32 %v4250_v61, %v1733_v1  ;;  %v4563_v21 = vpop.permute.xlu2 %1352  ;;  %v1274_v1 = vmul.f32 %v1272_v15, %v4460_v59 }
 0x33f   :  { %1748 = vst [vmem:[#allocation4 + $0x160] sm:$0xf] %v1740_v25  ;;  %v1275_v25 = vmul.f32 %v1272_v15, %v4466_v8 }
 0x340   :  { %1749 = vst [vmem:[#allocation4 + $0x1a0] sm:$0xf] %v1741_v17  ;;  %v1276_v17 = vmul.f32 %v1272_v15, %v4471_v43 }
 0x343   :  { %v1433_v48 = vpop.permute.xlu0 %1432 }
 0x344   :  { %v1435_v63 = vsel %vm724_vm4, %v1429_v60, %v1433_v48  ;;  %v1441_v36 = vsel %vm724_vm4, %v1433_v48, %v4492_v11  ;;  %v1277_v48 = vmul.f32 %v1272_v15, %v4474_v20 }
 0x345   :  { %v1446_v14 = vmul.f32 %v1441_v36, %v4012_v2  ;;  %v1449_v42 = vmul.f32 %v1435_v63, %v4240_v39  ;;  %v1313_v16 = vpop.permute.xlu2 %1312 }
 0x346   :  { %v1333_v55 = vsel %vm640_vm2, %v4544_v24, %v1313_v16  ;;  %v1804_v61 = vld [vmem:[#allocation4 + $0x160] sm:$0xf] }
 0x347   :  { %1454 = vst [vmem:[#allocation4 + $0x188] sm:$0xf] %v1446_v14  ;;  %v1338_v56 = vmul.f32 %v1333_v55, %v4132_v13  ;;  %3077 = vmatpush.msk.msrb.mxu0 %vm149_vm1, %v1804_v61  ;;  %v1805_v60 = vld [vmem:[#allocation4 + $0x1a0] sm:$0xf] }
 0x348   :  { %1457 = vst [vmem:[#allocation4 + $0xc8] sm:$0xf] %v1449_v42  ;;  %3079 = vmatpush.msk.msrb.mxu1 %vm149_vm1, %v1805_v60 }
 0x349   :  { %1346 = vst [vmem:[#allocation4 + $0xe8] sm:$0xf] %v1338_v56 }
 0x34b   :  { %v4578_v11 = vpop.permute.xlu0 %1364 }
 0x353   :  { %v4580_v28 = vpop.permute.xlu0 %1548 }
 0x35b   :  { %v4582_v3 = vpop.permute.xlu0 %1316 }
 0x35c   :  { %v1331_v53 = vsel %vm640_vm2, %v1313_v16, %v4582_v3 }
 0x35d   :  { %v1339_v9 = vmul.f32 %v1331_v53, %v3944_v34 }
 0x35f   :  { %1347 = vst [vmem:[#allocation4 + $0x68] sm:$0xf] %v1339_v9 }
 0x363   :  { %v4670_v9 = vpop.permute.xlu0 %1468 }
 0x392   :  { %v1287_v63 = vpop.permute.xlu1 %1286 }
 0x393   :  { %v1289_v36 = vadd.f32 %v1287_v63, %v1274_v1  ;;  %v1290_v14 = vadd.f32 %v1287_v63, %v1275_v25  ;;  %v1291_v42 = vadd.f32 %v1287_v63, %v1276_v17  ;;  %v1292_v55 = vadd.f32 %v1287_v63, %v1277_v48 }
 0x394   :  { %v1663_v25 = vsel %vm907_vm8, %v4355_v51, %v4349_v40  ;;  %v1661_v17 = vsel %vm907_vm8, %v4349_v40, %v4494_v18 }
 0x395   :  { %v1293_v61 = vmax.f32 %v1289_v36, 0.0  ;;  %v1294_v56 = vmax.f32 %v1290_v14, 0.0  ;;  %v1295_v60 = vmax.f32 %v1291_v42, 0.0  ;;  %v1296_v16 = vmax.f32 %v1292_v55, 0.0 }
 0x396   :  { %v1670_v48 = vmul.f32 %v1663_v25, %v4074_v47  ;;  %v1671_v42 = vmul.f32 %v1661_v17, %v4167_v44 }
 0x397   :  { %1297 = vst [vmem:[#allocation3 + $0x8] sm:$0xf] %v1293_v61 }
 0x398   :  { %1298 = vst [vmem:[#allocation3] sm:$0xf] %v1294_v56  ;;  %v1686_v56 = vrot.slane %v1670_v48, 4  ;;  %v1688_v25 = vrot.slane %v1671_v42, 4  ;;  %v3144_v42 = vld [vmem:[%s5688_s5 + $0x28] ss:$0 sm:$0xff] }
 0x399   :  { %1299 = vst [vmem:[#allocation3 + $0x38] sm:$0xf] %v1295_v60 }
 0x39a   :  { %1300 = vst [vmem:[#allocation3 + $0x18] sm:$0xf] %v1296_v16 }
 0x39e   :  { %v4592_v59 = vld [vmem:[#allocation3 + $0x8] sm:$0xff] }
 0x39f   :  { %v4594_v8 = vld [vmem:[#allocation3] sm:$0xff]  ;;  %1642 = vrot.lane.b32.xlu0 %v4592_v59, %s3160_s27 }
 0x3a0   :  { %v4598_v43 = vld [vmem:[#allocation3 + $0x38] sm:$0xff]  ;;  %1646 = vrot.lane.b32.xlu2 %v4594_v8, %s3160_s27 }
 0x3a1   :  { %1650 = vrot.lane.b32.xlu1 %v4598_v43, %s3160_s27  ;;  %v4604_v20 = vld [vmem:[#allocation3 + $0x18] sm:$0xff] }
 0x3a7   :  { %1710 = vrot.lane.b32.xlu0 %v4592_v59, %s3161_s28 }
 0x3a8   :  { %1718 = vrot.lane.b32.xlu2 %v4598_v43, %s3161_s28 }
 0x3a9   :  { %1714 = vrot.lane.b32.xlu1 %v4594_v8, %s3161_s28 }
 0x3af   :  { %1534 = vrot.lane.b32.xlu0 %v4592_v59, %s3158_s0 }
 0x3b0   :  { %1538 = vrot.lane.b32.xlu2 %v4594_v8, %s3158_s0 }
 0x3b1   :  { %1542 = vrot.lane.b32.xlu1 %v4598_v43, %s3158_s0 }
 0x3b7   :  { %1602 = vrot.lane.b32.xlu0 %v4592_v59, %s3159_s26 }
 0x3b8   :  { %1610 = vrot.lane.b32.xlu2 %v4598_v43, %s3159_s26 }
 0x3b9   :  { %1606 = vrot.lane.b32.xlu1 %v4594_v8, %s3159_s26 }
 0x3bf   :  { %1458 = vrot.lane.b32.xlu0 %v4592_v59, %s3157_s1 }
 0x3c0   :  { %1462 = vrot.lane.b32.xlu2 %v4594_v8, %s3157_s1 }
 0x3c1   :  { %1470 = vrot.lane.b32.xlu1 %v4604_v20, %s3157_s1 }
 0x3c7   :  { %1722 = vrot.lane.b32.xlu0 %v4604_v20, %s3161_s28 }
 0x3c8   :  { %1362 = vrot.lane.b32.xlu2 %v4604_v20, %s3155_s2 }
 0x3c9   :  { %1654 = vrot.lane.b32.xlu1 %v4604_v20, %s3160_s27 }
 0x3cf   :  { %1354 = vrot.lane.b32.xlu0 %v4594_v8, %s3155_s2 }
 0x3d0   :  { %1422 = vrot.lane.b32.xlu2 %v4594_v8, %s3156_s25 }
 0x3d1   :  { %1350 = vrot.lane.b32.xlu1 %v4592_v59, %s3155_s2 }
 0x3d7   :  { %1430 = vrot.lane.b32.xlu0 %v4604_v20, %s3156_s25 }
 0x3d8   :  { %1546 = vrot.lane.b32.xlu2 %v4604_v20, %s3158_s0 }
 0x3d9   :  { %1418 = vrot.lane.b32.xlu1 %v4592_v59, %s3156_s25 }
 0x3df   :  { %1314 = vrot.lane.b32.xlu0 %v4594_v8, %s3154_s21 }
 0x3e0   :  { %1310 = vrot.lane.b32.xlu2 %v4592_v59, %s3154_s21 }
 0x3e1   :  { %1614 = vrot.lane.b32.xlu1 %v4604_v20, %s3159_s26 }
 0x3e7   :  { %1360 = vrot.lane.b32.xlu0 %v4412_v50, %s3155_s2 }
 0x3e8   :  { %1466 = vrot.lane.b32.xlu2 %v4598_v43, %s3157_s1 }
 0x3e9   :  { %1322 = vrot.lane.b32.xlu1 %v4604_v20, %s3154_s21 }
 0x3ef   :  { %1318 = vrot.lane.b32.xlu0 %v4598_v43, %s3154_s21 }
 0x3f0   :  { %1358 = vrot.lane.b32.xlu2 %v4598_v43, %s3155_s2 }
 0x3f1   :  { %1426 = vrot.lane.b32.xlu1 %v4598_v43, %s3156_s25 }
 0x3f8   :  { %1320 = vrot.lane.b32.xlu2 %v4412_v50, %s3154_s21 }
 0x3fa   :  { %v1647_v15 = vpop.permute.xlu2 %1646 }
 0x402   :  { %v4668_v53 = vpop.permute.xlu2 %1718 }
 0x40a   :  { %v1539_v1 = vpop.permute.xlu2 %1538 }
 0x411   :  { %v4681_v63 = vpop.permute.xlu0 %1642 }
 0x412   :  { %v1662_v36 = vsel %vm907_vm8, %v4681_v63, %v1647_v15  ;;  %v4686_v14 = vpop.permute.xlu2 %1610 }
 0x413   :  { %v4689_v55 = vpop.permute.xlu1 %1650  ;;  %v1666_v61 = vmul.f32 %v1662_v36, %v4074_v47 }
 0x414   :  { %v1660_v40 = vsel %vm907_vm8, %v1647_v15, %v4689_v55 }
 0x415   :  { %v1667_v60 = vmul.f32 %v1660_v40, %v4167_v44  ;;  %v1682_v16 = vrot.slane %v1666_v61, 4 }
 0x417   :  { %v1683_v6 = vrot.slane %v1667_v60, 4  ;;  %v1687_v50 = vsel %vm149_vm1, %v1682_v16, %v1686_v56  ;;  %1702 = vst [vmem:[#allocation4 + $0x28] sm:$0xf0] %v1682_v16  ;;  %v1555_v56 = vsel %vm823_vm6, %v4477_v27, %v4538_v57  ;;  %v1553_v60 = vsel %vm823_vm6, %v4538_v57, %v4536_v32 }
 0x418   :  { %v1562_v16 = vmul.f32 %v1555_v56, %v4018_v4 }
 0x419   :  { %v1689_v26 = vsel %vm149_vm1, %v1683_v6, %v1688_v25  ;;  %1703 = vst [vmem:[#allocation4 + $0x20] sm:$0xf0] %v1683_v6  ;;  %v4698_v17 = vpop.permute.xlu0 %1710  ;;  %v3145_v6 = vld [vmem:[%s5688_s5 + $0x20] ss:$0 sm:$0xff] }
 0x41a   :  { %v4700_v0 = vpop.permute.xlu2 %1462  ;;  %v1578_v56 = vrot.slane %v1562_v16, 4 }
 0x41b   :  { %v1715_v36 = vpop.permute.xlu1 %1714 }
 0x41c   :  { %v1728_v15 = vsel %vm955_vm9, %v1715_v36, %v4668_v53  ;;  %v1730_v48 = vsel %vm955_vm9, %v4698_v17, %v1715_v36 }
 0x41d   :  { %v1735_v61 = vmul.f32 %v3144_v42, %v1728_v15  ;;  %v1734_v40 = vmul.f32 %v3145_v6, %v1730_v48  ;;  %v1563_v6 = vmul.f32 %v1553_v60, %v4070_v46 }
 0x41e   :  { %v1790_v48 = vld [vmem:[#allocation4 + $0x28] sm:$0xff] }
 0x41f   :  { %1825 = vmatpush.msrb.mxu2 %v1734_v40  ;;  %1845 = vmatpush.msrb.mxu3 %v1735_v61  ;;  %v1580_v47 = vrot.slane %v1563_v6, 4 }
 0x420   :  { %v1791_v42 = vld [vmem:[#allocation4 + $0x20] sm:$0xff] }
 0x421   :  { %v1535_v25 = vpop.permute.xlu0 %1534  ;;  %1826 = vmatpush.msrb.mxu2 %v1687_v50  ;;  %1846 = vmatpush.msrb.mxu3 %v1689_v26 }
 0x422   :  { %v1554_v36 = vsel %vm823_vm6, %v1535_v25, %v1539_v1  ;;  %v4725_v15 = vpop.permute.xlu2 %1362 }
 0x423   :  { %v1543_v61 = vpop.permute.xlu1 %1542  ;;  %v1558_v40 = vmul.f32 %v1554_v36, %v4018_v4  ;;  %1827 = vmatpush.msrb.mxu2 %v1790_v48  ;;  %1847 = vmatpush.msrb.mxu3 %v1791_v42 }
 0x424   :  { %v1552_v57 = vsel %vm823_vm6, %v1539_v1, %v1543_v61 }
 0x425   :  { %v1559_v26 = vmul.f32 %v1552_v57, %v4070_v46  ;;  %v1574_v50 = vrot.slane %v1558_v40, 4  ;;  %v1551_v57 = vsel %vm823_vm6, %v4536_v32, %v4580_v28 }
 0x427   :  { %v1575_v44 = vrot.slane %v1559_v26, 4  ;;  %v1579_v39 = vsel %vm149_vm1, %v1574_v50, %v1578_v56  ;;  %1594 = vst [vmem:[#allocation4 + $0x1a8] sm:$0xf0] %v1574_v50  ;;  %v1557_v50 = vsel %vm823_vm6, %v4580_v28, %v4477_v27  ;;  %v1564_v27 = vmul.f32 %v1551_v57, %v4158_v23 }
 0x429   :  { %v1581_v58 = vsel %vm149_vm1, %v1575_v44, %v1580_v47  ;;  %1595 = vst [vmem:[#allocation4 + $0x40] sm:$0xf0] %v1575_v44  ;;  %v4734_v60 = vpop.permute.xlu0 %1602  ;;  %v1479_v47 = vsel %vm760_vm5, %v4483_v52, %v4542_v22  ;;  %v1481_v44 = vsel %vm760_vm5, %v4540_v45, %v4483_v52 }
 0x42a   :  { %v4736_v36 = vpop.permute.xlu2 %1422  ;;  %v1487_v40 = vmul.f32 %v1479_v47, %v3987_v54  ;;  %v1486_v26 = vmul.f32 %v1481_v44, %v4031_v30 }
 0x42b   :  { %v1607_v48 = vpop.permute.xlu1 %1606 }
 0x42c   :  { %v1620_v1 = vsel %vm871_vm7, %v1607_v48, %v4686_v14  ;;  %v1622_v16 = vsel %vm871_vm7, %v4734_v60, %v1607_v48  ;;  %v1504_v44 = vrot.slane %v1487_v40, 4 }
 0x42d   :  { %v1627_v42 = vmul.f32 %v1620_v1, %v4103_v12  ;;  %v1626_v6 = vmul.f32 %v1622_v16, %v4037_v29 }
 0x42e   :  { %v1778_v1 = vld [vmem:[#allocation4 + $0x1a8] sm:$0xff] }
 0x42f   :  { %1828 = vmatpush.msrb.mxu2 %v1626_v6  ;;  %1848 = vmatpush.msrb.mxu3 %v1627_v42 }
 0x430   :  { %v1779_v16 = vld [vmem:[#allocation4 + $0x40] sm:$0xff] }
 0x431   :  { %v1459_v56 = vpop.permute.xlu0 %1458  ;;  %1829 = vmatpush.msrb.mxu2 %v1579_v39  ;;  %1849 = vmatpush.msrb.mxu3 %v1581_v58 }
 0x432   :  { %v1478_v52 = vsel %vm760_vm5, %v1459_v56, %v4700_v0  ;;  %v1547_v48 = vpop.permute.xlu2 %1546 }
 0x433   :  { %v4767_v42 = vpop.permute.xlu1 %1470  ;;  %v1483_v32 = vmul.f32 %v1478_v52, %v3987_v54  ;;  %v1550_v58 = vsel %vm823_vm6, %v1543_v61, %v1547_v48  ;;  %v1556_v39 = vsel %vm823_vm6, %v1547_v48, %v1535_v25  ;;  %1830 = vmatpush.msrb.mxu2 %v1778_v1  ;;  %1850 = vmatpush.msrb.mxu3 %v1779_v16  ;;  %v1582_v16 = vrot.slane %v1564_v27, 4 }
 0x434   :  { %v1480_v28 = vsel %vm760_vm5, %v4767_v42, %v1459_v56  ;;  %v1560_v6 = vmul.f32 %v1550_v58, %v4158_v23  ;;  %v1561_v47 = vmul.f32 %v1556_v39, %v4161_v5  ;;  %v1565_v52 = vmul.f32 %v1557_v50, %v4161_v5 }
 0x435   :  { %v1482_v61 = vmul.f32 %v1480_v28, %v4031_v30  ;;  %v1499_v54 = vrot.slane %v1483_v32, 4  ;;  %1831 = vmatpush.msrb.mxu2 %v4592_v59  ;;  %1851 = vmatpush.msrb.mxu3 %v4594_v8  ;;  %v1659_v25 = vsel %vm907_vm8, %v4494_v18, %v4546_v33  ;;  %v1502_v56 = vrot.slane %v1486_v26, 4 }
 0x436   :  { %v1576_v57 = vrot.slane %v1560_v6, 4  ;;  %v1577_v40 = vrot.slane %v1561_v47, 4  ;;  %v1665_v50 = vsel %vm907_vm8, %v4546_v33, %v4355_v51  ;;  %v1672_v32 = vmul.f32 %v1659_v25, %v4164_v35  ;;  %v3146_v47 = vld [vmem:[%s5688_s5 + $0x30] ss:$0 sm:$0xff] }
 0x437   :  { %v1498_v48 = vrot.slane %v1482_v61, 4  ;;  %v1505_v1 = vsel %vm149_vm1, %v1499_v54, %v1504_v44  ;;  %1519 = vst [vmem:[#allocation4 + $0x138] sm:$0xf0] %v1499_v54  ;;  %v1584_v58 = vrot.slane %v1565_v52, 4  ;;  %v1673_v27 = vmul.f32 %v1665_v50, %v4155_v37 }
 0x438   :  { %1852 = vmatpush.msrb.mxu3 %v1505_v1  ;;  %v4796_v26 = vsel %vm149_vm1, %v1576_v57, %v1582_v16  ;;  %1596 = vst [vmem:[#allocation4 + $0xd0] sm:$0xf0] %v1576_v57 }
 0x439   :  { %v1503_v39 = vsel %vm149_vm1, %v1498_v48, %v1502_v56  ;;  %1518 = vst [vmem:[#allocation4 + $0x188] sm:$0xf0] %v1498_v48  ;;  %v1723_v18 = vpop.permute.xlu0 %1722  ;;  %v4808_v28 = vsel %vm149_vm1, %v1577_v40, %v1584_v58  ;;  %v1690_v56 = vrot.slane %v1672_v32, 4  ;;  %v1692_v1 = vrot.slane %v1673_v27, 4 }
 0x43a   :  { %v1726_v54 = vsel %vm955_vm9, %v4668_v53, %v1723_v18  ;;  %v1732_v51 = vsel %vm955_vm9, %v1723_v18, %v4698_v17  ;;  %v4804_v33 = vpop.permute.xlu2 %1310  ;;  %1832 = vmatpush.msrb.mxu2 %v1503_v39  ;;  %v3147_v53 = vld [vmem:[%s5688_s5 + $0x38] ss:$0 sm:$0xff]  ;;  %1597 = vst [vmem:[#allocation4 + $0x58] sm:$0xf0] %v1577_v40  ;;  %v1371_v40 = vsel %vm676_vm3, %v4563_v21, %v4497_v62 }
 0x43b   :  { %v1655_v6 = vpop.permute.xlu1 %1654  ;;  %v1736_v44 = vmul.f32 %v3146_v47, %v1726_v54  ;;  %v1737_v17 = vmul.f32 %v3147_v53, %v1732_v51  ;;  %v1379_v18 = vmul.f32 %v1371_v40, %v3960_v41  ;;  %v1475_v54 = vsel %vm760_vm5, %v4670_v9, %v4540_v45 }
 0x43c   :  { %v1658_v52 = vsel %vm907_vm8, %v4689_v55, %v1655_v6  ;;  %v1664_v61 = vsel %vm907_vm8, %v1655_v6, %v4681_v63  ;;  %v1373_v63 = vsel %vm676_vm3, %v4578_v11, %v4563_v21  ;;  %v1477_v21 = vsel %vm760_vm5, %v4542_v22, %v4670_v9 }
 0x43d   :  { %v1668_v25 = vmul.f32 %v1658_v52, %v4164_v35  ;;  %v1669_v57 = vmul.f32 %v1664_v61, %v4155_v37  ;;  %1865 = vmatpush.msrb.mxu0 %v1736_v44  ;;  %1885 = vmatpush.msrb.mxu1 %v1737_v17  ;;  %v1378_v27 = vmul.f32 %v1373_v63, %v4003_v7 }
 0x43e   :  { %v1767_v48 = vld [vmem:[#allocation4 + $0x138] sm:$0xff]  ;;  %v1488_v17 = vmul.f32 %v1477_v21, %v4207_v19  ;;  %v1489_v52 = vmul.f32 %v1475_v54, %v4210_v38 }
 0x43f   :  { %v1684_v50 = vrot.slane %v1668_v25, 4  ;;  %v1685_v55 = vrot.slane %v1669_v57, 4  ;;  %1853 = vmatpush.msrb.mxu3 %v1767_v48  ;;  %v1394_v57 = vrot.slane %v1378_v27, 4 }
 0x440   :  { %v1766_v16 = vld [vmem:[#allocation4 + $0x188] sm:$0xff] }
 0x441   :  { %v1691_v58 = vsel %vm149_vm1, %v1684_v50, %v1690_v56  ;;  %v1693_v32 = vsel %vm149_vm1, %v1685_v55, %v1692_v1  ;;  %1704 = vst [vmem:[#allocation4 + $0x60] sm:$0xf0] %v1684_v50  ;;  %v1355_v39 = vpop.permute.xlu0 %1354  ;;  %1833 = vmatpush.msrb.mxu2 %v1766_v16  ;;  %v1506_v50 = vrot.slane %v1488_v17, 4 }
 0x442   :  { %1705 = vst [vmem:[#allocation4 + $0x48] sm:$0xf0] %v1685_v55  ;;  %v1467_v51 = vpop.permute.xlu2 %1466  ;;  %1866 = vmatpush.msrb.mxu0 %v1691_v58  ;;  %1886 = vmatpush.msrb.mxu1 %v1693_v32  ;;  %v1508_v55 = vrot.slane %v1489_v52, 4 }
 0x443   :  { %v1351_v6 = vpop.permute.xlu1 %1350  ;;  %v1474_v47 = vsel %vm760_vm5, %v1467_v51, %v4767_v42  ;;  %v1476_v45 = vsel %vm760_vm5, %v4700_v0, %v1467_v51  ;;  %v1396_v0 = vrot.slane %v1379_v18, 4 }
 0x444   :  { %v1372_v44 = vsel %vm676_vm3, %v4725_v15, %v1351_v6  ;;  %v1370_v22 = vsel %vm676_vm3, %v1351_v6, %v1355_v39  ;;  %v1484_v9 = vmul.f32 %v1476_v45, %v4207_v19  ;;  %v1485_v53 = vmul.f32 %v1474_v47, %v4210_v38 }
 0x445   :  { %v1374_v42 = vmul.f32 %v1372_v44, %v4003_v7  ;;  %v1375_v61 = vmul.f32 %v1370_v22, %v3960_v41  ;;  %v5732_v22 = vld [vmem:[#allocation12_spill] sm:$0xff] }
 0x446   :  { %v1500_v25 = vrot.slane %v1484_v9, 4  ;;  %v1501_v1 = vrot.slane %v1485_v53, 4 }
 0x447   :  { %v1390_v56 = vrot.slane %v1374_v42, 4  ;;  %v1391_v48 = vrot.slane %v1375_v61, 4 }
 0x448   :  { %1520 = vst [vmem:[#allocation4 + $0x1b8] sm:$0xf0] %v1500_v25  ;;  %v1792_v40 = vld [vmem:[#allocation4 + $0x60] sm:$0xff]  ;;  %v4866_v54 = vsel %vm149_vm1, %v1500_v25, %v1506_v50  ;;  %v4869_v21 = vsel %vm149_vm1, %v1501_v1, %v1508_v55  ;;  %v5733_v55 = vld [vmem:[#allocation15_spill] sm:$0xff] }
 0x449   :  { %v1395_v63 = vsel %vm149_vm1, %v1390_v56, %v1394_v57  ;;  %1410 = vst [vmem:[#allocation4 + $0xe8] sm:$0xf0] %v1390_v56  ;;  %v1397_v16 = vsel %vm149_vm1, %v1391_v48, %v1396_v0  ;;  %v4863_v58 = vpop.permute.xlu0 %1430  ;;  %1867 = vmatpush.msrb.mxu0 %v1792_v40  ;;  %v1793_v32 = vld [vmem:[#allocation4 + $0x48] sm:$0xff]  ;;  %v4908_v40 = vld [vmem:[%s5691_s8] sm:$0xf]  ;;  %s3165_s8 = smov 2  }
 0x44a   :  { %1414 = vst [vmem:[#allocation4 + $0xd8] sm:$0xff] %v1395_v63  ;;  %v1359_v18 = vpop.permute.xlu2 %1358  ;;  %1887 = vmatpush.msrb.mxu1 %v1793_v32  ;;  %v5735_v32 = vld [vmem:[#allocation11_spill] sm:$0xff] }
 0x44b   :  { %1411 = vst [vmem:[#allocation4 + $0x68] sm:$0xf0] %v1391_v48  ;;  %v1419_v51 = vpop.permute.xlu1 %1418  ;;  %v1366_v27 = vsel %vm676_vm3, %v1359_v18, %v4725_v15  ;;  %v1368_v6 = vsel %vm676_vm3, %v1355_v39, %v1359_v18 }
 0x44c   :  { %1415 = vst [vmem:[#allocation4 + $0x30] sm:$0xff] %v1397_v16  ;;  %v1438_v47 = vsel %vm724_vm4, %v1419_v51, %v4736_v36  ;;  %v1440_v45 = vsel %vm724_vm4, %v4863_v58, %v1419_v51  ;;  %v4883_v44 = vmul.f32 %v1368_v6, %v4201_v31  ;;  %v4886_v9 = vmul.f32 %v1366_v27, %v5732_v22  ;;  %v5736_v51 = vld [vmem:[#allocation16_spill] sm:$0xff] }
 0x44d   :  { %1521 = vst [vmem:[#allocation4 + $0xc8] sm:$0xf0] %v1501_v1  ;;  %v1443_v15 = vmul.f32 %v1438_v47, %v3974_v49  ;;  %v1442_v39 = vmul.f32 %v1440_v45, %v4012_v2  ;;  %v1780_v45 = vld [vmem:[#allocation4 + $0xd0] sm:$0xff] }
 0x44e   :  { %v1392_v53 = vrot.slane %v4883_v44, 4  ;;  %v1393_v17 = vrot.slane %v4886_v9, 4  ;;  %v1781_v44 = vld [vmem:[#allocation4 + $0x58] sm:$0xff] }
 0x44f   :  { %1834 = vmatpush.msrb.mxu2 %v1442_v39  ;;  %1854 = vmatpush.msrb.mxu3 %v1443_v15  ;;  %1451 = vst [vmem:[#allocation4 + $0x110] sm:$0xff] %v1443_v15 }
 0x450   :  { %1450 = vst [vmem:[#allocation4 + $0x108] sm:$0xff] %v1442_v39  ;;  %v1754_v0 = vld [vmem:[#allocation4 + $0xe8] sm:$0xff] }
 0x451   :  { %v4892_v52 = vpop.permute.xlu0 %1314  ;;  %1835 = vmatpush.msrb.mxu2 %v1395_v63  ;;  %1855 = vmatpush.msrb.mxu3 %v1397_v16  ;;  %1412 = vst [vmem:[#allocation4 + $0xf0] sm:$0xf0] %v1392_v53  ;;  %v5734_v16 = vld [vmem:[#allocation10_spill] sm:$0xff] }
 0x452   :  { %v1330_v42 = vsel %vm640_vm2, %v4804_v33, %v4892_v52  ;;  %v1321_v61 = vpop.permute.xlu2 %1320  ;;  %v1755_v25 = vld [vmem:[#allocation4 + $0x68] sm:$0xff]  ;;  %1413 = vst [vmem:[#allocation4 + $0x120] sm:$0xf0] %v1393_v17 }
 0x453   :  { %v1615_v57 = vpop.permute.xlu1 %1614  ;;  %v1335_v56 = vmul.f32 %v1330_v42, %v3944_v34  ;;  %v1327_v48 = vsel %vm640_vm2, %v1321_v61, %v4544_v24  ;;  %v1329_v1 = vsel %vm640_vm2, %v4582_v3, %v1321_v61  ;;  %1836 = vmatpush.msrb.mxu2 %v1754_v0  ;;  %1856 = vmatpush.msrb.mxu3 %v1755_v25 }
 0x454   :  { %v1618_v50 = vsel %vm871_vm7, %v4686_v14, %v1615_v57  ;;  %v1624_v24 = vsel %vm871_vm7, %v1615_v57, %v4734_v60  ;;  %v1340_v63 = vmul.f32 %v1329_v1, %v5733_v55  ;;  %v1341_v27 = vmul.f32 %v1327_v48, %v5736_v51  ;;  %v1769_v25 = vld [vmem:[#allocation4 + $0xc8] sm:$0xff] }
 0x455   :  { %v1628_v3 = vmul.f32 %v1618_v50, %v5734_v16  ;;  %v1629_v18 = vmul.f32 %v1624_v24, %v5735_v32  ;;  %1343 = vst [vmem:[#allocation4 + $0x18] sm:$0xff] %v1335_v56  ;;  %1857 = vmatpush.msrb.mxu3 %v1335_v56  ;;  %v5737_v14 = vmov 1.0   ;;  %v5739_v50 = vld [vmem:[#allocation14_spill] sm:$0xff] }
 0x456   :  { %1348 = vst [vmem:[#allocation4 + $0xf0] sm:$0xf] %v1340_v63  ;;  %3076 = vmatmul.msk.f32.vlgmr.msrb.gmra.mxu3 %vm1806_vm14, %v4908_v40  ;;  %v5740_v63 = vld [vmem:[#allocation7_spill] sm:$0xff] }
 0x457   :  { %1868 = vmatpush.msrb.mxu0 %v1628_v3  ;;  %1888 = vmatpush.msrb.mxu1 %v1629_v18  ;;  %1349 = vst [vmem:[#allocation4 + $0x120] sm:$0xf] %v1341_v27  ;;  %v5741_v27 = vld [vmem:[#allocation6_spill] sm:$0xff] }
 0x458   :  { %1922 = vmatpush.msra.mxu3 %v5737_v14 }
 0x459   :  { %v1361_v60 = vpop.permute.xlu0 %1360  ;;  %1869 = vmatpush.msrb.mxu0 %v4796_v26  ;;  %1889 = vmatpush.msrb.mxu1 %v4808_v28 }
 0x45a   :  { %v1367_v6 = vsel %vm676_vm3, %v1361_v60, %v4578_v11  ;;  %v1369_v47 = vsel %vm676_vm3, %v4497_v62, %v1361_v60  ;;  %1923 = vmatpush.msra.mxu3 %v5737_v14 }
 0x45b   :  { %v1323_v9 = vpop.permute.xlu1 %1322  ;;  %v1380_v15 = vmul.f32 %v1369_v47, %v4201_v31  ;;  %v1381_v39 = vmul.f32 %v1367_v6, %v5732_v22  ;;  %1870 = vmatpush.msrb.mxu0 %v1780_v45  ;;  %1890 = vmatpush.msrb.mxu1 %v1781_v44  ;;  %v5742_v47 = vld [vmem:[#allocation17_spill] sm:$0xff] }
 0x45c   :  { %v1332_v26 = vsel %vm640_vm2, %v1323_v9, %v4804_v33  ;;  %1924 = vmatpush.msra.mxu3 %v5737_v14  ;;  %v1768_v33 = vld [vmem:[#allocation4 + $0x1b8] sm:$0xff] }
 0x45d   :  { %v1334_v11 = vmul.f32 %v1332_v26, %v4132_v13  ;;  %v1398_v62 = vrot.slane %v1380_v15, 4  ;;  %v1400_v28 = vrot.slane %v1381_v39, 4  ;;  %1871 = vmatpush.msrb.mxu0 %v4598_v43  ;;  %1891 = vmatpush.msrb.mxu1 %v4604_v20 }
 0x45e   :  { %1925 = vmatpush.msra.mxu3 %v5737_v14 }
 0x45f   :  { %1342 = vst [vmem:[#allocation4 + $0x100] sm:$0xff] %v1334_v11  ;;  %v1399_v42 = vsel %vm149_vm1, %v1392_v53, %v1398_v62  ;;  %v1401_v61 = vsel %vm149_vm1, %v1393_v17, %v1400_v28  ;;  %1837 = vmatpush.msrb.mxu2 %v1334_v11  ;;  %1872 = vmatpush.msrb.mxu0 %v4866_v54 }
 0x460   :  { %1416 = vst [vmem:[#allocation4 + $0xb0] sm:$0xff] %v1399_v42  ;;  %1892 = vmatpush.msrb.mxu1 %v4869_v21  ;;  %3074 = vmatmul.msk.f32.vlgmr.msrb.gmra.mxu2 %vm1806_vm14, %v4908_v40 }
 0x461   :  { %1417 = vst [vmem:[#allocation4 + $0x158] sm:$0xff] %v1401_v61  ;;  %v1319_v0 = vpop.permute.xlu0 %1318  ;;  %1873 = vmatpush.msrb.mxu0 %v1768_v33  ;;  %1902 = vmatpush.msra.mxu2 %v5737_v14 }
 0x462   :  { %v1326_v53 = vsel %vm640_vm2, %v1319_v0, %v1323_v9  ;;  %v1328_v54 = vsel %vm640_vm2, %v4892_v52, %v1319_v0  ;;  %1893 = vmatpush.msrb.mxu1 %v1769_v25  ;;  %1926 = vmatpush.msra.mxu3 %v5737_v14  ;;  %v5738_v52 = vld [vmem:[#allocation13_spill] sm:$0xff] }
 0x463   :  { %v1427_v21 = vpop.permute.xlu1 %1426  ;;  %v1336_v17 = vmul.f32 %v1328_v54, %v5733_v55  ;;  %v1337_v57 = vmul.f32 %v1326_v53, %v5736_v51  ;;  %1903 = vmatpush.msra.mxu2 %v5737_v14 }
 0x464   :  { %v1434_v56 = vsel %vm724_vm4, %v1427_v21, %v4863_v58  ;;  %v1436_v48 = vsel %vm724_vm4, %v4736_v36, %v1427_v21  ;;  %1927 = vmatpush.msra.mxu3 %v5737_v14  ;;  %v1756_v36 = vld [vmem:[#allocation4 + $0xf0] sm:$0xff]  ;;  %v1757_v58 = vld [vmem:[#allocation4 + $0x120] sm:$0xff] }
 0x465   :  { %v1444_v1 = vmul.f32 %v1436_v48, %v5738_v52  ;;  %v1445_v24 = vmul.f32 %v1434_v56, %v5739_v50  ;;  %1344 = vst [vmem:[#allocation4 + $0x150] sm:$0xff] %v1336_v17  ;;  %1904 = vmatpush.msra.mxu2 %v5737_v14 }
 0x466   :  { %1345 = vst [vmem:[#allocation4 + $0xe0] sm:$0xff] %v1337_v57  ;;  %1928 = vmatpush.msra.mxu3 %v5737_v14 }
 0x467   :  { %1452 = vst [vmem:[#allocation4 + $0x50] sm:$0xff] %v1444_v1  ;;  %1874 = vmatpush.msrb.mxu0 %v1444_v1  ;;  %1894 = vmatpush.msrb.mxu1 %v1445_v24 }
 0x468   :  { %1453 = vst [vmem:[#allocation4 + $0x178] sm:$0xff] %v1445_v24  ;;  %1905 = vmatpush.msra.mxu2 %v5737_v14  ;;  %1929 = vmatpush.msra.mxu3 %v5737_v14 }
 0x469   :  { %1875 = vmatpush.msrb.mxu0 %v1399_v42  ;;  %1895 = vmatpush.msrb.mxu1 %v1401_v61 }
 0x46a   :  { %1906 = vmatpush.msra.mxu2 %v5737_v14  ;;  %1930 = vmatpush.msra.mxu3 %v5737_v14 }
 0x46b   :  { %1876 = vmatpush.msrb.mxu0 %v1756_v36  ;;  %1896 = vmatpush.msrb.mxu1 %v1757_v58 }
 0x46c   :  { %1907 = vmatpush.msra.mxu2 %v5737_v14  ;;  %1931 = vmatpush.msra.mxu3 %v5737_v14 }
 0x46d   :  { %1877 = vmatpush.msrb.mxu0 %v1336_v17  ;;  %1897 = vmatpush.msrb.mxu1 %v1337_v57 }
 0x46e   :  { %3078 = vmatmul.msk.f32.vlgmr.msrb.gmra.mxu0 %vm1806_vm14, %v4908_v40  ;;  %3080 = vmatmul.msk.f32.vlgmr.msrb.gmra.mxu1 %vm1806_vm14, %v4908_v40 }
 0x46f   :  { %1942 = vmatpush.msra.mxu0 %v5737_v14  ;;  %1962 = vmatpush.msra.mxu1 %v5737_v14 }
 0x470   :  { %1908 = vmatpush.msra.mxu2 %v5737_v14  ;;  %1932 = vmatpush.msra.mxu3 %v5737_v14 }
 0x471   :  { %1943 = vmatpush.msra.mxu0 %v5737_v14  ;;  %1963 = vmatpush.msra.mxu1 %v5737_v14 }
 0x472   :  { %1909 = vmatpush.msra.mxu2 %v5737_v14  ;;  %1933 = vmatpush.msra.mxu3 %v5737_v14 }
 0x473   :  { %1944 = vmatpush.msra.mxu0 %v5737_v14  ;;  %1964 = vmatpush.msra.mxu1 %v5737_v14 }
 0x474   :  { %1910 = vmatpush.msra.mxu2 %v5737_v14  ;;  %1934 = vmatpush.msra.mxu3 %v5737_v14 }
 0x475   :  { %1945 = vmatpush.msra.mxu0 %v5737_v14  ;;  %1965 = vmatpush.msra.mxu1 %v5737_v14 }
 0x476   :  { %1911 = vmatpush.msra.mxu2 %v5737_v14  ;;  %1935 = vmatpush.msra.mxu3 %v5737_v14 }
 0x477   :  { %1946 = vmatpush.msra.mxu0 %v5737_v14  ;;  %1966 = vmatpush.msra.mxu1 %v5737_v14 }
 0x478   :  { %1912 = vmatpush.msra.mxu2 %v5737_v14  ;;  %1936 = vmatpush.msra.mxu3 %v5737_v14 }
 0x479   :  { %1947 = vmatpush.msra.mxu0 %v5737_v14  ;;  %1967 = vmatpush.msra.mxu1 %v5737_v14 }
 0x47a   :  { %1913 = vmatpush.msra.mxu2 %v5737_v14  ;;  %1937 = vmatpush.msra.mxu3 %v5737_v14 }
 0x47b   :  { %1948 = vmatpush.msra.mxu0 %v5737_v14  ;;  %1968 = vmatpush.msra.mxu1 %v5737_v14 }
 0x47c   :  { %2007 = vmatpush.msrb.mxu3 %v5737_v14  ;;  %1914 = vmatpush.msra.mxu2 %v5737_v14 }
 0x47d   :  { %1949 = vmatpush.msra.mxu0 %v5737_v14  ;;  %1969 = vmatpush.msra.mxu1 %v5737_v14 }
 0x47e   :  { %2008 = vmatpush.msrb.mxu3 %v5737_v14  ;;  %1915 = vmatpush.msra.mxu2 %v5737_v14 }
 0x47f   :  { %1950 = vmatpush.msra.mxu0 %v5737_v14  ;;  %1970 = vmatpush.msra.mxu1 %v5737_v14 }
 0x480   :  { %2009 = vmatpush.msrb.mxu3 %v5737_v14  ;;  %1916 = vmatpush.msra.mxu2 %v5737_v14 }
 0x481   :  { %1951 = vmatpush.msra.mxu0 %v5737_v14  ;;  %1971 = vmatpush.msra.mxu1 %v5737_v14 }
 0x482   :  { %2010 = vmatpush.msrb.mxu3 %v5737_v14  ;;  %1917 = vmatpush.msra.mxu2 %v5737_v14 }
 0x483   :  { %1952 = vmatpush.msra.mxu0 %v5737_v14  ;;  %1972 = vmatpush.msra.mxu1 %v5737_v14 }
 0x484   :  { %1987 = vmatpush.msrb.mxu2 %v5737_v14  ;;  %2011 = vmatpush.msrb.mxu3 %v5737_v14 }
 0x485   :  { %1953 = vmatpush.msra.mxu0 %v5737_v14  ;;  %1973 = vmatpush.msra.mxu1 %v5737_v14 }
 0x486   :  { %1988 = vmatpush.msrb.mxu2 %v5737_v14  ;;  %2012 = vmatpush.msrb.mxu3 %v5737_v14 }
 0x487   :  { %1954 = vmatpush.msra.mxu0 %v5737_v14  ;;  %1974 = vmatpush.msra.mxu1 %v5737_v14 }
 0x488   :  { %1989 = vmatpush.msrb.mxu2 %v5737_v14  ;;  %2013 = vmatpush.msrb.mxu3 %v5737_v14 }
 0x489   :  { %1955 = vmatpush.msra.mxu0 %v5737_v14  ;;  %1975 = vmatpush.msra.mxu1 %v5737_v14 }
 0x48a   :  { %1990 = vmatpush.msrb.mxu2 %v5737_v14  ;;  %2014 = vmatpush.msrb.mxu3 %v5737_v14 }
 0x48b   :  { %1956 = vmatpush.msra.mxu0 %v5737_v14  ;;  %1976 = vmatpush.msra.mxu1 %v5737_v14 }
 0x48c   :  { %1991 = vmatpush.msrb.mxu2 %v5737_v14  ;;  %2015 = vmatpush.msrb.mxu3 %v5737_v14 }
 0x48d   :  { %1957 = vmatpush.msra.mxu0 %v5737_v14  ;;  %1977 = vmatpush.msra.mxu1 %v5737_v14 }
 0x48e   :  { %1992 = vmatpush.msrb.mxu2 %v5737_v14  ;;  %2016 = vmatpush.msrb.mxu3 %v5737_v14 }
 0x48f   :  { %2027 = vmatpush.msrb.mxu0 %v5737_v14  ;;  %2047 = vmatpush.msrb.mxu1 %v5737_v14 }
 0x490   :  { %1993 = vmatpush.msrb.mxu2 %v5737_v14  ;;  %2017 = vmatpush.msrb.mxu3 %v5737_v14 }
 0x491   :  { %2028 = vmatpush.msrb.mxu0 %v5737_v14  ;;  %2048 = vmatpush.msrb.mxu1 %v5737_v14 }
 0x492   :  { %1994 = vmatpush.msrb.mxu2 %v5737_v14  ;;  %2018 = vmatpush.msrb.mxu3 %v5737_v14 }
 0x493   :  { %2029 = vmatpush.msrb.mxu0 %v5737_v14  ;;  %2049 = vmatpush.msrb.mxu1 %v5737_v14 }
 0x494   :  { %1995 = vmatpush.msrb.mxu2 %v5737_v14  ;;  %2019 = vmatpush.msrb.mxu3 %v5737_v14 }
 0x495   :  { %2030 = vmatpush.msrb.mxu0 %v5737_v14  ;;  %2050 = vmatpush.msrb.mxu1 %v5737_v14 }
 0x496   :  { %1996 = vmatpush.msrb.mxu2 %v5737_v14  ;;  %2020 = vmatpush.msrb.mxu3 %v5737_v14 }
 0x497   :  { %2031 = vmatpush.msrb.mxu0 %v5737_v14  ;;  %2051 = vmatpush.msrb.mxu1 %v5737_v14 }
 0x498   :  { %1997 = vmatpush.msrb.mxu2 %v5737_v14  ;;  %2021 = vmatpush.msrb.mxu3 %v5737_v14 }
 0x499   :  { %2032 = vmatpush.msrb.mxu0 %v5737_v14  ;;  %2052 = vmatpush.msrb.mxu1 %v5737_v14 }
 0x49a   :  { %1998 = vmatpush.msrb.mxu2 %v5737_v14  ;;  %2022 = vmatpush.msrb.mxu3 %v5737_v14 }
 0x49b   :  { %2033 = vmatpush.msrb.mxu0 %v5737_v14  ;;  %2053 = vmatpush.msrb.mxu1 %v5737_v14 }
 0x49c   :  { %1999 = vmatpush.msrb.mxu2 %v5737_v14 }
 0x49d   :  { %2034 = vmatpush.msrb.mxu0 %v5737_v14  ;;  %2054 = vmatpush.msrb.mxu1 %v5737_v14 }
 0x49e   :  { %2000 = vmatpush.msrb.mxu2 %v5737_v14 }
 0x49f   :  { %2035 = vmatpush.msrb.mxu0 %v5737_v14  ;;  %2055 = vmatpush.msrb.mxu1 %v5737_v14 }
 0x4a0   :  { %2001 = vmatpush.msrb.mxu2 %v5737_v14 }
 0x4a1   :  { %2036 = vmatpush.msrb.mxu0 %v5737_v14  ;;  %2056 = vmatpush.msrb.mxu1 %v5737_v14 }
 0x4a2   :  { %2002 = vmatpush.msrb.mxu2 %v5737_v14 }
 0x4a3   :  { %2037 = vmatpush.msrb.mxu0 %v5737_v14  ;;  %2057 = vmatpush.msrb.mxu1 %v5737_v14 }
 0x4a5   :  { %2038 = vmatpush.msrb.mxu0 %v5737_v14  ;;  %2058 = vmatpush.msrb.mxu1 %v5737_v14 }
 0x4a7   :  { %2039 = vmatpush.msrb.mxu0 %v5737_v14  ;;  %2059 = vmatpush.msrb.mxu1 %v5737_v14 }
 0x4a9   :  { %2040 = vmatpush.msrb.mxu0 %v5737_v14  ;;  %2060 = vmatpush.msrb.mxu1 %v5737_v14 }
 0x4ab   :  { %2041 = vmatpush.msrb.mxu0 %v5737_v14  ;;  %2061 = vmatpush.msrb.mxu1 %v5737_v14 }
 0x4ad   :  { %2042 = vmatpush.msrb.mxu0 %v5737_v14  ;;  %2062 = vmatpush.msrb.mxu1 %v5737_v14 }
 0x4d9   :  { %v5091_v40 = vpop.f32.mrf.mxu3 }
 0x4da   :  { %1938 = vmatmul.f32.vlgmr.msra.gmra.mxu3 %v5091_v40  ;;  %v1984_v3 = vmul.f32 %v5091_v40, %v5091_v40 }
 0x4db   :  { %3083 = vmatpush.msk.msra.mxu3 %vm149_vm1, %v5740_v63 }
 0x4dd   :  { %2170 = vmatpush.msra.mxu3 %v4594_v8 }
 0x4e2   :  { %2023 = vmatmul.f32.vlgmr.msrb.gmra.mxu3 %v1984_v3 }
 0x4e3   :  { %v5099_v18 = vpop.f32.mrf.mxu2  ;;  %2235 = vmatpush.msrb.mxu3 %v5737_v14 }
 0x4e4   :  { %1918 = vmatmul.f32.vlgmr.msra.gmra.mxu2 %v5099_v18  ;;  %v1983_v8 = vmul.f32 %v5099_v18, %v5099_v18 }
 0x4e5   :  { %3081 = vmatpush.msk.msra.mxu2 %vm149_vm1, %v5741_v27  ;;  %2236 = vmatpush.msrb.mxu3 %v5737_v14  ;;  %v3166_v27 = vmov 2  }
 0x4e6   :  { %3125 = vset.pattern.permute.xlu1 %v3166_v27 }
 0x4e7   :  { %2150 = vmatpush.msra.mxu2 %v4592_v59  ;;  %2237 = vmatpush.msrb.mxu3 %v5737_v14  ;;  %v5743_v59 = vld [vmem:[#allocation18_spill] sm:$0xff] }
 0x4e9   :  { %2238 = vmatpush.msrb.mxu3 %v5737_v14 }
 0x4eb   :  { %v5111_v60 = vpop.f32.mrf.mxu0  ;;  %v5113_v6 = vpop.f32.mrf.mxu1  ;;  %2239 = vmatpush.msrb.mxu3 %v5737_v14 }
 0x4ec   :  { %1958 = vmatmul.f32.vlgmr.msra.gmra.mxu0 %v5111_v60  ;;  %1978 = vmatmul.f32.vlgmr.msra.gmra.mxu1 %v5113_v6  ;;  %v1985_v45 = vmul.f32 %v5111_v60, %v5111_v60  ;;  %v1986_v44 = vmul.f32 %v5113_v6, %v5113_v6 }
 0x4ed   :  { %2003 = vmatmul.f32.vlgmr.msrb.gmra.mxu2 %v1983_v8  ;;  %3085 = vmatpush.msk.msra.mxu0 %vm149_vm1, %v5742_v47  ;;  %v5190_v47 = vld [vmem:[%s5690_s11] sm:$0xf] }
 0x4ee   :  { %3087 = vmatpush.msk.msra.mxu1 %vm149_vm1, %v5743_v59  ;;  %2215 = vmatpush.msrb.mxu2 %v5737_v14 }
 0x4ef   :  { %2190 = vmatpush.msra.mxu0 %v4598_v43  ;;  %2240 = vmatpush.msrb.mxu3 %v5737_v14 }
 0x4f0   :  { %2210 = vmatpush.msra.mxu1 %v4604_v20  ;;  %2216 = vmatpush.msrb.mxu2 %v5737_v14 }
 0x4f1   :  { %2241 = vmatpush.msrb.mxu3 %v5737_v14 }
 0x4f2   :  { %2217 = vmatpush.msrb.mxu2 %v5737_v14 }
 0x4f3   :  { %2242 = vmatpush.msrb.mxu3 %v5737_v14 }
 0x4f4   :  { %2043 = vmatmul.f32.vlgmr.msrb.gmra.mxu0 %v1985_v45  ;;  %2063 = vmatmul.f32.vlgmr.msrb.gmra.mxu1 %v1986_v44  ;;  %v2118_v45 = vld [vmem:[%s5692_s10] sm:$0xf]  ;;  %s3168_s10 = smov 3  }
 0x4f5   :  { %2218 = vmatpush.msrb.mxu2 %v5737_v14  ;;  %2255 = vmatpush.msrb.mxu0 %v5737_v14 }
 0x4f6   :  { %2275 = vmatpush.msrb.mxu1 %v5737_v14  ;;  %2243 = vmatpush.msrb.mxu3 %v5737_v14 }
 0x4f7   :  { %2219 = vmatpush.msrb.mxu2 %v5737_v14  ;;  %2256 = vmatpush.msrb.mxu0 %v5737_v14 }
 0x4f8   :  { %2276 = vmatpush.msrb.mxu1 %v5737_v14  ;;  %2244 = vmatpush.msrb.mxu3 %v5737_v14 }
 0x4f9   :  { %2220 = vmatpush.msrb.mxu2 %v5737_v14  ;;  %2257 = vmatpush.msrb.mxu0 %v5737_v14 }
 0x4fa   :  { %2277 = vmatpush.msrb.mxu1 %v5737_v14  ;;  %2245 = vmatpush.msrb.mxu3 %v5737_v14 }
 0x4fb   :  { %2221 = vmatpush.msrb.mxu2 %v5737_v14  ;;  %2258 = vmatpush.msrb.mxu0 %v5737_v14 }
 0x4fc   :  { %2278 = vmatpush.msrb.mxu1 %v5737_v14  ;;  %2246 = vmatpush.msrb.mxu3 %v5737_v14 }
 0x4fd   :  { %2222 = vmatpush.msrb.mxu2 %v5737_v14  ;;  %2259 = vmatpush.msrb.mxu0 %v5737_v14 }
 0x4fe   :  { %2279 = vmatpush.msrb.mxu1 %v5737_v14  ;;  %2247 = vmatpush.msrb.mxu3 %v5737_v14 }
 0x4ff   :  { %2223 = vmatpush.msrb.mxu2 %v5737_v14  ;;  %2260 = vmatpush.msrb.mxu0 %v5737_v14 }
 0x500   :  { %2280 = vmatpush.msrb.mxu1 %v5737_v14  ;;  %2248 = vmatpush.msrb.mxu3 %v5737_v14 }
 0x501   :  { %2224 = vmatpush.msrb.mxu2 %v5737_v14  ;;  %2261 = vmatpush.msrb.mxu0 %v5737_v14 }
 0x502   :  { %2281 = vmatpush.msrb.mxu1 %v5737_v14  ;;  %2249 = vmatpush.msrb.mxu3 %v5737_v14 }
 0x503   :  { %2225 = vmatpush.msrb.mxu2 %v5737_v14  ;;  %2262 = vmatpush.msrb.mxu0 %v5737_v14 }
 0x504   :  { %2282 = vmatpush.msrb.mxu1 %v5737_v14  ;;  %2250 = vmatpush.msrb.mxu3 %v5737_v14 }
 0x505   :  { %2226 = vmatpush.msrb.mxu2 %v5737_v14  ;;  %2263 = vmatpush.msrb.mxu0 %v5737_v14 }
 0x506   :  { %2283 = vmatpush.msrb.mxu1 %v5737_v14  ;;  %3082 = vmatmul.msk.f32.vlgmr.msra.gmra.mxu2 %vm2119_vm12, %v2118_v45 }
 0x507   :  { %2227 = vmatpush.msrb.mxu2 %v5737_v14  ;;  %2264 = vmatpush.msrb.mxu0 %v5737_v14 }
 0x508   :  { %2284 = vmatpush.msrb.mxu1 %v5737_v14  ;;  %3084 = vmatmul.msk.f32.vlgmr.msra.gmra.mxu3 %vm2119_vm12, %v2118_v45 }
 0x509   :  { %2228 = vmatpush.msrb.mxu2 %v5737_v14  ;;  %2265 = vmatpush.msrb.mxu0 %v5737_v14 }
 0x50a   :  { %2285 = vmatpush.msrb.mxu1 %v5737_v14  ;;  %3086 = vmatmul.msk.f32.vlgmr.msra.gmra.mxu0 %vm2119_vm12, %v2118_v45 }
 0x50b   :  { %2229 = vmatpush.msrb.mxu2 %v5737_v14  ;;  %2266 = vmatpush.msrb.mxu0 %v5737_v14 }
 0x50c   :  { %2286 = vmatpush.msrb.mxu1 %v5737_v14  ;;  %2320 = vmatpush.msra.mxu3 %v5737_v14 }
 0x50d   :  { %2230 = vmatpush.msrb.mxu2 %v5737_v14  ;;  %2267 = vmatpush.msrb.mxu0 %v5737_v14 }
 0x50e   :  { %2287 = vmatpush.msrb.mxu1 %v5737_v14  ;;  %2321 = vmatpush.msra.mxu3 %v5737_v14 }
 0x50f   :  { %2268 = vmatpush.msrb.mxu0 %v5737_v14  ;;  %3088 = vmatmul.msk.f32.vlgmr.msra.gmra.mxu1 %vm2119_vm12, %v2118_v45 }
 0x510   :  { %2288 = vmatpush.msrb.mxu1 %v5737_v14  ;;  %2300 = vmatpush.msra.mxu2 %v5737_v14 }
 0x511   :  { %2269 = vmatpush.msrb.mxu0 %v5737_v14  ;;  %2322 = vmatpush.msra.mxu3 %v5737_v14 }
 0x512   :  { %2289 = vmatpush.msrb.mxu1 %v5737_v14  ;;  %2301 = vmatpush.msra.mxu2 %v5737_v14 }
 0x513   :  { %2270 = vmatpush.msrb.mxu0 %v5737_v14  ;;  %2323 = vmatpush.msra.mxu3 %v5737_v14 }
 0x514   :  { %2290 = vmatpush.msrb.mxu1 %v5737_v14  ;;  %2302 = vmatpush.msra.mxu2 %v5737_v14 }
 0x515   :  { %2340 = vmatpush.msra.mxu0 %v5737_v14  ;;  %2324 = vmatpush.msra.mxu3 %v5737_v14 }
 0x516   :  { %2360 = vmatpush.msra.mxu1 %v5737_v14  ;;  %2303 = vmatpush.msra.mxu2 %v5737_v14 }
 0x517   :  { %2341 = vmatpush.msra.mxu0 %v5737_v14  ;;  %2325 = vmatpush.msra.mxu3 %v5737_v14 }
 0x518   :  { %2361 = vmatpush.msra.mxu1 %v5737_v14  ;;  %2304 = vmatpush.msra.mxu2 %v5737_v14 }
 0x519   :  { %2342 = vmatpush.msra.mxu0 %v5737_v14  ;;  %2326 = vmatpush.msra.mxu3 %v5737_v14 }
 0x51a   :  { %2362 = vmatpush.msra.mxu1 %v5737_v14  ;;  %2305 = vmatpush.msra.mxu2 %v5737_v14 }
 0x51b   :  { %2343 = vmatpush.msra.mxu0 %v5737_v14  ;;  %2327 = vmatpush.msra.mxu3 %v5737_v14 }
 0x51c   :  { %2363 = vmatpush.msra.mxu1 %v5737_v14  ;;  %2306 = vmatpush.msra.mxu2 %v5737_v14 }
 0x51d   :  { %2344 = vmatpush.msra.mxu0 %v5737_v14  ;;  %2328 = vmatpush.msra.mxu3 %v5737_v14 }
 0x51e   :  { %2364 = vmatpush.msra.mxu1 %v5737_v14  ;;  %2307 = vmatpush.msra.mxu2 %v5737_v14 }
 0x51f   :  { %2345 = vmatpush.msra.mxu0 %v5737_v14  ;;  %2329 = vmatpush.msra.mxu3 %v5737_v14 }
 0x520   :  { %2365 = vmatpush.msra.mxu1 %v5737_v14  ;;  %2308 = vmatpush.msra.mxu2 %v5737_v14 }
 0x521   :  { %2346 = vmatpush.msra.mxu0 %v5737_v14  ;;  %2330 = vmatpush.msra.mxu3 %v5737_v14 }
 0x522   :  { %2366 = vmatpush.msra.mxu1 %v5737_v14  ;;  %2309 = vmatpush.msra.mxu2 %v5737_v14 }
 0x523   :  { %2347 = vmatpush.msra.mxu0 %v5737_v14  ;;  %2331 = vmatpush.msra.mxu3 %v5737_v14 }
 0x524   :  { %2367 = vmatpush.msra.mxu1 %v5737_v14  ;;  %2310 = vmatpush.msra.mxu2 %v5737_v14 }
 0x525   :  { %2348 = vmatpush.msra.mxu0 %v5737_v14  ;;  %2332 = vmatpush.msra.mxu3 %v5737_v14 }
 0x526   :  { %2368 = vmatpush.msra.mxu1 %v5737_v14  ;;  %2311 = vmatpush.msra.mxu2 %v5737_v14 }
 0x527   :  { %2349 = vmatpush.msra.mxu0 %v5737_v14  ;;  %2333 = vmatpush.msra.mxu3 %v5737_v14 }
 0x528   :  { %2369 = vmatpush.msra.mxu1 %v5737_v14  ;;  %2312 = vmatpush.msra.mxu2 %v5737_v14 }
 0x529   :  { %2350 = vmatpush.msra.mxu0 %v5737_v14  ;;  %2334 = vmatpush.msra.mxu3 %v5737_v14 }
 0x52a   :  { %2370 = vmatpush.msra.mxu1 %v5737_v14  ;;  %2313 = vmatpush.msra.mxu2 %v5737_v14 }
 0x52b   :  { %2351 = vmatpush.msra.mxu0 %v5737_v14  ;;  %2335 = vmatpush.msra.mxu3 %v5737_v14 }
 0x52c   :  { %2371 = vmatpush.msra.mxu1 %v5737_v14  ;;  %2314 = vmatpush.msra.mxu2 %v5737_v14 }
 0x52d   :  { %2352 = vmatpush.msra.mxu0 %v5737_v14 }
 0x52e   :  { %2372 = vmatpush.msra.mxu1 %v5737_v14  ;;  %2315 = vmatpush.msra.mxu2 %v5737_v14 }
 0x52f   :  { %2353 = vmatpush.msra.mxu0 %v5737_v14 }
 0x530   :  { %2373 = vmatpush.msra.mxu1 %v5737_v14 }
 0x531   :  { %2354 = vmatpush.msra.mxu0 %v5737_v14 }
 0x532   :  { %2374 = vmatpush.msra.mxu1 %v5737_v14 }
 0x533   :  { %2355 = vmatpush.msra.mxu0 %v5737_v14 }
 0x534   :  { %2375 = vmatpush.msra.mxu1 %v5737_v14 }
 0x55d   :  { %v1939_v43 = vpop.f32.mrf.mxu3 }
 0x565   :  { %v2024_v28 = vpop.f32.mrf.mxu3 }
 0x567   :  { %v1919_v20 = vpop.f32.mrf.mxu2 }
 0x568   :  { %v1940_v9 = vadd.f32 %v1939_v43, %v1919_v20  ;;  %v3169_v20 = vmov 3  }
 0x569   :  { %v1959_v15 = vpop.f32.mrf.mxu0  ;;  %v1979_v39 = vpop.f32.mrf.mxu1  ;;  %3126 = vset.pattern.permute.xlu2 %v3169_v20 }
 0x56a   :  { %v1960_v26 = vadd.f32 %v1959_v15, %v1940_v9 }
 0x56c   :  { %v1980_v11 = vadd.f32 %v1979_v39, %v1960_v26 }
 0x56e   :  { %v1982_v33 = vmul.f32 0.001953125, %v1980_v11 }
 0x570   :  { %v2004_v62 = vpop.f32.mrf.mxu2  ;;  %v2068_v54 = vmul.f32 %v1982_v33, %v1982_v33 }
 0x571   :  { %v2025_v42 = vadd.f32 %v2024_v28, %v2004_v62  ;;  %v2044_v61 = vpop.f32.mrf.mxu0  ;;  %v2064_v25 = vpop.f32.mrf.mxu1 }
 0x573   :  { %v2045_v0 = vadd.f32 %v2044_v61, %v2025_v42 }
 0x575   :  { %v2065_v53 = vadd.f32 %v2064_v25, %v2045_v0 }
 0x577   :  { %v2067_v21 = vmul.f32 0.001953125, %v2065_v53 }
 0x579   :  { %v2069_v17 = vsub.f32 %v2067_v21, %v2068_v54 }
 0x57b   :  { %v2070_v57 = vmax.f32 %v2069_v17, 0.0 }
 0x57d   :  { %v2071_v56 = vadd.f32 1e-05, %v2070_v57 }
 0x57f   :  { %3138 = vrsqrt.f32 %v2071_v56  ;;  %vm2078_vm0 = vweird.f32 %v2071_v56 }
 0x585   :  { %v3139_v48 = vpop.eup %3138 }
 0x586   :  { %v2073_v1 = vmul.f32 %v3139_v48, %v2071_v56  ;;  %vm2079_vm15 = vweird.f32 %v3139_v48 }
 0x587   :  { %vm2080_vm11 = vmor %vm2078_vm0, %vm2079_vm15  ;;  %v5261_v39 = vpop.f32.mrf.mxu0 }
 0x588   :  { %v2074_v24 = vmul.f32 %v3139_v48, %v2073_v1  ;;  %2271 = vmatmul.f32.vlgmr.msrb.gmra.mxu0 %v5261_v39  ;;  %v2298_v28 = vmul.f32 %v5261_v39, %v5261_v39 }
 0x589   :  { %v5267_v11 = vpop.f32.mrf.mxu2 }
 0x58a   :  { %v2075_v36 = vmul.f32 0.5, %v2074_v24  ;;  %2231 = vmatmul.f32.vlgmr.msrb.gmra.mxu2 %v5267_v11  ;;  %v2296_v61 = vmul.f32 %v5267_v11, %v5267_v11 }
 0x58b   :  { %v5269_v62 = vpop.f32.mrf.mxu3 }
 0x58c   :  { %v2076_v58 = vsub.f32 1.5, %v2075_v36  ;;  %v5263_v26 = vpop.f32.mrf.mxu1  ;;  %2251 = vmatmul.f32.vlgmr.msrb.gmra.mxu3 %v5269_v62 }
 0x58d   :  { %2291 = vmatmul.f32.vlgmr.msrb.gmra.mxu1 %v5263_v26  ;;  %v2299_v42 = vmul.f32 %v5263_v26, %v5263_v26 }
 0x58e   :  { %v2077_v63 = vmul.f32 %v3139_v48, %v2076_v58 }
 0x590   :  { %v2081_v3 = vsel %vm2080_vm11, %v3139_v48, %v2077_v63  ;;  %2356 = vmatmul.f32.vlgmr.msra.gmra.mxu0 %v2298_v28 }
 0x591   :  { %2083 = vrot.lane.b32.xlu1 %v2081_v3, %s3165_s8 }
 0x592   :  { %2316 = vmatmul.f32.vlgmr.msra.gmra.mxu2 %v2296_v61 }
 0x595   :  { %2376 = vmatmul.f32.vlgmr.msra.gmra.mxu1 %v2299_v42 }
 0x603   :  { %v2084_v8 = vpop.permute.xlu1 %2083 }
 0x604   :  { %v2086_v59 = vmul.f32 %v5190_v47, %v2084_v8 }
 0x606   :  { %2089 = vperm.xlu1 %3125, %v2086_v59   ;;  %2096 = vrot.lane.b32.xlu2 %v2086_v59, %s3167_s23 }
 0x60a   :  { %v2292_v27 = vpop.f32.mrf.mxu1 }
 0x660   :  { %v2097_v44 = vpop.permute.xlu2 %2096 }
 0x661   :  { %v2099_v43 = vmul.f32 %v2097_v44, %v1982_v33  ;;  %v2297_v33 = vmul.f32 %v5269_v62, %v5269_v62 }
 0x663   :  { %2101 = vrot.lane.b32.xlu0 %v2099_v43, %s3168_s10  ;;  %2336 = vmatmul.f32.vlgmr.msra.gmra.mxu3 %v2297_v33 }
 0x678   :  { %v2090_v0 = vpop.permute.xlu1 %2089 }
 0x679   :  { %v2092_v25 = vmul.f32 %v2090_v0, %v5099_v18  ;;  %v2093_v53 = vmul.f32 %v2090_v0, %v5091_v40  ;;  %v2094_v54 = vmul.f32 %v2090_v0, %v5111_v60  ;;  %v2095_v21 = vmul.f32 %v2090_v0, %v5113_v6  ;;  %v2272_v40 = vpop.f32.mrf.mxu0  ;;  %v2232_v18 = vpop.f32.mrf.mxu2 }
 0x67a   :  { %v2252_v60 = vpop.f32.mrf.mxu3 }
 0x67b   :  { %v2253_v6 = vadd.f32 %v2252_v60, %v2232_v18 }
 0x67d   :  { %v2273_v3 = vadd.f32 %v2272_v40, %v2253_v6 }
 0x67f   :  { %v2293_v8 = vadd.f32 %v2292_v27, %v2273_v3  ;;  %v5745_v27 = vld [vmem:[#allocation8_spill] sm:$0xff] }
 0x681   :  { %v2357_v59 = vpop.f32.mrf.mxu0  ;;  %v2317_v45 = vpop.f32.mrf.mxu2  ;;  %v5313_v43 = vmul.f32 0.001953125, %v2293_v8 }
 0x683   :  { %v2381_v28 = vmul.f32 %v5313_v43, %v5313_v43 }
 0x6d5   :  { %v2102_v9 = vpop.permute.xlu0 %2101 }
 0x6d6   :  { %v2104_v15 = vsub.f32 %v5190_v47, %v2102_v9 }
 0x6d8   :  { %2107 = vperm.xlu2 %3126, %v2104_v15   ;;  %v2377_v15 = vpop.f32.mrf.mxu1 }
 0x6e6   :  { %v2337_v44 = vpop.f32.mrf.mxu3 }
 0x6e7   :  { %v2338_v20 = vadd.f32 %v2337_v44, %v2317_v45 }
 0x6e9   :  { %v2358_v9 = vadd.f32 %v2357_v59, %v2338_v20 }
 0x6eb   :  { %v2378_v42 = vadd.f32 %v2377_v15, %v2358_v9 }
 0x6ed   :  { %v2380_v61 = vmul.f32 0.001953125, %v2378_v42 }
 0x6ef   :  { %v2382_v33 = vsub.f32 %v2380_v61, %v2381_v28  ;;  %v3149_v28 = vld [vmem:[%s5688_s5 + $0x28] ss:$0 sm:$0xff] }
 0x6f1   :  { %v2383_v0 = vmax.f32 %v2382_v33, 0.0  ;;  %v3150_v33 = vld [vmem:[%s5688_s5 + $0x20] ss:$0 sm:$0xff] }
 0x732   :  { %v2108_v17 = vpop.permute.xlu2 %2107 }
 0x733   :  { %v2110_v57 = vadd.f32 %v2108_v17, %v2092_v25  ;;  %v2111_v56 = vadd.f32 %v2108_v17, %v2093_v53  ;;  %v2112_v48 = vadd.f32 %v2108_v17, %v2094_v54  ;;  %v2113_v1 = vadd.f32 %v2108_v17, %v2095_v21 }
 0x734   :  { %v2384_v25 = vadd.f32 1e-05, %v2383_v0 }
 0x735   :  { %v2114_v24 = vmax.f32 %v2110_v57, 0.0  ;;  %v2115_v36 = vmax.f32 %v2111_v56, 0.0  ;;  %v5285_v58 = vmax.f32 %v2112_v48, 0.0  ;;  %v2117_v63 = vmax.f32 %v2113_v1, 0.0 }
 0x736   :  { %3140 = vrsqrt.f32 %v2384_v25  ;;  %vm2391_vm13 = vweird.f32 %v2384_v25 }
 0x737   :  { %2532 = vst [vmem:[#allocation4 + $0xd8] sm:$0xf] %v2114_v24  ;;  %2592 = vrot.lane.b32.xlu2 %v5285_v58, %s3160_s27  ;;  %2590 = vrot.lane.b32.xlu1 %v2115_v36, %s3160_s27 }
 0x738   :  { %2533 = vst [vmem:[#allocation4 + $0x30] sm:$0xf] %v2115_v36  ;;  %2588 = vrot.lane.b32.xlu0 %v2114_v24, %s3160_s27 }
 0x739   :  { %2534 = vst [vmem:[#allocation4 + $0xb0] sm:$0xf] %v5285_v58 }
 0x73a   :  { %2535 = vst [vmem:[#allocation4 + $0x158] sm:$0xf] %v2117_v63 }
 0x73c   :  { %v3141_v53 = vpop.eup %3140 }
 0x73d   :  { %v2386_v54 = vmul.f32 %v3141_v53, %v2384_v25  ;;  %vm2392_vm14 = vweird.f32 %v3141_v53 }
 0x73e   :  { %vm2393_vm15 = vmor %vm2391_vm13, %vm2392_vm14 }
 0x73f   :  { %2624 = vrot.lane.b32.xlu2 %v5285_v58, %s3161_s28  ;;  %2622 = vrot.lane.b32.xlu1 %v2115_v36, %s3161_s28  ;;  %v2387_v21 = vmul.f32 %v3141_v53, %v2386_v54 }
 0x740   :  { %2620 = vrot.lane.b32.xlu0 %v2114_v24, %s3161_s28 }
 0x741   :  { %v2388_v17 = vmul.f32 0.5, %v2387_v21 }
 0x743   :  { %v2389_v57 = vsub.f32 1.5, %v2388_v17 }
 0x745   :  { %v2390_v56 = vmul.f32 %v3141_v53, %v2389_v57 }
 0x747   :  { %2540 = vrot.lane.b32.xlu2 %v5285_v58, %s3158_s0  ;;  %2538 = vrot.lane.b32.xlu1 %v2115_v36, %s3158_s0  ;;  %v2394_v48 = vsel %vm2393_vm15, %v3141_v53, %v2390_v56 }
 0x748   :  { %2536 = vrot.lane.b32.xlu0 %v2114_v24, %s3158_s0 }
 0x74f   :  { %2572 = vrot.lane.b32.xlu2 %v5285_v58, %s3159_s26  ;;  %2570 = vrot.lane.b32.xlu1 %v2115_v36, %s3159_s26 }
 0x750   :  { %2568 = vrot.lane.b32.xlu0 %v2114_v24, %s3159_s26 }
 0x757   :  { %2506 = vrot.lane.b32.xlu2 %v2117_v63, %s3157_s1  ;;  %2502 = vrot.lane.b32.xlu1 %v2115_v36, %s3157_s1 }
 0x758   :  { %2500 = vrot.lane.b32.xlu0 %v2114_v24, %s3157_s1 }
 0x75f   :  { %2454 = vrot.lane.b32.xlu2 %v2117_v63, %s3155_s2  ;;  %2450 = vrot.lane.b32.xlu1 %v2115_v36, %s3155_s2 }
 0x760   :  { %2448 = vrot.lane.b32.xlu0 %v2114_v24, %s3155_s2 }
 0x767   :  { %2486 = vrot.lane.b32.xlu2 %v2117_v63, %s3156_s25  ;;  %2482 = vrot.lane.b32.xlu1 %v2115_v36, %s3156_s25 }
 0x768   :  { %2480 = vrot.lane.b32.xlu0 %v2114_v24, %s3156_s25 }
 0x76f   :  { %2434 = vrot.lane.b32.xlu2 %v2117_v63, %s3154_s21  ;;  %2430 = vrot.lane.b32.xlu1 %v2115_v36, %s3154_s21 }
 0x770   :  { %2428 = vrot.lane.b32.xlu0 %v2114_v24, %s3154_s21 }
 0x777   :  { %2542 = vrot.lane.b32.xlu2 %v2117_v63, %s3158_s0  ;;  %2626 = vrot.lane.b32.xlu1 %v2117_v63, %s3161_s28 }
 0x778   :  { %2594 = vrot.lane.b32.xlu0 %v2117_v63, %s3160_s27 }
 0x77f   :  { %2452 = vrot.lane.b32.xlu2 %v5285_v58, %s3155_s2  ;;  %2504 = vrot.lane.b32.xlu1 %v5285_v58, %s3157_s1  ;;  %s3170_s2 = smov 6  }
 0x780   :  { %2574 = vrot.lane.b32.xlu0 %v2117_v63, %s3159_s26  ;;  %s3171_s26 = smov 122  }
 0x787   :  { %2432 = vrot.lane.b32.xlu1 %v5285_v58, %s3154_s21  ;;  %2396 = vrot.lane.b32.xlu2 %v2394_v48, %s3170_s2 }
 0x788   :  { %2484 = vrot.lane.b32.xlu0 %v5285_v58, %s3156_s25  ;;  %v5744_v58 = vld [vmem:[#allocation9_spill] sm:$0xff] }
 0x791   :  { %v5332_v1 = vpop.permute.xlu2 %2592 }
 0x799   :  { %v5334_v24 = vpop.permute.xlu2 %2624 }
 0x7a1   :  { %v5336_v36 = vpop.permute.xlu2 %2540 }
 0x7a9   :  { %v5338_v63 = vpop.permute.xlu2 %2572  ;;  %v2591_v40 = vpop.permute.xlu1 %2590 }
 0x7aa   :  { %v2597_v18 = vsel %vm907_vm8, %v2591_v40, %v5332_v1  ;;  %v5343_v60 = vpop.permute.xlu0 %2588 }
 0x7ab   :  { %v2601_v6 = vmul.f32 %v2597_v18, %v5744_v58  ;;  %v2598_v3 = vsel %vm907_vm8, %v5343_v60, %v2591_v40 }
 0x7ac   :  { %v2600_v8 = vmul.f32 %v2598_v3, %v5745_v27 }
 0x7ad   :  { %v2609_v59 = vrot.slane %v2601_v6, 4 }
 0x7ae   :  { %v2608_v45 = vrot.slane %v2600_v8, 4 }
 0x7af   :  { %2617 = vst [vmem:[#allocation4 + $0x110] sm:$0xf0] %v2609_v59 }
 0x7b0   :  { %2616 = vst [vmem:[#allocation4 + $0x108] sm:$0xf0] %v2608_v45 }
 0x7b1   :  { %v5350_v44 = vpop.permute.xlu2 %2506  ;;  %v2623_v20 = vpop.permute.xlu1 %2622 }
 0x7b2   :  { %v2629_v9 = vsel %vm955_vm9, %v2623_v20, %v5334_v24  ;;  %v5355_v15 = vpop.permute.xlu0 %2620 }
 0x7b3   :  { %v2633_v42 = vmul.f32 %v3149_v28, %v2629_v9  ;;  %v2630_v61 = vsel %vm955_vm9, %v5355_v15, %v2623_v20 }
 0x7b4   :  { %v2632_v0 = vmul.f32 %v3150_v33, %v2630_v61  ;;  %v5746_v61 = vld [vmem:[#allocation5_spill] sm:$0xff] }
 0x7b5   :  { %2637 = vst [vmem:[#allocation4 + $0x138] sm:$0xf] %v2633_v42 }
 0x7b6   :  { %2636 = vst [vmem:[#allocation4 + $0x188] sm:$0xf] %v2632_v0 }
 0x7b9   :  { %v5366_v25 = vpop.permute.xlu2 %2454  ;;  %v2539_v53 = vpop.permute.xlu1 %2538 }
 0x7ba   :  { %v2545_v54 = vsel %vm823_vm6, %v2539_v53, %v5336_v36  ;;  %v2537_v21 = vpop.permute.xlu0 %2536 }
 0x7bb   :  { %v2549_v17 = vmul.f32 %v2545_v54, %v4070_v46  ;;  %v2546_v57 = vsel %vm823_vm6, %v2537_v21, %v2539_v53 }
 0x7bc   :  { %v2548_v56 = vmul.f32 %v2546_v57, %v4018_v4  ;;  %v2657_v48 = vld [vmem:[#allocation4 + $0x138] sm:$0xf] }
 0x7bd   :  { %v2557_v40 = vrot.slane %v2549_v17, 4  ;;  %v2656_v18 = vld [vmem:[#allocation4 + $0x188] sm:$0xf]  ;;  %3091 = vmatpush.msk.msrb.mxu3 %vm149_vm1, %v2657_v48 }
 0x7be   :  { %v2556_v58 = vrot.slane %v2548_v56, 4  ;;  %3089 = vmatpush.msk.msrb.mxu2 %vm149_vm1, %v2656_v18 }
 0x7bf   :  { %2565 = vst [vmem:[#allocation4 + $0x30] sm:$0xf0] %v2557_v40 }
 0x7c0   :  { %2564 = vst [vmem:[#allocation4 + $0xd8] sm:$0xf0] %v2556_v58 }
 0x7c1   :  { %v5377_v6 = vpop.permute.xlu2 %2486  ;;  %v2571_v3 = vpop.permute.xlu1 %2570 }
 0x7c2   :  { %v2577_v46 = vsel %vm871_vm7, %v2571_v3, %v5338_v63  ;;  %v5382_v27 = vpop.permute.xlu0 %2568 }
 0x7c3   :  { %v2581_v4 = vmul.f32 %v2577_v46, %v4103_v12  ;;  %v2578_v8 = vsel %vm871_vm7, %v5382_v27, %v2571_v3 }
 0x7c4   :  { %v2580_v59 = vmul.f32 %v2578_v8, %v4037_v29 }
 0x7c5   :  { %2585 = vst [vmem:[#allocation4 + $0x110] sm:$0xf] %v2581_v4 }
 0x7c6   :  { %2584 = vst [vmem:[#allocation4 + $0x108] sm:$0xf] %v2580_v59  ;;  %v2649_v17 = vld [vmem:[#allocation4 + $0x30] sm:$0xff] }
 0x7c7   :  { %v2648_v57 = vld [vmem:[#allocation4 + $0xd8] sm:$0xff] }
 0x7c9   :  { %v5389_v45 = vpop.permute.xlu2 %2434  ;;  %v5391_v20 = vpop.permute.xlu1 %2502 }
 0x7ca   :  { %v2501_v9 = vpop.permute.xlu0 %2500 }
 0x7cb   :  { %v2510_v28 = vsel %vm760_vm5, %v2501_v9, %v5391_v20  ;;  %v2511_v12 = vsel %vm760_vm5, %v5350_v44, %v2501_v9 }
 0x7cc   :  { %v2512_v42 = vmul.f32 %v2511_v12, %v4031_v30  ;;  %v2513_v33 = vmul.f32 %v2510_v28, %v5746_v61  ;;  %v2653_v29 = vld [vmem:[#allocation4 + $0x110] sm:$0xff] }
 0x7cd   :  { %v2652_v0 = vld [vmem:[#allocation4 + $0x108] sm:$0xff]  ;;  %2707 = vmatpush.msrb.mxu3 %v2653_v29 }
 0x7ce   :  { %v2520_v53 = vrot.slane %v2512_v42, 4  ;;  %v2521_v54 = vrot.slane %v2513_v33, 4  ;;  %2687 = vmatpush.msrb.mxu2 %v2652_v0 }
 0x7cf   :  { %2708 = vmatpush.msrb.mxu3 %v2649_v17 }
 0x7d0   :  { %2528 = vst [vmem:[#allocation4 + $0xe8] sm:$0xf0] %v2520_v53  ;;  %2688 = vmatpush.msrb.mxu2 %v2648_v57 }
 0x7d1   :  { %2529 = vst [vmem:[#allocation4 + $0x68] sm:$0xf0] %v2521_v54  ;;  %v2543_v56 = vpop.permute.xlu2 %2542  ;;  %v2451_v48 = vpop.permute.xlu1 %2450 }
 0x7d2   :  { %v2544_v30 = vsel %vm823_vm6, %v5336_v36, %v2543_v56  ;;  %v2547_v40 = vsel %vm823_vm6, %v2543_v56, %v2537_v21  ;;  %v2449_v18 = vpop.permute.xlu0 %2448 }
 0x7d3   :  { %v2550_v58 = vmul.f32 %v2544_v30, %v4158_v23  ;;  %v2551_v3 = vmul.f32 %v2547_v40, %v4161_v5  ;;  %v2458_v46 = vsel %vm676_vm3, %v2449_v18, %v2451_v48  ;;  %v2459_v4 = vsel %vm676_vm3, %v5366_v25, %v2449_v18 }
 0x7d4   :  { %v2460_v8 = vmul.f32 %v2459_v4, %v4003_v7  ;;  %v2461_v59 = vmul.f32 %v2458_v46, %v3960_v41  ;;  %v3152_v46 = vld [vmem:[%s5688_s5 + $0x38] ss:$0 sm:$0xff] }
 0x7d5   :  { %v2558_v36 = vrot.slane %v2550_v58, 4  ;;  %v2559_v9 = vrot.slane %v2551_v3, 4 }
 0x7d6   :  { %v2468_v28 = vrot.slane %v2460_v8, 4  ;;  %v2469_v21 = vrot.slane %v2461_v59, 4 }
 0x7d7   :  { %2566 = vst [vmem:[#allocation4 + $0xb0] sm:$0xf0] %v2558_v36  ;;  %v5469_v36 = vld [vmem:[%s5693_s9] sm:$0xf]  ;;  %s3173_s9 = smov 7  }
 0x7d8   :  { %2567 = vst [vmem:[#allocation4 + $0x158] sm:$0xf0] %v2559_v9 }
 0x7d9   :  { %2476 = vst [vmem:[#allocation4 + $0x100] sm:$0xf0] %v2468_v28  ;;  %v2453_v23 = vpop.permute.xlu2 %2452  ;;  %v5415_v5 = vpop.permute.xlu1 %2482 }
 0x7da   :  { %2477 = vst [vmem:[#allocation4 + $0x18] sm:$0xf0] %v2469_v21  ;;  %v2456_v12 = vsel %vm676_vm3, %v2453_v23, %v5366_v25  ;;  %v2457_v7 = vsel %vm676_vm3, %v2451_v48, %v2453_v23  ;;  %v2481_v42 = vpop.permute.xlu0 %2480 }
 0x7db   :  { %v2462_v41 = vmul.f32 %v2457_v7, %v4201_v31  ;;  %v2463_v61 = vmul.f32 %v2456_v12, %v5732_v22  ;;  %v2490_v33 = vsel %vm724_vm4, %v2481_v42, %v5415_v5  ;;  %v2491_v29 = vsel %vm724_vm4, %v5377_v6, %v2481_v42 }
 0x7dc   :  { %v2492_v0 = vmul.f32 %v2491_v29, %v4012_v2  ;;  %v2493_v54 = vmul.f32 %v2490_v33, %v3974_v49 }
 0x7dd   :  { %v2470_v53 = vrot.slane %v2462_v41, 4  ;;  %v2471_v25 = vrot.slane %v2463_v61, 4 }
 0x7de   :  { %2496 = vst [vmem:[#allocation4 + $0xe8] sm:$0xf] %v2492_v0 }
 0x7df   :  { %2478 = vst [vmem:[#allocation4 + $0x150] sm:$0xf0] %v2470_v53 }
 0x7e0   :  { %2479 = vst [vmem:[#allocation4 + $0xe0] sm:$0xf0] %v2471_v25 }
 0x7e1   :  { %2497 = vst [vmem:[#allocation4 + $0x68] sm:$0xf] %v2493_v54  ;;  %v5432_v31 = vpop.permute.xlu1 %2430  ;;  %v2397_v49 = vpop.permute.xlu2 %2396 }
 0x7e2   :  { %v2429_v22 = vpop.permute.xlu0 %2428  ;;  %v5443_v30 = vmul.f32 %v5190_v47, %v2397_v49  ;;  %v3151_v47 = vld [vmem:[%s5688_s5 + $0x30] ss:$0 sm:$0xff]  ;;  %s3172_s5 = smov 4  }
 0x7e3   :  { %v2438_v17 = vsel %vm640_vm2, %v2429_v22, %v5432_v31  ;;  %v2439_v57 = vsel %vm640_vm2, %v5389_v45, %v2429_v22 }
 0x7e4   :  { %v2440_v2 = vmul.f32 %v2439_v57, %v4132_v13  ;;  %v2441_v56 = vmul.f32 %v2438_v17, %v3944_v34  ;;  %2409 = vrot.lane.b32.xlu1 %v5443_v30, %s3171_s26 }
 0x7e5   :  { %v2644_v48 = vld [vmem:[#allocation4 + $0xe8] sm:$0xff] }
 0x7e6   :  { %2444 = vst [vmem:[#allocation4 + $0x100] sm:$0xf] %v2440_v2  ;;  %2689 = vmatpush.msrb.mxu2 %v2644_v48 }
 0x7e7   :  { %2445 = vst [vmem:[#allocation4 + $0x18] sm:$0xf] %v2441_v56 }
 0x7e8   :  { %v2645_v40 = vld [vmem:[#allocation4 + $0x68] sm:$0xff] }
 0x7e9   :  { %2709 = vmatpush.msrb.mxu3 %v2645_v40  ;;  %v2627_v18 = vpop.permute.xlu1 %2626 }
 0x7ea   :  { %v2628_v13 = vsel %vm955_vm9, %v5334_v24, %v2627_v18  ;;  %v2631_v34 = vsel %vm955_vm9, %v2627_v18, %v5355_v15  ;;  %v2595_v58 = vpop.permute.xlu0 %2594 }
 0x7eb   :  { %v2634_v3 = vmul.f32 %v3151_v47, %v2628_v13  ;;  %v2635_v4 = vmul.f32 %v3152_v46, %v2631_v34  ;;  %v2596_v8 = vsel %vm907_vm8, %v5332_v1, %v2595_v58  ;;  %v2599_v24 = vsel %vm907_vm8, %v2595_v58, %v5343_v60 }
 0x7ec   :  { %v2602_v15 = vmul.f32 %v2596_v8, %v4164_v35  ;;  %v2603_v59 = vmul.f32 %v2599_v24, %v4155_v37 }
 0x7ed   :  { %2638 = vst [vmem:[#allocation4 + $0x1b8] sm:$0xf] %v2634_v3  ;;  %v2640_v9 = vld [vmem:[#allocation4 + $0x100] sm:$0xff] }
 0x7ee   :  { %2639 = vst [vmem:[#allocation4 + $0xc8] sm:$0xf] %v2635_v4  ;;  %v2610_v28 = vrot.slane %v2602_v15, 4  ;;  %v2611_v21 = vrot.slane %v2603_v59, 4  ;;  %2690 = vmatpush.msrb.mxu2 %v2640_v9  ;;  %v2641_v1 = vld [vmem:[#allocation4 + $0x18] sm:$0xff] }
 0x7ef   :  { %2710 = vmatpush.msrb.mxu3 %v2641_v1  ;;  %3090 = vmatmul.msk.f32.vlgmr.msrb.gmra.mxu2 %vm992_vm10, %v5469_v36 }
 0x7f0   :  { %2618 = vst [vmem:[#allocation4 + $0x50] sm:$0xf0] %v2610_v28  ;;  %3092 = vmatmul.msk.f32.vlgmr.msrb.gmra.mxu3 %vm992_vm10, %v5469_v36  ;;  %2755 = vmatpush.msra.mxu2 %v5737_v14 }
 0x7f1   :  { %2619 = vst [vmem:[#allocation4 + $0x178] sm:$0xf0] %v2611_v21  ;;  %v2505_v37 = vpop.permute.xlu1 %2504  ;;  %2775 = vmatpush.msra.mxu3 %v5737_v14 }
 0x7f2   :  { %v2508_v35 = vsel %vm760_vm5, %v2505_v37, %v5350_v44  ;;  %v2509_v60 = vsel %vm760_vm5, %v5391_v20, %v2505_v37  ;;  %v2575_v23 = vpop.permute.xlu0 %2574  ;;  %2756 = vmatpush.msra.mxu2 %v5737_v14 }
 0x7f3   :  { %v2514_v12 = vmul.f32 %v2509_v60, %v4207_v19  ;;  %v2515_v7 = vmul.f32 %v2508_v35, %v4210_v38  ;;  %v2576_v42 = vsel %vm871_vm7, %v5338_v63, %v2575_v23  ;;  %v2579_v41 = vsel %vm871_vm7, %v2575_v23, %v5382_v27  ;;  %2776 = vmatpush.msra.mxu3 %v5737_v14 }
 0x7f4   :  { %v2582_v44 = vmul.f32 %v2576_v42, %v5734_v16  ;;  %v2658_v20 = vld [vmem:[#allocation4 + $0x1b8] sm:$0xf]  ;;  %2757 = vmatpush.msra.mxu2 %v5737_v14  ;;  %v2583_v19 = vmul.f32 %v2579_v41, %v5735_v32 }
 0x7f5   :  { %v2522_v61 = vrot.slane %v2514_v12, 4  ;;  %v2523_v33 = vrot.slane %v2515_v7, 4  ;;  %3093 = vmatpush.msk.msrb.mxu0 %vm149_vm1, %v2658_v20  ;;  %v2659_v38 = vld [vmem:[#allocation4 + $0xc8] sm:$0xf]  ;;  %2777 = vmatpush.msra.mxu3 %v5737_v14 }
 0x7f6   :  { %2586 = vst [vmem:[#allocation4 + $0x50] sm:$0xf] %v2582_v44  ;;  %3095 = vmatpush.msk.msrb.mxu1 %vm149_vm1, %v2659_v38  ;;  %2758 = vmatpush.msra.mxu2 %v5737_v14 }
 0x7f7   :  { %2530 = vst [vmem:[#allocation4 + $0xf0] sm:$0xf0] %v2522_v61  ;;  %2778 = vmatpush.msra.mxu3 %v5737_v14 }
 0x7f8   :  { %2531 = vst [vmem:[#allocation4 + $0x120] sm:$0xf0] %v2523_v33  ;;  %2759 = vmatpush.msra.mxu2 %v5737_v14  ;;  %v3174_v33 = vmov 4  }
 0x7f9   :  { %2587 = vst [vmem:[#allocation4 + $0x178] sm:$0xf] %v2583_v19  ;;  %v2433_v16 = vpop.permute.xlu1 %2432  ;;  %2779 = vmatpush.msra.mxu3 %v5737_v14  ;;  %3128 = vset.pattern.permute.xlu0 %v3174_v33  ;;  %v3175_v19 = vmov 6  }
 0x7fa   :  { %v2436_v32 = vsel %vm640_vm2, %v2433_v16, %v5389_v45  ;;  %v2437_v63 = vsel %vm640_vm2, %v5432_v31, %v2433_v16  ;;  %v2485_v27 = vpop.permute.xlu0 %2484  ;;  %2760 = vmatpush.msra.mxu2 %v5737_v14  ;;  %3127 = vset.pattern.permute.xlu2 %v3175_v19  ;;  %v3153_v16 = vld [vmem:[%s5690_s11] sm:$0xf] }
 0x7fb   :  { %v2442_v29 = vmul.f32 %v2437_v63, %v5733_v55  ;;  %v2443_v0 = vmul.f32 %v2436_v32, %v5736_v51  ;;  %v2488_v53 = vsel %vm724_vm4, %v2485_v27, %v5377_v6  ;;  %v2489_v25 = vsel %vm724_vm4, %v5415_v5, %v2485_v27  ;;  %2780 = vmatpush.msra.mxu3 %v5737_v14  ;;  %v2650_v51 = vld [vmem:[#allocation4 + $0xb0] sm:$0xff] }
 0x7fc   :  { %v2494_v45 = vmul.f32 %v2489_v25, %v5738_v52  ;;  %v2495_v54 = vmul.f32 %v2488_v53, %v5739_v50  ;;  %2761 = vmatpush.msra.mxu2 %v5737_v14  ;;  %v2651_v52 = vld [vmem:[#allocation4 + $0x158] sm:$0xff]  ;;  %v3177_v63 = vmov 7   ;;  %v3179_v53 = vmov 5  }
 0x7fd   :  { %2446 = vst [vmem:[#allocation4 + $0x150] sm:$0xf] %v2442_v29  ;;  %v2654_v55 = vld [vmem:[#allocation4 + $0x50] sm:$0xff]  ;;  %2781 = vmatpush.msra.mxu3 %v5737_v14  ;;  %3129 = vset.pattern.permute.xlu1 %v3177_v63 }
 0x7fe   :  { %2447 = vst [vmem:[#allocation4 + $0xe0] sm:$0xf] %v2443_v0  ;;  %2727 = vmatpush.msrb.mxu0 %v2654_v55  ;;  %2762 = vmatpush.msra.mxu2 %v5737_v14 }
 0x7ff   :  { %2498 = vst [vmem:[#allocation4 + $0xf0] sm:$0xf] %v2494_v45  ;;  %2782 = vmatpush.msra.mxu3 %v5737_v14 }
 0x800   :  { %2499 = vst [vmem:[#allocation4 + $0x120] sm:$0xf] %v2495_v54  ;;  %v2655_v10 = vld [vmem:[#allocation4 + $0x178] sm:$0xff]  ;;  %2728 = vmatpush.msrb.mxu0 %v2650_v51  ;;  %2763 = vmatpush.msra.mxu2 %v5737_v14 }
 0x801   :  { %2747 = vmatpush.msrb.mxu1 %v2655_v10  ;;  %2783 = vmatpush.msra.mxu3 %v5737_v14 }
 0x802   :  { %2764 = vmatpush.msra.mxu2 %v5737_v14 }
 0x803   :  { %2748 = vmatpush.msrb.mxu1 %v2651_v52  ;;  %2784 = vmatpush.msra.mxu3 %v5737_v14 }
 0x804   :  { %2765 = vmatpush.msra.mxu2 %v5737_v14  ;;  %v2642_v5 = vld [vmem:[#allocation4 + $0x150] sm:$0xff] }
 0x805   :  { %2785 = vmatpush.msra.mxu3 %v5737_v14  ;;  %v2643_v31 = vld [vmem:[#allocation4 + $0xe0] sm:$0xff] }
 0x806   :  { %v2646_v50 = vld [vmem:[#allocation4 + $0xf0] sm:$0xff]  ;;  %2766 = vmatpush.msra.mxu2 %v5737_v14 }
 0x807   :  { %2729 = vmatpush.msrb.mxu0 %v2646_v50  ;;  %v2647_v6 = vld [vmem:[#allocation4 + $0x120] sm:$0xff]  ;;  %2786 = vmatpush.msra.mxu3 %v5737_v14 }
 0x808   :  { %2749 = vmatpush.msrb.mxu1 %v2647_v6  ;;  %2767 = vmatpush.msra.mxu2 %v5737_v14 }
 0x809   :  { %2730 = vmatpush.msrb.mxu0 %v2642_v5  ;;  %2787 = vmatpush.msra.mxu3 %v5737_v14 }
 0x80a   :  { %2750 = vmatpush.msrb.mxu1 %v2643_v31  ;;  %3094 = vmatmul.msk.f32.vlgmr.msrb.gmra.mxu0 %vm992_vm10, %v5469_v36 }
 0x80b   :  { %3096 = vmatmul.msk.f32.vlgmr.msrb.gmra.mxu1 %vm992_vm10, %v5469_v36  ;;  %2795 = vmatpush.msra.mxu0 %v5737_v14 }
 0x80c   :  { %2815 = vmatpush.msra.mxu1 %v5737_v14  ;;  %2768 = vmatpush.msra.mxu2 %v5737_v14 }
 0x80d   :  { %2796 = vmatpush.msra.mxu0 %v5737_v14  ;;  %2788 = vmatpush.msra.mxu3 %v5737_v14 }
 0x80e   :  { %2816 = vmatpush.msra.mxu1 %v5737_v14  ;;  %2769 = vmatpush.msra.mxu2 %v5737_v14 }
 0x80f   :  { %2797 = vmatpush.msra.mxu0 %v5737_v14  ;;  %2789 = vmatpush.msra.mxu3 %v5737_v14 }
 0x810   :  { %2817 = vmatpush.msra.mxu1 %v5737_v14  ;;  %2770 = vmatpush.msra.mxu2 %v5737_v14 }
 0x811   :  { %2798 = vmatpush.msra.mxu0 %v5737_v14  ;;  %2790 = vmatpush.msra.mxu3 %v5737_v14 }
 0x812   :  { %2818 = vmatpush.msra.mxu1 %v5737_v14  ;;  %2840 = vmatpush.msrb.mxu2 %v5737_v14 }
 0x813   :  { %2799 = vmatpush.msra.mxu0 %v5737_v14  ;;  %2860 = vmatpush.msrb.mxu3 %v5737_v14 }
 0x814   :  { %2819 = vmatpush.msra.mxu1 %v5737_v14  ;;  %2841 = vmatpush.msrb.mxu2 %v5737_v14 }
 0x815   :  { %2800 = vmatpush.msra.mxu0 %v5737_v14  ;;  %2861 = vmatpush.msrb.mxu3 %v5737_v14 }
 0x816   :  { %2820 = vmatpush.msra.mxu1 %v5737_v14  ;;  %2842 = vmatpush.msrb.mxu2 %v5737_v14 }
 0x817   :  { %2801 = vmatpush.msra.mxu0 %v5737_v14  ;;  %2862 = vmatpush.msrb.mxu3 %v5737_v14 }
 0x818   :  { %2821 = vmatpush.msra.mxu1 %v5737_v14  ;;  %2843 = vmatpush.msrb.mxu2 %v5737_v14 }
 0x819   :  { %2802 = vmatpush.msra.mxu0 %v5737_v14  ;;  %2863 = vmatpush.msrb.mxu3 %v5737_v14 }
 0x81a   :  { %2822 = vmatpush.msra.mxu1 %v5737_v14  ;;  %2844 = vmatpush.msrb.mxu2 %v5737_v14 }
 0x81b   :  { %2803 = vmatpush.msra.mxu0 %v5737_v14  ;;  %2864 = vmatpush.msrb.mxu3 %v5737_v14 }
 0x81c   :  { %2823 = vmatpush.msra.mxu1 %v5737_v14  ;;  %2845 = vmatpush.msrb.mxu2 %v5737_v14 }
 0x81d   :  { %2804 = vmatpush.msra.mxu0 %v5737_v14  ;;  %2865 = vmatpush.msrb.mxu3 %v5737_v14 }
 0x81e   :  { %2824 = vmatpush.msra.mxu1 %v5737_v14  ;;  %2846 = vmatpush.msrb.mxu2 %v5737_v14 }
 0x81f   :  { %2805 = vmatpush.msra.mxu0 %v5737_v14  ;;  %2866 = vmatpush.msrb.mxu3 %v5737_v14 }
 0x820   :  { %2825 = vmatpush.msra.mxu1 %v5737_v14  ;;  %2847 = vmatpush.msrb.mxu2 %v5737_v14 }
 0x821   :  { %2806 = vmatpush.msra.mxu0 %v5737_v14  ;;  %2867 = vmatpush.msrb.mxu3 %v5737_v14 }
 0x822   :  { %2826 = vmatpush.msra.mxu1 %v5737_v14  ;;  %2848 = vmatpush.msrb.mxu2 %v5737_v14 }
 0x823   :  { %2807 = vmatpush.msra.mxu0 %v5737_v14  ;;  %2868 = vmatpush.msrb.mxu3 %v5737_v14 }
 0x824   :  { %2827 = vmatpush.msra.mxu1 %v5737_v14  ;;  %2849 = vmatpush.msrb.mxu2 %v5737_v14 }
 0x825   :  { %2808 = vmatpush.msra.mxu0 %v5737_v14  ;;  %2869 = vmatpush.msrb.mxu3 %v5737_v14 }
 0x826   :  { %2828 = vmatpush.msra.mxu1 %v5737_v14  ;;  %2850 = vmatpush.msrb.mxu2 %v5737_v14 }
 0x827   :  { %2809 = vmatpush.msra.mxu0 %v5737_v14  ;;  %2870 = vmatpush.msrb.mxu3 %v5737_v14 }
 0x828   :  { %2829 = vmatpush.msra.mxu1 %v5737_v14  ;;  %2851 = vmatpush.msrb.mxu2 %v5737_v14 }
 0x829   :  { %2810 = vmatpush.msra.mxu0 %v5737_v14  ;;  %2871 = vmatpush.msrb.mxu3 %v5737_v14 }
 0x82a   :  { %2830 = vmatpush.msra.mxu1 %v5737_v14  ;;  %2852 = vmatpush.msrb.mxu2 %v5737_v14 }
 0x82b   :  { %2880 = vmatpush.msrb.mxu0 %v5737_v14  ;;  %2872 = vmatpush.msrb.mxu3 %v5737_v14 }
 0x82c   :  { %2900 = vmatpush.msrb.mxu1 %v5737_v14  ;;  %2853 = vmatpush.msrb.mxu2 %v5737_v14 }
 0x82d   :  { %2881 = vmatpush.msrb.mxu0 %v5737_v14  ;;  %2873 = vmatpush.msrb.mxu3 %v5737_v14 }
 0x82e   :  { %2901 = vmatpush.msrb.mxu1 %v5737_v14  ;;  %2854 = vmatpush.msrb.mxu2 %v5737_v14 }
 0x82f   :  { %2882 = vmatpush.msrb.mxu0 %v5737_v14  ;;  %2874 = vmatpush.msrb.mxu3 %v5737_v14 }
 0x830   :  { %2902 = vmatpush.msrb.mxu1 %v5737_v14  ;;  %2855 = vmatpush.msrb.mxu2 %v5737_v14 }
 0x831   :  { %2883 = vmatpush.msrb.mxu0 %v5737_v14  ;;  %2875 = vmatpush.msrb.mxu3 %v5737_v14 }
 0x832   :  { %2903 = vmatpush.msrb.mxu1 %v5737_v14 }
 0x833   :  { %2884 = vmatpush.msrb.mxu0 %v5737_v14 }
 0x834   :  { %2904 = vmatpush.msrb.mxu1 %v5737_v14 }
 0x835   :  { %2885 = vmatpush.msrb.mxu0 %v5737_v14 }
 0x836   :  { %2905 = vmatpush.msrb.mxu1 %v5737_v14 }
 0x837   :  { %2886 = vmatpush.msrb.mxu0 %v5737_v14 }
 0x838   :  { %2906 = vmatpush.msrb.mxu1 %v5737_v14 }
 0x839   :  { %2887 = vmatpush.msrb.mxu0 %v5737_v14 }
 0x83a   :  { %2907 = vmatpush.msrb.mxu1 %v5737_v14 }
 0x83b   :  { %2888 = vmatpush.msrb.mxu0 %v5737_v14 }
 0x83c   :  { %2908 = vmatpush.msrb.mxu1 %v5737_v14 }
 0x83d   :  { %2889 = vmatpush.msrb.mxu0 %v5737_v14 }
 0x83e   :  { %2909 = vmatpush.msrb.mxu1 %v5737_v14 }
 0x83f   :  { %2890 = vmatpush.msrb.mxu0 %v5737_v14 }
 0x840   :  { %2910 = vmatpush.msrb.mxu1 %v5737_v14 }
 0x841   :  { %2891 = vmatpush.msrb.mxu0 %v5737_v14 }
 0x842   :  { %2911 = vmatpush.msrb.mxu1 %v5737_v14 }
 0x843   :  { %2892 = vmatpush.msrb.mxu0 %v5737_v14 }
 0x844   :  { %2912 = vmatpush.msrb.mxu1 %v5737_v14 }
 0x845   :  { %2893 = vmatpush.msrb.mxu0 %v5737_v14 }
 0x846   :  { %2913 = vmatpush.msrb.mxu1 %v5737_v14 }
 0x847   :  { %2894 = vmatpush.msrb.mxu0 %v5737_v14 }
 0x848   :  { %2914 = vmatpush.msrb.mxu1 %v5737_v14 }
 0x849   :  { %2895 = vmatpush.msrb.mxu0 %v5737_v14 }
 0x84a   :  { %2915 = vmatpush.msrb.mxu1 %v5737_v14 }
 0x856   :  { %v2410_v20 = vpop.permute.xlu1 %2409 }
 0x857   :  { %v2412_v61 = vmul.f32 %v2410_v20, %v5313_v43 }
 0x872   :  { %v5641_v22 = vpop.f32.mrf.mxu2 }
 0x873   :  { %v5643_v17 = vpop.f32.mrf.mxu3  ;;  %2771 = vmatmul.f32.vlgmr.msra.gmra.mxu2 %v5641_v22  ;;  %v2836_v57 = vmul.f32 %v5641_v22, %v5641_v22 }
 0x874   :  { %2791 = vmatmul.f32.vlgmr.msra.gmra.mxu3 %v5643_v17  ;;  %v2837_v2 = vmul.f32 %v5643_v17, %v5643_v17 }
 0x87b   :  { %2856 = vmatmul.f32.vlgmr.msrb.gmra.mxu2 %v2836_v57 }
 0x87c   :  { %2876 = vmatmul.f32.vlgmr.msrb.gmra.mxu3 %v2837_v2 }
 0x887   :  { %v5651_v56 = vpop.f32.mrf.mxu0 }
 0x888   :  { %2811 = vmatmul.f32.vlgmr.msra.gmra.mxu0 %v5651_v56  ;;  %v5654_v14 = vpop.f32.mrf.mxu1  ;;  %v2838_v49 = vmul.f32 %v5651_v56, %v5651_v56 }
 0x889   :  { %2831 = vmatmul.f32.vlgmr.msra.gmra.mxu1 %v5654_v14  ;;  %v2839_v48 = vmul.f32 %v5654_v14, %v5654_v14 }
 0x890   :  { %2896 = vmatmul.f32.vlgmr.msrb.gmra.mxu0 %v2838_v49 }
 0x891   :  { %2916 = vmatmul.f32.vlgmr.msrb.gmra.mxu1 %v2839_v48 }
 0x8f6   :  { %v2772_v40 = vpop.f32.mrf.mxu2 }
 0x8f7   :  { %v2792_v18 = vpop.f32.mrf.mxu3 }
 0x8f8   :  { %v2793_v13 = vadd.f32 %v2792_v18, %v2772_v40 }
 0x8fe   :  { %v2857_v3 = vpop.f32.mrf.mxu2 }
 0x8ff   :  { %v2877_v46 = vpop.f32.mrf.mxu3 }
 0x900   :  { %v2878_v8 = vadd.f32 %v2877_v46, %v2857_v3 }
 0x905   :  { %v2812_v34 = vpop.f32.mrf.mxu0 }
 0x906   :  { %v2813_v58 = vadd.f32 %v2812_v34, %v2793_v13  ;;  %v2832_v47 = vpop.f32.mrf.mxu1 }
 0x908   :  { %v2833_v4 = vadd.f32 %v2832_v47, %v2813_v58 }
 0x90a   :  { %v2835_v15 = vmul.f32 0.001953125, %v2833_v4 }
 0x90c   :  { %v2921_v28 = vmul.f32 %v2835_v15, %v2835_v15 }
 0x90d   :  { %v2897_v24 = vpop.f32.mrf.mxu0 }
 0x90e   :  { %v2898_v59 = vadd.f32 %v2897_v24, %v2878_v8  ;;  %v2917_v36 = vpop.f32.mrf.mxu1 }
 0x910   :  { %v2918_v9 = vadd.f32 %v2917_v36, %v2898_v59 }
 0x912   :  { %v2920_v21 = vmul.f32 0.001953125, %v2918_v9 }
 0x914   :  { %v2922_v1 = vsub.f32 %v2920_v21, %v2921_v28 }
 0x916   :  { %v2923_v37 = vmax.f32 %v2922_v1, 0.0 }
 0x918   :  { %v2924_v35 = vadd.f32 1e-05, %v2923_v37 }
 0x91a   :  { %3142 = vrsqrt.f32 %v2924_v35  ;;  %vm2931_vm3 = vweird.f32 %v2924_v35 }
 0x920   :  { %v3143_v60 = vpop.eup %3142 }
 0x921   :  { %v2926_v23 = vmul.f32 %v3143_v60, %v2924_v35  ;;  %vm2932_vm2 = vweird.f32 %v3143_v60 }
 0x922   :  { %vm2933_vm4 = vmor %vm2931_vm3, %vm2932_vm2 }
 0x923   :  { %v2927_v12 = vmul.f32 %v3143_v60, %v2926_v23 }
 0x925   :  { %v2928_v7 = vmul.f32 0.5, %v2927_v12 }
 0x927   :  { %v2929_v42 = vsub.f32 1.5, %v2928_v7 }
 0x929   :  { %v2930_v41 = vmul.f32 %v3143_v60, %v2929_v42 }
 0x92b   :  { %v2934_v44 = vsel %vm2933_vm4, %v3143_v60, %v2930_v41 }
 0x92c   :  { %2936 = vrot.lane.b32.xlu0 %v2934_v44, %s3172_s5 }
 0x934   :  { %2414 = vrot.lane.b32.xlu0 %v2412_v61, %s3173_s9 }
 0x99e   :  { %v2937_v38 = vpop.permute.xlu0 %2936 }
 0x99f   :  { %v2939_v32 = vmul.f32 %v3153_v16, %v2937_v38 }
 0x9a1   :  { %2942 = vperm.xlu0 %3128, %v2939_v32   ;;  %2949 = vrot.lane.b32.xlu2 %v2939_v32, %s3176_s18 }
 0x9a6   :  { %v2415_v29 = vpop.permute.xlu0 %2414 }
 0x9a7   :  { %v2417_v0 = vsub.f32 %v3153_v16, %v2415_v29 }
 0x9a9   :  { %2402 = vperm.xlu2 %3127, %v5443_v30   ;;  %3131 = vset.pattern.permute.xlu0 %v3179_v53 }
 0x9b1   :  { %3130 = vset.pattern.permute.xlu2 %v3179_v53 }
 0x9fb   :  { %v2950_v43 = vpop.permute.xlu2 %2949 }
 0x9fc   :  { %v2952_v27 = vmul.f32 %v2950_v43, %v2835_v15 }
 0x9fe   :  { %2954 = vrot.lane.b32.xlu1 %v2952_v27, %s3178_s19 }
 0xa03   :  { %v2403_v54 = vpop.permute.xlu2 %2402 }
 0xa04   :  { %v2405_v30 = vmul.f32 %v2403_v54, %v5267_v11  ;;  %v2406_v10 = vmul.f32 %v2403_v54, %v5269_v62  ;;  %v2407_v52 = vmul.f32 %v2403_v54, %v5261_v39  ;;  %v2408_v50 = vmul.f32 %v2403_v54, %v5263_v26 }
 0xa06   :  { %2420 = vperm.xlu1 %3129, %v2417_v0  }
 0xa13   :  { %v2943_v55 = vpop.permute.xlu0 %2942 }
 0xa14   :  { %v2945_v6 = vmul.f32 %v2943_v55, %v5641_v22  ;;  %v2946_v5 = vmul.f32 %v2943_v55, %v5643_v17  ;;  %v2947_v31 = vmul.f32 %v2943_v55, %v5651_v56  ;;  %v2948_v57 = vmul.f32 %v2943_v55, %v5654_v14 }
 0xa70   :  { %v2955_v25 = vpop.permute.xlu1 %2954 }
 0xa71   :  { %v2957_v45 = vsub.f32 %v3153_v16, %v2955_v25 }
 0xa73   :  { %2960 = vperm.xlu2 %3130, %v2957_v45  }
 0xa78   :  { %v2421_v51 = vpop.permute.xlu1 %2420 }
 0xa79   :  { %v2423_v2 = vadd.f32 %v2421_v51, %v2405_v30  ;;  %v2424_v49 = vadd.f32 %v2421_v51, %v2406_v10  ;;  %v2425_v48 = vadd.f32 %v2421_v51, %v2407_v52  ;;  %v2426_v40 = vadd.f32 %v2421_v51, %v2408_v50 }
 0xacd   :  { %v2961_v18 = vpop.permute.xlu2 %2960 }
 0xace   :  { %v2963_v11 = vadd.f32 %v2961_v18, %v2945_v6  ;;  %v2964_v13 = vadd.f32 %v2961_v18, %v2946_v5  ;;  %v2965_v62 = vadd.f32 %v2961_v18, %v2947_v31  ;;  %v2966_v34 = vadd.f32 %v2961_v18, %v2948_v57 }
 0xad0   :  { %v2967_v39 = vadd.f32 %v2963_v11, %v2423_v2  ;;  %v2968_v58 = vadd.f32 %v2964_v13, %v2424_v49  ;;  %v2969_v26 = vadd.f32 %v2965_v62, %v2425_v48  ;;  %v2970_v47 = vadd.f32 %v2966_v34, %v2426_v40 }
 0xad2   :  { %v2972_v22 = vmax.f32 %v2968_v58, 0.0  ;;  %v2974_v3 = vmax.f32 %v2970_v47, 0.0  ;;  %v2971_v17 = vmax.f32 %v2967_v39, 0.0  ;;  %v2973_v46 = vmax.f32 %v2969_v26, 0.0 }
 0xad4   :  { %v2979_v56 = vrot.slane %v2972_v22, 4  ;;  %v2980_v4 = vrot.slane %v2974_v3, 4 }
 0xad6   :  { %v2981_v14 = vsel %vm149_vm1, %v2971_v17, %v2979_v56  ;;  %v2982_v8 = vsel %vm149_vm1, %v2973_v46, %v2980_v4 }
 0xad7   :  { %2985 = vst [vmem:[%s5694_s12] sm:$0xff] %v2981_v14 }
 0xad8   :  { %2986 = vst [vmem:[%s5694_s12 + $0x8] sm:$0xff] %v2982_v8 }

</bundles_post_ra>
